<compile_context>
chip_gen: v6e
topology: v6e:2x2x1
jax: 0.10.0
libtpu: 0.0.40
codegen_flags: <defaults>
</compile_context>

<pallas_src>
import math
import functools

import jax
import jax.numpy as jnp
from jax import lax
from jax.experimental import pallas as pl
from jax.experimental.pallas import tpu as pltpu

# ---- config (small, consistent with the module) ----
VOCAB = 64
BLOCK_SIZE = 16
N_LAYER = 2
N_HEAD = 4
N_EMBD = 32
DROPOUT = 0.0          # p = 0 -> dropout is a no-op (eval semantics)
EPS = 1e-5
VPAD = 128             # lm_head vocab dim padded to a full lane width


# ---------------- shared math helpers (used by kernel and reference) ----------------
def _layernorm(x, w, b):
    mean = jnp.mean(x, axis=-1, keepdims=True)
    var = jnp.mean(jnp.square(x - mean), axis=-1, keepdims=True)
    return (x - mean) * lax.rsqrt(var + EPS) * w + b


def _new_gelu(x):
    c = math.sqrt(2.0 / math.pi)
    return 0.5 * x * (1.0 + jnp.tanh(c * (x + 0.044715 * x * x * x)))


# ---------------- fused decoder kernel ----------------
def _decoder_kernel(x_ref, xa_ref,
                    attn_wqkv_ref, attn_bqkv_ref, attn_wo_ref,
                    mlp_wfc_ref, mlp_wpr_ref, mlp_bfc_ref,
                    vec_ref, wlm_ref,
                    o_ref, *, n_layer, n_head, nb):
    x = x_ref[...]                   # (nb*T, C)   decoder activations (row-folded batch)
    xa = xa_ref[...]                 # (nb*Ta, C)  encoder features (row-folded batch)
    C = x.shape[-1]
    T = x.shape[0] // nb
    Ta = xa.shape[0] // nb
    H = n_head
    D = C // H
    F = 4 * C
    scale = 1.0 / math.sqrt(D)

    # Small per-layer vector params (LN scales/biases, attn/mlp proj biases):
    # the whole (7L+2, C) table is loaded once; rows are sliced statically below.
    vec = vec_ref[...]
    bfc_all = mlp_bfc_ref[...]       # (L, 4C)

    # ---- causal mask, built ONCE and reused by every attention in every layer ----
    def make_mask(S):
        row = lax.broadcasted_iota(jnp.int32, (T, S), 0)
        col = lax.broadcasted_iota(jnp.int32, (T, S), 1)
        return row >= col

    mask_self = make_mask(T)
    mask_cross = mask_self if Ta == T else make_mask(Ta)

    def layer_norm(v, row):
        return _layernorm(v, vec[row:row + 1, :], vec[row + 1:row + 2, :])

    def softmax_rows(att):
        att = att - jnp.max(att, axis=-1, keepdims=True)
        e = jnp.exp(att)
        return e * pl.reciprocal(jnp.sum(e, axis=-1, keepdims=True), approx=True)

    def heads_attend(q, k, v, mask):
        # q: (T, C), k/v: (S, C). Static H=4 loop over lane stripes; outputs are
        # concatenated back into a (T, C) head-major slab (matches torch .view(T, C)).
        ys = []
        for h in range(H):
            qh = q[:, h * D:(h + 1) * D]
            kh = k[:, h * D:(h + 1) * D]
            vh = v[:, h * D:(h + 1) * D]
            att = jnp.einsum('td,sd->ts', qh, kh,
                             preferred_element_type=jnp.float32) * scale
            att = jnp.where(mask, att, -1e30)       # finite sentinel (no -inf math)
            p = softmax_rows(att)
            ys.append(jnp.dot(p, vh, preferred_element_type=jnp.float32))
        return jnp.concatenate(ys, axis=-1)          # (T, C)

    def out_proj(per_batch_y, wo, bo_row):
        # single lane-dense (nb*T, C) @ (C, C) matmul for the head-merge projection
        y2 = per_batch_y[0] if nb == 1 else jnp.concatenate(per_batch_y, axis=0)
        return jnp.dot(y2, wo, preferred_element_type=jnp.float32) + vec[bo_row:bo_row + 1, :]

    def self_attention(h2, idx, bo_row):
        # idx is a static python int -> cheap leading-dim ref indexing.
        wqkv = attn_wqkv_ref[idx]                    # (C, 3C)  = [Wq | Wk | Wv]
        bqkv = attn_bqkv_ref[idx:idx + 1, :]         # (1, 3C)
        wo = attn_wo_ref[idx]                        # (C, C)
        # ONE fused lane-dense projection for all rows (all batch elements):
        qkv = jnp.dot(h2, wqkv, preferred_element_type=jnp.float32) + bqkv   # (nb*T, 3C)
        ys = []
        for n in range(nb):                          # static, nb <= B (tiny)
            r = n * T
            q = qkv[r:r + T, 0:C]
            k = qkv[r:r + T, C:2 * C]
            v = qkv[r:r + T, 2 * C:3 * C]
            ys.append(heads_attend(q, k, v, mask_self))
        return out_proj(ys, wo, bo_row)

    def cross_attention(h2, idx, bo_row):
        wqkv = attn_wqkv_ref[idx]                    # (C, 3C)
        bqkv = attn_bqkv_ref[idx:idx + 1, :]         # (1, 3C)
        wo = attn_wo_ref[idx]                        # (C, C)
        # q from the decoder stream, k/v from the (layer-constant) encoder features:
        q2 = jnp.dot(h2, wqkv[:, 0:C],
                     preferred_element_type=jnp.float32) + bqkv[:, 0:C]        # (nb*T, C)
        kv2 = jnp.dot(xa, wqkv[:, C:3 * C],
                      preferred_element_type=jnp.float32) + bqkv[:, C:3 * C]   # (nb*Ta, 2C)
        ys = []
        for n in range(nb):
            q = q2[n * T:(n + 1) * T, :]
            k = kv2[n * Ta:(n + 1) * Ta, 0:C]
            v = kv2[n * Ta:(n + 1) * Ta, C:2 * C]
            ys.append(heads_attend(q, k, v, mask_cross))
        return out_proj(ys, wo, bo_row)

    def mlp(h2, l, bpr_row):
        wfc = mlp_wfc_ref[:, l * F:(l + 1) * F]      # (C, 4C)   (128-aligned lane slice)
        wpr = mlp_wpr_ref[l * F:(l + 1) * F, :]      # (4C, C)   (8-aligned sublane slice)
        hid = jnp.dot(h2, wfc, preferred_element_type=jnp.float32) + bfc_all[l:l + 1, :]
        hid = _new_gelu(hid)
        return jnp.dot(hid, wpr, preferred_element_type=jnp.float32) + vec[bpr_row:bpr_row + 1, :]

    # ---- both transformer blocks, statically unrolled (N_LAYER = 2) ----
    for l in range(n_layer):
        base = 7 * l     # vec rows: ln1_w, ln1_b, ln2_w, ln2_b, bo_self, bo_cross, b_pr
        h2 = layer_norm(x, base)                                             # ln_1
        x = x + self_attention(h2, 2 * l, base + 4)                          # self-attn
        h2 = layer_norm(x, base)                                             # ln_1 (reused, as in the module)
        x = x + cross_attention(h2, 2 * l + 1, base + 5)                     # cross-attn
        h2 = layer_norm(x, base + 2)                                         # ln_2
        x = x + mlp(h2, l, base + 6)                                         # MLP

    # ---- final LN + tied lm_head (vocab padded to 128 lanes for a dense store) ----
    h2 = layer_norm(x, 7 * n_layer)
    o_ref[...] = jnp.dot(h2, wlm_ref[...], preferred_element_type=jnp.float32)


# ---------------- parameter packing (wrapper-side, done once) ----------------
def pack_params(params):
    """Pack the per-layer parameter dicts into a few stacked, lane-dense arrays."""
    C = N_EMBD
    attn_wqkv, attn_bqkv, attn_wo = [], [], []
    mlp_wfc, mlp_wpr, mlp_bfc, vec_rows = [], [], [], []
    for lp in params["layers"]:
        for pre in ("s", "c"):                        # self then cross
            attn_wqkv.append(jnp.concatenate(
                [lp[f"{pre}_wq"], lp[f"{pre}_wk"], lp[f"{pre}_wv"]], axis=1))   # (C, 3C)
            attn_bqkv.append(jnp.concatenate(
                [lp[f"{pre}_bq"], lp[f"{pre}_bk"], lp[f"{pre}_bv"]], axis=0))   # (3C,)
            attn_wo.append(lp[f"{pre}_wo"])                                     # (C, C)
        mlp_wfc.append(lp["w_fc"])
        mlp_wpr.append(lp["w_pr"])
        mlp_bfc.append(lp["b_fc"])
        vec_rows += [lp["ln1_w"], lp["ln1_b"], lp["ln2_w"], lp["ln2_b"],
                     lp["s_bo"], lp["c_bo"], lp["b_pr"]]
    vec_rows += [params["lnf_w"], params["lnf_b"]]
    # tied lm_head: wte.T, vocab padded to 128 lanes (extra logits are zero, sliced off later)
    w_lm = jnp.zeros((C, VPAD), jnp.float32).at[:, :VOCAB].set(params["wte"].T)
    return dict(
        wte=params["wte"], wpe=params["wpe"],
        attn_wqkv=jnp.stack(attn_wqkv),              # (2L, C, 3C)
        attn_bqkv=jnp.stack(attn_bqkv),              # (2L, 3C)   lane-dense bias rows
        attn_wo=jnp.stack(attn_wo),                  # (2L, C, C)
        mlp_wfc=jnp.concatenate(mlp_wfc, axis=1),    # (C, L*4C)
        mlp_wpr=jnp.concatenate(mlp_wpr, axis=0),    # (L*4C, C)
        mlp_bfc=jnp.stack(mlp_bfc),                  # (L, 4C)
        vec=jnp.stack(vec_rows),                     # (7L+2, C)
        w_lm=w_lm,                                   # (C, VPAD)
    )


def _whole(arr):
    nd = arr.ndim
    return pl.BlockSpec(arr.shape, lambda g, _nd=nd: (0,) * _nd)


def _tensorcores_per_chip():
    """Crude generation sniff: dual-TC / megacore chips get grid=(B,) parallel,
    single-TC chips (v5e / v6e) fold the batch into matmul rows instead."""
    kind = jax.devices()[0].device_kind.lower()
    if "lite" in kind or "v5e" in kind or "v6" in kind:
        return 1
    if any(s in kind for s in ("v4", "v5p", "v7", "7x")) or kind.strip() == "tpu v5":
        return 2
    return 1


@functools.partial(jax.jit, static_argnames=("nb",))
def _decoder_forward_impl(idx, xa, packed, *, nb):
    B, T = idx.shape
    Ta = xa.shape[1]
    C = N_EMBD
    tok_emb = jnp.take(packed["wte"], idx, axis=0)           # (B, T, C)
    pos_emb = packed["wpe"][:T][None]                        # (1, T, C)
    x2 = (tok_emb + pos_emb).astype(jnp.float32).reshape(B * T, C)
    xa2 = xa.astype(jnp.float32).reshape(B * Ta, C)

    param_names = ("attn_wqkv", "attn_bqkv", "attn_wo",
                   "mlp_wfc", "mlp_wpr", "mlp_bfc", "vec", "w_lm")
    plist = [packed[k] for k in param_names]

    grid = (B // nb,)
    logits_pad = pl.pallas_call(
        functools.partial(_decoder_kernel, n_layer=N_LAYER, n_head=N_HEAD, nb=nb),
        out_shape=jax.ShapeDtypeStruct((B * T, VPAD), jnp.float32),
        grid=grid,
        in_specs=[pl.BlockSpec((nb * T, C), lambda g: (g, 0)),
                  pl.BlockSpec((nb * Ta, C), lambda g: (g, 0))]
                 + [_whole(p) for p in plist],
        out_specs=pl.BlockSpec((nb * T, VPAD), lambda g: (g, 0)),
        compiler_params=pltpu.CompilerParams(dimension_semantics=("parallel",)),
    )(x2, xa2, *plist)
    return logits_pad[:, :VOCAB].reshape(B, T, VOCAB)


def decoder_forward(idx, xa, packed):
    B = idx.shape[0]
    # single-TC chips: fold the whole batch into matmul rows (1-step grid);
    # dual-TC chips: one batch element per grid step, sharded across TensorCores.
    nb = B if (_tensorcores_per_chip() == 1 or B == 1) else 1
    return _decoder_forward_impl(idx, xa, packed, nb=nb)


# ---------------- pure-JAX reference (mirrors the PyTorch module) ----------------
def _ref_attention(xq, kv, wq, bq, wk, bk, wv, bv, wo, bo):
    Tq, C = xq.shape
    S = kv.shape[0]
    H, D = N_HEAD, C // N_HEAD
    q = (xq @ wq + bq).reshape(Tq, H, D).transpose(1, 0, 2)
    k = (kv @ wk + bk).reshape(S, H, D).transpose(1, 0, 2)
    v = (kv @ wv + bv).reshape(S, H, D).transpose(1, 0, 2)
    att = jnp.einsum('htd,hsd->hts', q, k) / math.sqrt(D)
    mask = jnp.tril(jnp.ones((Tq, S)))[None]
    att = jnp.where(mask == 0, -jnp.inf, att)
    p = jax.nn.softmax(att, axis=-1)
    y = jnp.einsum('hts,hsd->htd', p, v).transpose(1, 0, 2).reshape(Tq, C)
    return y @ wo + bo


def reference_forward(idx, xa, params):
    B, T = idx.shape
    x = jnp.take(params["wte"], idx, axis=0) + params["wpe"][:T][None]
    outs = []
    for b in range(B):
        xb = x[b]
        for lp in params["layers"]:
            h = _layernorm(xb, lp["ln1_w"], lp["ln1_b"])
            xb = xb + _ref_attention(h, h, lp["s_wq"], lp["s_bq"], lp["s_wk"], lp["s_bk"],
                                     lp["s_wv"], lp["s_bv"], lp["s_wo"], lp["s_bo"])
            h = _layernorm(xb, lp["ln1_w"], lp["ln1_b"])
            xb = xb + _ref_attention(h, xa[b], lp["c_wq"], lp["c_bq"], lp["c_wk"], lp["c_bk"],
                                     lp["c_wv"], lp["c_bv"], lp["c_wo"], lp["c_bo"])
            h = _layernorm(xb, lp["ln2_w"], lp["ln2_b"])
            xb = xb + _new_gelu(h @ lp["w_fc"] + lp["b_fc"]) @ lp["w_pr"] + lp["b_pr"]
        xb = _layernorm(xb, params["lnf_w"], params["lnf_b"])
        outs.append(xb @ params["wte"].T)
    return jnp.stack(outs)


# ---------------- deterministic parameter init ----------------
def init_params(key):
    std = 0.02
    proj_std = 0.02 / math.sqrt(2 * N_LAYER)     # c_proj.weight special init
    C = N_EMBD
    keys = jax.random.split(key, 2 + N_LAYER)

    def nrm(k, shape, s=std):
        return jax.random.normal(k, shape, jnp.float32) * s

    wte = nrm(keys[0], (VOCAB, C))
    wpe = nrm(keys[1], (BLOCK_SIZE, C))

    layers = []
    for l in range(N_LAYER):
        lk = jax.random.split(keys[2 + l], 10)
        layers.append(dict(
            ln1_w=jnp.ones((C,), jnp.float32), ln1_b=jnp.zeros((C,), jnp.float32),
            s_wq=nrm(lk[0], (C, C)), s_bq=jnp.zeros((C,), jnp.float32),
            s_wk=nrm(lk[1], (C, C)), s_bk=jnp.zeros((C,), jnp.float32),
            s_wv=nrm(lk[2], (C, C)), s_bv=jnp.zeros((C,), jnp.float32),
            s_wo=nrm(lk[3], (C, C), proj_std), s_bo=jnp.zeros((C,), jnp.float32),
            c_wq=nrm(lk[4], (C, C)), c_bq=jnp.zeros((C,), jnp.float32),
            c_wk=nrm(lk[5], (C, C)), c_bk=jnp.zeros((C,), jnp.float32),
            c_wv=nrm(lk[6], (C, C)), c_bv=jnp.zeros((C,), jnp.float32),
            c_wo=nrm(lk[7], (C, C), proj_std), c_bo=jnp.zeros((C,), jnp.float32),
            ln2_w=jnp.ones((C,), jnp.float32), ln2_b=jnp.zeros((C,), jnp.float32),
            w_fc=nrm(lk[8], (C, 4 * C)), b_fc=jnp.zeros((4 * C,), jnp.float32),
            w_pr=nrm(lk[9], (4 * C, C), proj_std), b_pr=jnp.zeros((C,), jnp.float32),
        ))

    return dict(wte=wte, wpe=wpe, layers=layers,
                lnf_w=jnp.ones((C,), jnp.float32),
                lnf_b=jnp.zeros((C,), jnp.float32))


if __name__ == "__main__":
    key = jax.random.PRNGKey(0)
    k_idx, k_xa, k_par = jax.random.split(key, 3)

    B, T, Ta = 2, 8, 8
    idx = jax.random.randint(k_idx, (B, T), 0, VOCAB, dtype=jnp.int32)
    xa = jax.random.normal(k_xa, (B, Ta, N_EMBD), jnp.float32)
    params = init_params(k_par)
    packed = pack_params(params)

    logits = decoder_forward(idx, xa, packed)
    jax.block_until_ready(logits)

    assert logits.shape == (B, T, VOCAB)
    assert bool(jnp.all(jnp.isfinite(logits)))

    # correctness vs. a plain-JAX reference of the PyTorch module
    ref = reference_forward(idx, xa, params)
    max_diff = float(jnp.max(jnp.abs(logits - ref)))
    assert max_diff < 1e-2, f"mismatch vs reference: {max_diff}"

    print("KERNEL_OK")
</pallas_src>

<mosaic_0001>
module attributes {stable_mosaic.version = 11 : i64} {
  func.func @_decoder_kernel(%arg0: i32, %arg1: memref<16x32xf32, #tpu.memory_space<vmem>>, %arg2: memref<16x32xf32, #tpu.memory_space<vmem>>, %arg3: memref<4x32x96xf32, #tpu.memory_space<vmem>>, %arg4: memref<4x96xf32, #tpu.memory_space<vmem>>, %arg5: memref<4x32x32xf32, #tpu.memory_space<vmem>>, %arg6: memref<32x256xf32, #tpu.memory_space<vmem>>, %arg7: memref<256x32xf32, #tpu.memory_space<vmem>>, %arg8: memref<2x128xf32, #tpu.memory_space<vmem>>, %arg9: memref<16x32xf32, #tpu.memory_space<vmem>>, %arg10: memref<32x128xf32, #tpu.memory_space<vmem>>, %arg11: memref<16x128xf32, #tpu.memory_space<vmem>>) attributes {dimension_semantics = [#tpu.dimension_semantics<parallel>], iteration_bounds = array<i64: 1>, scalar_prefetch = 0 : i64, scratch_operands = 0 : i64, tpu.core_type = #tpu.core_type<tc>, window_params = [{transform_indices = @transform_0, window_bounds = array<i64: 16, 32>}, {transform_indices = @transform_1, window_bounds = array<i64: 16, 32>}, {pipeline_mode = #tpu.pipeline_mode<synchronous>, transform_indices = @transform_2, window_bounds = array<i64: 4, 32, 96>}, {pipeline_mode = #tpu.pipeline_mode<synchronous>, transform_indices = @transform_3, window_bounds = array<i64: 4, 96>}, {pipeline_mode = #tpu.pipeline_mode<synchronous>, transform_indices = @transform_4, window_bounds = array<i64: 4, 32, 32>}, {pipeline_mode = #tpu.pipeline_mode<synchronous>, transform_indices = @transform_5, window_bounds = array<i64: 32, 256>}, {pipeline_mode = #tpu.pipeline_mode<synchronous>, transform_indices = @transform_6, window_bounds = array<i64: 256, 32>}, {pipeline_mode = #tpu.pipeline_mode<synchronous>, transform_indices = @transform_7, window_bounds = array<i64: 2, 128>}, {pipeline_mode = #tpu.pipeline_mode<synchronous>, transform_indices = @transform_8, window_bounds = array<i64: 16, 32>}, {pipeline_mode = #tpu.pipeline_mode<synchronous>, transform_indices = @transform_9, window_bounds = array<i64: 32, 128>}, {transform_indices = @transform_10, window_bounds = array<i64: 16, 128>}]} {
    %c0 = arith.constant 0 : index
    %c0_0 = arith.constant 0 : index
    %0 = vector.load %arg1[%c0, %c0_0] : memref<16x32xf32, #tpu.memory_space<vmem>>, vector<16x32xf32>
    %c0_1 = arith.constant 0 : index
    %c0_2 = arith.constant 0 : index
    %1 = vector.load %arg2[%c0_1, %c0_2] : memref<16x32xf32, #tpu.memory_space<vmem>>, vector<16x32xf32>
    %c0_3 = arith.constant 0 : index
    %c0_4 = arith.constant 0 : index
    %2 = vector.load %arg9[%c0_3, %c0_4] : memref<16x32xf32, #tpu.memory_space<vmem>>, vector<16x32xf32>
    %c0_5 = arith.constant 0 : index
    %c0_6 = arith.constant 0 : index
    %3 = vector.load %arg8[%c0_5, %c0_6] : memref<2x128xf32, #tpu.memory_space<vmem>>, vector<2x128xf32>
    %4 = tpu.iota {dimensions = array<i32: 0>} : vector<8x8xi32>
    %5 = tpu.iota {dimensions = array<i32: 1>} : vector<8x8xi32>
    %6 = arith.cmpi sge, %4, %5 : vector<8x8xi32>
    %7 = vector.extract_strided_slice %2 {offsets = [0, 0], sizes = [1, 32], strides = [1, 1]} : vector<16x32xf32> to vector<1x32xf32>
    %8 = vector.extract_strided_slice %2 {offsets = [1, 0], sizes = [1, 32], strides = [1, 1]} : vector<16x32xf32> to vector<1x32xf32>
    %cst = arith.constant dense<0.000000e+00> : vector<16xf32>
    %9 = vector.multi_reduction <add>, %0, %cst [1] : vector<16x32xf32> to vector<16xf32>
    %10 = vector.shape_cast %9 : vector<16xf32> to vector<16x1xf32>
    %cst_7 = arith.constant 3.200000e+01 : f32
    %11 = vector.broadcast %cst_7 : f32 to vector<16x1xf32>
    %12 = arith.divf %10, %11 : vector<16x1xf32>
    %13 = vector.broadcast %12 : vector<16x1xf32> to vector<16x32xf32>
    %14 = arith.subf %0, %13 : vector<16x32xf32>
    %15 = arith.mulf %14, %14 : vector<16x32xf32>
    %cst_8 = arith.constant dense<0.000000e+00> : vector<16xf32>
    %16 = vector.multi_reduction <add>, %15, %cst_8 [1] : vector<16x32xf32> to vector<16xf32>
    %17 = vector.shape_cast %16 : vector<16xf32> to vector<16x1xf32>
    %cst_9 = arith.constant 3.200000e+01 : f32
    %18 = vector.broadcast %cst_9 : f32 to vector<16x1xf32>
    %19 = arith.divf %17, %18 : vector<16x1xf32>
    %20 = vector.broadcast %12 : vector<16x1xf32> to vector<16x32xf32>
    %21 = arith.subf %0, %20 : vector<16x32xf32>
    %cst_10 = arith.constant 9.99999974E-6 : f32
    %22 = vector.broadcast %cst_10 : f32 to vector<16x1xf32>
    %23 = arith.addf %19, %22 : vector<16x1xf32>
    %24 = math.rsqrt %23 : vector<16x1xf32>
    %25 = vector.broadcast %24 : vector<16x1xf32> to vector<16x32xf32>
    %26 = arith.mulf %21, %25 : vector<16x32xf32>
    %27 = vector.broadcast %7 : vector<1x32xf32> to vector<16x32xf32>
    %28 = arith.mulf %26, %27 : vector<16x32xf32>
    %29 = vector.broadcast %8 : vector<1x32xf32> to vector<16x32xf32>
    %30 = arith.addf %28, %29 : vector<16x32xf32>
    %c0_11 = arith.constant 0 : index
    %c0_12 = arith.constant 0 : index
    %c0_13 = arith.constant 0 : index
    %31 = vector.load %arg3[%c0_11, %c0_12, %c0_13] : memref<4x32x96xf32, #tpu.memory_space<vmem>>, vector<1x32x96xf32>
    %32 = vector.shape_cast %31 : vector<1x32x96xf32> to vector<32x96xf32>
    %c0_14 = arith.constant 0 : index
    %c0_15 = arith.constant 0 : index
    %33 = vector.load %arg4[%c0_14, %c0_15] : memref<4x96xf32, #tpu.memory_space<vmem>>, vector<1x96xf32>
    %c0_16 = arith.constant 0 : index
    %c0_17 = arith.constant 0 : index
    %c0_18 = arith.constant 0 : index
    %34 = vector.load %arg5[%c0_16, %c0_17, %c0_18] : memref<4x32x32xf32, #tpu.memory_space<vmem>>, vector<1x32x32xf32>
    %35 = vector.shape_cast %34 : vector<1x32x32xf32> to vector<32x32xf32>
    %cst_19 = arith.constant dense<0.000000e+00> : vector<16x96xf32>
    %36 = tpu.matmul %30, %32, %cst_19 {dimension_numbers = #tpu.dot_dimension_numbers<[1], [0], [0], [1], [0, 0, 1, 1], [], []>} : vector<16x32xf32>, vector<32x96xf32>, vector<16x96xf32> -> vector<16x96xf32>
    %37 = vector.broadcast %33 : vector<1x96xf32> to vector<16x96xf32>
    %38 = arith.addf %36, %37 : vector<16x96xf32>
    %39 = vector.extract_strided_slice %38 {offsets = [0, 0], sizes = [8, 32], strides = [1, 1]} : vector<16x96xf32> to vector<8x32xf32>
    %40 = vector.extract_strided_slice %38 {offsets = [0, 32], sizes = [8, 32], strides = [1, 1]} : vector<16x96xf32> to vector<8x32xf32>
    %41 = vector.extract_strided_slice %38 {offsets = [0, 64], sizes = [8, 32], strides = [1, 1]} : vector<16x96xf32> to vector<8x32xf32>
    %42 = vector.extract_strided_slice %39 {offsets = [0, 0], sizes = [8, 8], strides = [1, 1]} : vector<8x32xf32> to vector<8x8xf32>
    %43 = vector.extract_strided_slice %40 {offsets = [0, 0], sizes = [8, 8], strides = [1, 1]} : vector<8x32xf32> to vector<8x8xf32>
    %44 = vector.extract_strided_slice %41 {offsets = [0, 0], sizes = [8, 8], strides = [1, 1]} : vector<8x32xf32> to vector<8x8xf32>
    "tpu.trace_start"() <{level = 10 : i32, message = "td,sd->ts"}> : () -> ()
    %cst_20 = arith.constant dense<0.000000e+00> : vector<8x8xf32>
    %45 = tpu.matmul %42, %43, %cst_20 {dimension_numbers = #tpu.dot_dimension_numbers<[1], [1], [0], [0], [0, 0, 1, 0], [], []>} : vector<8x8xf32>, vector<8x8xf32>, vector<8x8xf32> -> vector<8x8xf32>
    "tpu.trace_stop"() : () -> ()
    %cst_21 = arith.constant 0.353553385 : f32
    %46 = vector.broadcast %cst_21 : f32 to vector<8x8xf32>
    %47 = arith.mulf %45, %46 : vector<8x8xf32>
    %cst_22 = arith.constant -1.000000e+30 : f32
    %48 = vector.broadcast %cst_22 : f32 to vector<8x8xf32>
    %49 = arith.select %6, %47, %48 : vector<8x8xi1>, vector<8x8xf32>
    %cst_23 = arith.constant dense<0xFF800000> : vector<8xf32>
    %50 = vector.multi_reduction <maximumf>, %49, %cst_23 [1] : vector<8x8xf32> to vector<8xf32>
    %51 = vector.shape_cast %50 : vector<8xf32> to vector<8x1xf32>
    %52 = vector.broadcast %51 : vector<8x1xf32> to vector<8x8xf32>
    %53 = arith.subf %49, %52 : vector<8x8xf32>
    %54 = math.exp %53 : vector<8x8xf32>
    %cst_24 = arith.constant dense<0.000000e+00> : vector<8xf32>
    %55 = vector.multi_reduction <add>, %54, %cst_24 [1] : vector<8x8xf32> to vector<8xf32>
    %56 = vector.shape_cast %55 : vector<8xf32> to vector<8x1xf32>
    %57 = tpu.reciprocal %56 {approx = true} : vector<8x1xf32> -> vector<8x1xf32>
    %58 = vector.broadcast %57 : vector<8x1xf32> to vector<8x8xf32>
    %59 = arith.mulf %54, %58 : vector<8x8xf32>
    %cst_25 = arith.constant dense<0.000000e+00> : vector<8x8xf32>
    %60 = tpu.matmul %59, %44, %cst_25 {dimension_numbers = #tpu.dot_dimension_numbers<[1], [0], [0], [1], [0, 0, 1, 1], [], []>} : vector<8x8xf32>, vector<8x8xf32>, vector<8x8xf32> -> vector<8x8xf32>
    %61 = vector.extract_strided_slice %39 {offsets = [0, 8], sizes = [8, 8], strides = [1, 1]} : vector<8x32xf32> to vector<8x8xf32>
    %62 = vector.extract_strided_slice %40 {offsets = [0, 8], sizes = [8, 8], strides = [1, 1]} : vector<8x32xf32> to vector<8x8xf32>
    %63 = vector.extract_strided_slice %41 {offsets = [0, 8], sizes = [8, 8], strides = [1, 1]} : vector<8x32xf32> to vector<8x8xf32>
    "tpu.trace_start"() <{level = 10 : i32, message = "td,sd->ts"}> : () -> ()
    %cst_26 = arith.constant dense<0.000000e+00> : vector<8x8xf32>
    %64 = tpu.matmul %61, %62, %cst_26 {dimension_numbers = #tpu.dot_dimension_numbers<[1], [1], [0], [0], [0, 0, 1, 0], [], []>} : vector<8x8xf32>, vector<8x8xf32>, vector<8x8xf32> -> vector<8x8xf32>
    "tpu.trace_stop"() : () -> ()
    %cst_27 = arith.constant 0.353553385 : f32
    %65 = vector.broadcast %cst_27 : f32 to vector<8x8xf32>
    %66 = arith.mulf %64, %65 : vector<8x8xf32>
    %cst_28 = arith.constant -1.000000e+30 : f32
    %67 = vector.broadcast %cst_28 : f32 to vector<8x8xf32>
    %68 = arith.select %6, %66, %67 : vector<8x8xi1>, vector<8x8xf32>
    %cst_29 = arith.constant dense<0xFF800000> : vector<8xf32>
    %69 = vector.multi_reduction <maximumf>, %68, %cst_29 [1] : vector<8x8xf32> to vector<8xf32>
    %70 = vector.shape_cast %69 : vector<8xf32> to vector<8x1xf32>
    %71 = vector.broadcast %70 : vector<8x1xf32> to vector<8x8xf32>
    %72 = arith.subf %68, %71 : vector<8x8xf32>
    %73 = math.exp %72 : vector<8x8xf32>
    %cst_30 = arith.constant dense<0.000000e+00> : vector<8xf32>
    %74 = vector.multi_reduction <add>, %73, %cst_30 [1] : vector<8x8xf32> to vector<8xf32>
    %75 = vector.shape_cast %74 : vector<8xf32> to vector<8x1xf32>
    %76 = tpu.reciprocal %75 {approx = true} : vector<8x1xf32> -> vector<8x1xf32>
    %77 = vector.broadcast %76 : vector<8x1xf32> to vector<8x8xf32>
    %78 = arith.mulf %73, %77 : vector<8x8xf32>
    %cst_31 = arith.constant dense<0.000000e+00> : vector<8x8xf32>
    %79 = tpu.matmul %78, %63, %cst_31 {dimension_numbers = #tpu.dot_dimension_numbers<[1], [0], [0], [1], [0, 0, 1, 1], [], []>} : vector<8x8xf32>, vector<8x8xf32>, vector<8x8xf32> -> vector<8x8xf32>
    %80 = vector.extract_strided_slice %39 {offsets = [0, 16], sizes = [8, 8], strides = [1, 1]} : vector<8x32xf32> to vector<8x8xf32>
    %81 = vector.extract_strided_slice %40 {offsets = [0, 16], sizes = [8, 8], strides = [1, 1]} : vector<8x32xf32> to vector<8x8xf32>
    %82 = vector.extract_strided_slice %41 {offsets = [0, 16], sizes = [8, 8], strides = [1, 1]} : vector<8x32xf32> to vector<8x8xf32>
    "tpu.trace_start"() <{level = 10 : i32, message = "td,sd->ts"}> : () -> ()
    %cst_32 = arith.constant dense<0.000000e+00> : vector<8x8xf32>
    %83 = tpu.matmul %80, %81, %cst_32 {dimension_numbers = #tpu.dot_dimension_numbers<[1], [1], [0], [0], [0, 0, 1, 0], [], []>} : vector<8x8xf32>, vector<8x8xf32>, vector<8x8xf32> -> vector<8x8xf32>
    "tpu.trace_stop"() : () -> ()
    %cst_33 = arith.constant 0.353553385 : f32
    %84 = vector.broadcast %cst_33 : f32 to vector<8x8xf32>
    %85 = arith.mulf %83, %84 : vector<8x8xf32>
    %cst_34 = arith.constant -1.000000e+30 : f32
    %86 = vector.broadcast %cst_34 : f32 to vector<8x8xf32>
    %87 = arith.select %6, %85, %86 : vector<8x8xi1>, vector<8x8xf32>
    %cst_35 = arith.constant dense<0xFF800000> : vector<8xf32>
    %88 = vector.multi_reduction <maximumf>, %87, %cst_35 [1] : vector<8x8xf32> to vector<8xf32>
    %89 = vector.shape_cast %88 : vector<8xf32> to vector<8x1xf32>
    %90 = vector.broadcast %89 : vector<8x1xf32> to vector<8x8xf32>
    %91 = arith.subf %87, %90 : vector<8x8xf32>
    %92 = math.exp %91 : vector<8x8xf32>
    %cst_36 = arith.constant dense<0.000000e+00> : vector<8xf32>
    %93 = vector.multi_reduction <add>, %92, %cst_36 [1] : vector<8x8xf32> to vector<8xf32>
    %94 = vector.shape_cast %93 : vector<8xf32> to vector<8x1xf32>
    %95 = tpu.reciprocal %94 {approx = true} : vector<8x1xf32> -> vector<8x1xf32>
    %96 = vector.broadcast %95 : vector<8x1xf32> to vector<8x8xf32>
    %97 = arith.mulf %92, %96 : vector<8x8xf32>
    %cst_37 = arith.constant dense<0.000000e+00> : vector<8x8xf32>
    %98 = tpu.matmul %97, %82, %cst_37 {dimension_numbers = #tpu.dot_dimension_numbers<[1], [0], [0], [1], [0, 0, 1, 1], [], []>} : vector<8x8xf32>, vector<8x8xf32>, vector<8x8xf32> -> vector<8x8xf32>
    %99 = vector.extract_strided_slice %39 {offsets = [0, 24], sizes = [8, 8], strides = [1, 1]} : vector<8x32xf32> to vector<8x8xf32>
    %100 = vector.extract_strided_slice %40 {offsets = [0, 24], sizes = [8, 8], strides = [1, 1]} : vector<8x32xf32> to vector<8x8xf32>
    %101 = vector.extract_strided_slice %41 {offsets = [0, 24], sizes = [8, 8], strides = [1, 1]} : vector<8x32xf32> to vector<8x8xf32>
    "tpu.trace_start"() <{level = 10 : i32, message = "td,sd->ts"}> : () -> ()
    %cst_38 = arith.constant dense<0.000000e+00> : vector<8x8xf32>
    %102 = tpu.matmul %99, %100, %cst_38 {dimension_numbers = #tpu.dot_dimension_numbers<[1], [1], [0], [0], [0, 0, 1, 0], [], []>} : vector<8x8xf32>, vector<8x8xf32>, vector<8x8xf32> -> vector<8x8xf32>
    "tpu.trace_stop"() : () -> ()
    %cst_39 = arith.constant 0.353553385 : f32
    %103 = vector.broadcast %cst_39 : f32 to vector<8x8xf32>
    %104 = arith.mulf %102, %103 : vector<8x8xf32>
    %cst_40 = arith.constant -1.000000e+30 : f32
    %105 = vector.broadcast %cst_40 : f32 to vector<8x8xf32>
    %106 = arith.select %6, %104, %105 : vector<8x8xi1>, vector<8x8xf32>
    %cst_41 = arith.constant dense<0xFF800000> : vector<8xf32>
    %107 = vector.multi_reduction <maximumf>, %106, %cst_41 [1] : vector<8x8xf32> to vector<8xf32>
    %108 = vector.shape_cast %107 : vector<8xf32> to vector<8x1xf32>
    %109 = vector.broadcast %108 : vector<8x1xf32> to vector<8x8xf32>
    %110 = arith.subf %106, %109 : vector<8x8xf32>
    %111 = math.exp %110 : vector<8x8xf32>
    %cst_42 = arith.constant dense<0.000000e+00> : vector<8xf32>
    %112 = vector.multi_reduction <add>, %111, %cst_42 [1] : vector<8x8xf32> to vector<8xf32>
    %113 = vector.shape_cast %112 : vector<8xf32> to vector<8x1xf32>
    %114 = tpu.reciprocal %113 {approx = true} : vector<8x1xf32> -> vector<8x1xf32>
    %115 = vector.broadcast %114 : vector<8x1xf32> to vector<8x8xf32>
    %116 = arith.mulf %111, %115 : vector<8x8xf32>
    %cst_43 = arith.constant dense<0.000000e+00> : vector<8x8xf32>
    %117 = tpu.matmul %116, %101, %cst_43 {dimension_numbers = #tpu.dot_dimension_numbers<[1], [0], [0], [1], [0, 0, 1, 1], [], []>} : vector<8x8xf32>, vector<8x8xf32>, vector<8x8xf32> -> vector<8x8xf32>
    %118 = tpu.concatenate %60, %79, %98, %117 in 1 : vector<8x8xf32>, vector<8x8xf32>, vector<8x8xf32>, vector<8x8xf32> -> vector<8x32xf32>
    %119 = vector.extract_strided_slice %38 {offsets = [8, 0], sizes = [8, 32], strides = [1, 1]} : vector<16x96xf32> to vector<8x32xf32>
    %120 = vector.extract_strided_slice %38 {offsets = [8, 32], sizes = [8, 32], strides = [1, 1]} : vector<16x96xf32> to vector<8x32xf32>
    %121 = vector.extract_strided_slice %38 {offsets = [8, 64], sizes = [8, 32], strides = [1, 1]} : vector<16x96xf32> to vector<8x32xf32>
    %122 = vector.extract_strided_slice %119 {offsets = [0, 0], sizes = [8, 8], strides = [1, 1]} : vector<8x32xf32> to vector<8x8xf32>
    %123 = vector.extract_strided_slice %120 {offsets = [0, 0], sizes = [8, 8], strides = [1, 1]} : vector<8x32xf32> to vector<8x8xf32>
    %124 = vector.extract_strided_slice %121 {offsets = [0, 0], sizes = [8, 8], strides = [1, 1]} : vector<8x32xf32> to vector<8x8xf32>
    "tpu.trace_start"() <{level = 10 : i32, message = "td,sd->ts"}> : () -> ()
    %cst_44 = arith.constant dense<0.000000e+00> : vector<8x8xf32>
    %125 = tpu.matmul %122, %123, %cst_44 {dimension_numbers = #tpu.dot_dimension_numbers<[1], [1], [0], [0], [0, 0, 1, 0], [], []>} : vector<8x8xf32>, vector<8x8xf32>, vector<8x8xf32> -> vector<8x8xf32>
    "tpu.trace_stop"() : () -> ()
    %cst_45 = arith.constant 0.353553385 : f32
    %126 = vector.broadcast %cst_45 : f32 to vector<8x8xf32>
    %127 = arith.mulf %125, %126 : vector<8x8xf32>
    %cst_46 = arith.constant -1.000000e+30 : f32
    %128 = vector.broadcast %cst_46 : f32 to vector<8x8xf32>
    %129 = arith.select %6, %127, %128 : vector<8x8xi1>, vector<8x8xf32>
    %cst_47 = arith.constant dense<0xFF800000> : vector<8xf32>
    %130 = vector.multi_reduction <maximumf>, %129, %cst_47 [1] : vector<8x8xf32> to vector<8xf32>
    %131 = vector.shape_cast %130 : vector<8xf32> to vector<8x1xf32>
    %132 = vector.broadcast %131 : vector<8x1xf32> to vector<8x8xf32>
    %133 = arith.subf %129, %132 : vector<8x8xf32>
    %134 = math.exp %133 : vector<8x8xf32>
    %cst_48 = arith.constant dense<0.000000e+00> : vector<8xf32>
    %135 = vector.multi_reduction <add>, %134, %cst_48 [1] : vector<8x8xf32> to vector<8xf32>
    %136 = vector.shape_cast %135 : vector<8xf32> to vector<8x1xf32>
    %137 = tpu.reciprocal %136 {approx = true} : vector<8x1xf32> -> vector<8x1xf32>
    %138 = vector.broadcast %137 : vector<8x1xf32> to vector<8x8xf32>
    %139 = arith.mulf %134, %138 : vector<8x8xf32>
    %cst_49 = arith.constant dense<0.000000e+00> : vector<8x8xf32>
    %140 = tpu.matmul %139, %124, %cst_49 {dimension_numbers = #tpu.dot_dimension_numbers<[1], [0], [0], [1], [0, 0, 1, 1], [], []>} : vector<8x8xf32>, vector<8x8xf32>, vector<8x8xf32> -> vector<8x8xf32>
    %141 = vector.extract_strided_slice %119 {offsets = [0, 8], sizes = [8, 8], strides = [1, 1]} : vector<8x32xf32> to vector<8x8xf32>
    %142 = vector.extract_strided_slice %120 {offsets = [0, 8], sizes = [8, 8], strides = [1, 1]} : vector<8x32xf32> to vector<8x8xf32>
    %143 = vector.extract_strided_slice %121 {offsets = [0, 8], sizes = [8, 8], strides = [1, 1]} : vector<8x32xf32> to vector<8x8xf32>
    "tpu.trace_start"() <{level = 10 : i32, message = "td,sd->ts"}> : () -> ()
    %cst_50 = arith.constant dense<0.000000e+00> : vector<8x8xf32>
    %144 = tpu.matmul %141, %142, %cst_50 {dimension_numbers = #tpu.dot_dimension_numbers<[1], [1], [0], [0], [0, 0, 1, 0], [], []>} : vector<8x8xf32>, vector<8x8xf32>, vector<8x8xf32> -> vector<8x8xf32>
    "tpu.trace_stop"() : () -> ()
    %cst_51 = arith.constant 0.353553385 : f32
    %145 = vector.broadcast %cst_51 : f32 to vector<8x8xf32>
    %146 = arith.mulf %144, %145 : vector<8x8xf32>
    %cst_52 = arith.constant -1.000000e+30 : f32
    %147 = vector.broadcast %cst_52 : f32 to vector<8x8xf32>
    %148 = arith.select %6, %146, %147 : vector<8x8xi1>, vector<8x8xf32>
    %cst_53 = arith.constant dense<0xFF800000> : vector<8xf32>
    %149 = vector.multi_reduction <maximumf>, %148, %cst_53 [1] : vector<8x8xf32> to vector<8xf32>
    %150 = vector.shape_cast %149 : vector<8xf32> to vector<8x1xf32>
    %151 = vector.broadcast %150 : vector<8x1xf32> to vector<8x8xf32>
    %152 = arith.subf %148, %151 : vector<8x8xf32>
    %153 = math.exp %152 : vector<8x8xf32>
    %cst_54 = arith.constant dense<0.000000e+00> : vector<8xf32>
    %154 = vector.multi_reduction <add>, %153, %cst_54 [1] : vector<8x8xf32> to vector<8xf32>
    %155 = vector.shape_cast %154 : vector<8xf32> to vector<8x1xf32>
    %156 = tpu.reciprocal %155 {approx = true} : vector<8x1xf32> -> vector<8x1xf32>
    %157 = vector.broadcast %156 : vector<8x1xf32> to vector<8x8xf32>
    %158 = arith.mulf %153, %157 : vector<8x8xf32>
    %cst_55 = arith.constant dense<0.000000e+00> : vector<8x8xf32>
    %159 = tpu.matmul %158, %143, %cst_55 {dimension_numbers = #tpu.dot_dimension_numbers<[1], [0], [0], [1], [0, 0, 1, 1], [], []>} : vector<8x8xf32>, vector<8x8xf32>, vector<8x8xf32> -> vector<8x8xf32>
    %160 = vector.extract_strided_slice %119 {offsets = [0, 16], sizes = [8, 8], strides = [1, 1]} : vector<8x32xf32> to vector<8x8xf32>
    %161 = vector.extract_strided_slice %120 {offsets = [0, 16], sizes = [8, 8], strides = [1, 1]} : vector<8x32xf32> to vector<8x8xf32>
    %162 = vector.extract_strided_slice %121 {offsets = [0, 16], sizes = [8, 8], strides = [1, 1]} : vector<8x32xf32> to vector<8x8xf32>
    "tpu.trace_start"() <{level = 10 : i32, message = "td,sd->ts"}> : () -> ()
    %cst_56 = arith.constant dense<0.000000e+00> : vector<8x8xf32>
    %163 = tpu.matmul %160, %161, %cst_56 {dimension_numbers = #tpu.dot_dimension_numbers<[1], [1], [0], [0], [0, 0, 1, 0], [], []>} : vector<8x8xf32>, vector<8x8xf32>, vector<8x8xf32> -> vector<8x8xf32>
    "tpu.trace_stop"() : () -> ()
    %cst_57 = arith.constant 0.353553385 : f32
    %164 = vector.broadcast %cst_57 : f32 to vector<8x8xf32>
    %165 = arith.mulf %163, %164 : vector<8x8xf32>
    %cst_58 = arith.constant -1.000000e+30 : f32
    %166 = vector.broadcast %cst_58 : f32 to vector<8x8xf32>
    %167 = arith.select %6, %165, %166 : vector<8x8xi1>, vector<8x8xf32>
    %cst_59 = arith.constant dense<0xFF800000> : vector<8xf32>
    %168 = vector.multi_reduction <maximumf>, %167, %cst_59 [1] : vector<8x8xf32> to vector<8xf32>
    %169 = vector.shape_cast %168 : vector<8xf32> to vector<8x1xf32>
    %170 = vector.broadcast %169 : vector<8x1xf32> to vector<8x8xf32>
    %171 = arith.subf %167, %170 : vector<8x8xf32>
    %172 = math.exp %171 : vector<8x8xf32>
    %cst_60 = arith.constant dense<0.000000e+00> : vector<8xf32>
    %173 = vector.multi_reduction <add>, %172, %cst_60 [1] : vector<8x8xf32> to vector<8xf32>
    %174 = vector.shape_cast %173 : vector<8xf32> to vector<8x1xf32>
    %175 = tpu.reciprocal %174 {approx = true} : vector<8x1xf32> -> vector<8x1xf32>
    %176 = vector.broadcast %175 : vector<8x1xf32> to vector<8x8xf32>
    %177 = arith.mulf %172, %176 : vector<8x8xf32>
    %cst_61 = arith.constant dense<0.000000e+00> : vector<8x8xf32>
    %178 = tpu.matmul %177, %162, %cst_61 {dimension_numbers = #tpu.dot_dimension_numbers<[1], [0], [0], [1], [0, 0, 1, 1], [], []>} : vector<8x8xf32>, vector<8x8xf32>, vector<8x8xf32> -> vector<8x8xf32>
    %179 = vector.extract_strided_slice %119 {offsets = [0, 24], sizes = [8, 8], strides = [1, 1]} : vector<8x32xf32> to vector<8x8xf32>
    %180 = vector.extract_strided_slice %120 {offsets = [0, 24], sizes = [8, 8], strides = [1, 1]} : vector<8x32xf32> to vector<8x8xf32>
    %181 = vector.extract_strided_slice %121 {offsets = [0, 24], sizes = [8, 8], strides = [1, 1]} : vector<8x32xf32> to vector<8x8xf32>
    "tpu.trace_start"() <{level = 10 : i32, message = "td,sd->ts"}> : () -> ()
    %cst_62 = arith.constant dense<0.000000e+00> : vector<8x8xf32>
    %182 = tpu.matmul %179, %180, %cst_62 {dimension_numbers = #tpu.dot_dimension_numbers<[1], [1], [0], [0], [0, 0, 1, 0], [], []>} : vector<8x8xf32>, vector<8x8xf32>, vector<8x8xf32> -> vector<8x8xf32>
    "tpu.trace_stop"() : () -> ()
    %cst_63 = arith.constant 0.353553385 : f32
    %183 = vector.broadcast %cst_63 : f32 to vector<8x8xf32>
    %184 = arith.mulf %182, %183 : vector<8x8xf32>
    %cst_64 = arith.constant -1.000000e+30 : f32
    %185 = vector.broadcast %cst_64 : f32 to vector<8x8xf32>
    %186 = arith.select %6, %184, %185 : vector<8x8xi1>, vector<8x8xf32>
    %cst_65 = arith.constant dense<0xFF800000> : vector<8xf32>
    %187 = vector.multi_reduction <maximumf>, %186, %cst_65 [1] : vector<8x8xf32> to vector<8xf32>
    %188 = vector.shape_cast %187 : vector<8xf32> to vector<8x1xf32>
    %189 = vector.broadcast %188 : vector<8x1xf32> to vector<8x8xf32>
    %190 = arith.subf %186, %189 : vector<8x8xf32>
    %191 = math.exp %190 : vector<8x8xf32>
    %cst_66 = arith.constant dense<0.000000e+00> : vector<8xf32>
    %192 = vector.multi_reduction <add>, %191, %cst_66 [1] : vector<8x8xf32> to vector<8xf32>
    %193 = vector.shape_cast %192 : vector<8xf32> to vector<8x1xf32>
    %194 = tpu.reciprocal %193 {approx = true} : vector<8x1xf32> -> vector<8x1xf32>
    %195 = vector.broadcast %194 : vector<8x1xf32> to vector<8x8xf32>
    %196 = arith.mulf %191, %195 : vector<8x8xf32>
    %cst_67 = arith.constant dense<0.000000e+00> : vector<8x8xf32>
    %197 = tpu.matmul %196, %181, %cst_67 {dimension_numbers = #tpu.dot_dimension_numbers<[1], [0], [0], [1], [0, 0, 1, 1], [], []>} : vector<8x8xf32>, vector<8x8xf32>, vector<8x8xf32> -> vector<8x8xf32>
    %198 = tpu.concatenate %140, %159, %178, %197 in 1 : vector<8x8xf32>, vector<8x8xf32>, vector<8x8xf32>, vector<8x8xf32> -> vector<8x32xf32>
    %199 = tpu.concatenate %118, %198 in 0 : vector<8x32xf32>, vector<8x32xf32> -> vector<16x32xf32>
    %cst_68 = arith.constant dense<0.000000e+00> : vector<16x32xf32>
    %200 = tpu.matmul %199, %35, %cst_68 {dimension_numbers = #tpu.dot_dimension_numbers<[1], [0], [0], [1], [0, 0, 1, 1], [], []>} : vector<16x32xf32>, vector<32x32xf32>, vector<16x32xf32> -> vector<16x32xf32>
    %201 = vector.extract_strided_slice %2 {offsets = [4, 0], sizes = [1, 32], strides = [1, 1]} : vector<16x32xf32> to vector<1x32xf32>
    %202 = vector.broadcast %201 : vector<1x32xf32> to vector<16x32xf32>
    %203 = arith.addf %200, %202 : vector<16x32xf32>
    %204 = arith.addf %0, %203 : vector<16x32xf32>
    %205 = vector.extract_strided_slice %2 {offsets = [0, 0], sizes = [1, 32], strides = [1, 1]} : vector<16x32xf32> to vector<1x32xf32>
    %206 = vector.extract_strided_slice %2 {offsets = [1, 0], sizes = [1, 32], strides = [1, 1]} : vector<16x32xf32> to vector<1x32xf32>
    %cst_69 = arith.constant dense<0.000000e+00> : vector<16xf32>
    %207 = vector.multi_reduction <add>, %204, %cst_69 [1] : vector<16x32xf32> to vector<16xf32>
    %208 = vector.shape_cast %207 : vector<16xf32> to vector<16x1xf32>
    %cst_70 = arith.constant 3.200000e+01 : f32
    %209 = vector.broadcast %cst_70 : f32 to vector<16x1xf32>
    %210 = arith.divf %208, %209 : vector<16x1xf32>
    %211 = vector.broadcast %210 : vector<16x1xf32> to vector<16x32xf32>
    %212 = arith.subf %204, %211 : vector<16x32xf32>
    %213 = arith.mulf %212, %212 : vector<16x32xf32>
    %cst_71 = arith.constant dense<0.000000e+00> : vector<16xf32>
    %214 = vector.multi_reduction <add>, %213, %cst_71 [1] : vector<16x32xf32> to vector<16xf32>
    %215 = vector.shape_cast %214 : vector<16xf32> to vector<16x1xf32>
    %cst_72 = arith.constant 3.200000e+01 : f32
    %216 = vector.broadcast %cst_72 : f32 to vector<16x1xf32>
    %217 = arith.divf %215, %216 : vector<16x1xf32>
    %218 = vector.broadcast %210 : vector<16x1xf32> to vector<16x32xf32>
    %219 = arith.subf %204, %218 : vector<16x32xf32>
    %cst_73 = arith.constant 9.99999974E-6 : f32
    %220 = vector.broadcast %cst_73 : f32 to vector<16x1xf32>
    %221 = arith.addf %217, %220 : vector<16x1xf32>
    %222 = math.rsqrt %221 : vector<16x1xf32>
    %223 = vector.broadcast %222 : vector<16x1xf32> to vector<16x32xf32>
    %224 = arith.mulf %219, %223 : vector<16x32xf32>
    %225 = vector.broadcast %205 : vector<1x32xf32> to vector<16x32xf32>
    %226 = arith.mulf %224, %225 : vector<16x32xf32>
    %227 = vector.broadcast %206 : vector<1x32xf32> to vector<16x32xf32>
    %228 = arith.addf %226, %227 : vector<16x32xf32>
    %c1 = arith.constant 1 : index
    %c0_74 = arith.constant 0 : index
    %c0_75 = arith.constant 0 : index
    %229 = vector.load %arg3[%c1, %c0_74, %c0_75] : memref<4x32x96xf32, #tpu.memory_space<vmem>>, vector<1x32x96xf32>
    %230 = vector.shape_cast %229 : vector<1x32x96xf32> to vector<32x96xf32>
    %c1_76 = arith.constant 1 : index
    %c0_77 = arith.constant 0 : index
    %231 = vector.load %arg4[%c1_76, %c0_77] : memref<4x96xf32, #tpu.memory_space<vmem>>, vector<1x96xf32>
    %c1_78 = arith.constant 1 : index
    %c0_79 = arith.constant 0 : index
    %c0_80 = arith.constant 0 : index
    %232 = vector.load %arg5[%c1_78, %c0_79, %c0_80] : memref<4x32x32xf32, #tpu.memory_space<vmem>>, vector<1x32x32xf32>
    %233 = vector.shape_cast %232 : vector<1x32x32xf32> to vector<32x32xf32>
    %234 = vector.extract_strided_slice %230 {offsets = [0, 0], sizes = [32, 32], strides = [1, 1]} : vector<32x96xf32> to vector<32x32xf32>
    %cst_81 = arith.constant dense<0.000000e+00> : vector<16x32xf32>
    %235 = tpu.matmul %228, %234, %cst_81 {dimension_numbers = #tpu.dot_dimension_numbers<[1], [0], [0], [1], [0, 0, 1, 1], [], []>} : vector<16x32xf32>, vector<32x32xf32>, vector<16x32xf32> -> vector<16x32xf32>
    %236 = vector.extract_strided_slice %231 {offsets = [0, 0], sizes = [1, 32], strides = [1, 1]} : vector<1x96xf32> to vector<1x32xf32>
    %237 = vector.broadcast %236 : vector<1x32xf32> to vector<16x32xf32>
    %238 = arith.addf %235, %237 : vector<16x32xf32>
    %239 = vector.extract_strided_slice %230 {offsets = [0, 32], sizes = [32, 64], strides = [1, 1]} : vector<32x96xf32> to vector<32x64xf32>
    %cst_82 = arith.constant dense<0.000000e+00> : vector<16x64xf32>
    %240 = tpu.matmul %1, %239, %cst_82 {dimension_numbers = #tpu.dot_dimension_numbers<[1], [0], [0], [1], [0, 0, 1, 1], [], []>} : vector<16x32xf32>, vector<32x64xf32>, vector<16x64xf32> -> vector<16x64xf32>
    %241 = vector.extract_strided_slice %231 {offsets = [0, 32], sizes = [1, 64], strides = [1, 1]} : vector<1x96xf32> to vector<1x64xf32>
    %242 = vector.broadcast %241 : vector<1x64xf32> to vector<16x64xf32>
    %243 = arith.addf %240, %242 : vector<16x64xf32>
    %244 = vector.extract_strided_slice %238 {offsets = [0, 0], sizes = [8, 32], strides = [1, 1]} : vector<16x32xf32> to vector<8x32xf32>
    %245 = vector.extract_strided_slice %243 {offsets = [0, 0], sizes = [8, 32], strides = [1, 1]} : vector<16x64xf32> to vector<8x32xf32>
    %246 = vector.extract_strided_slice %243 {offsets = [0, 32], sizes = [8, 32], strides = [1, 1]} : vector<16x64xf32> to vector<8x32xf32>
    %247 = vector.extract_strided_slice %244 {offsets = [0, 0], sizes = [8, 8], strides = [1, 1]} : vector<8x32xf32> to vector<8x8xf32>
    %248 = vector.extract_strided_slice %245 {offsets = [0, 0], sizes = [8, 8], strides = [1, 1]} : vector<8x32xf32> to vector<8x8xf32>
    %249 = vector.extract_strided_slice %246 {offsets = [0, 0], sizes = [8, 8], strides = [1, 1]} : vector<8x32xf32> to vector<8x8xf32>
    "tpu.trace_start"() <{level = 10 : i32, message = "td,sd->ts"}> : () -> ()
    %cst_83 = arith.constant dense<0.000000e+00> : vector<8x8xf32>
    %250 = tpu.matmul %247, %248, %cst_83 {dimension_numbers = #tpu.dot_dimension_numbers<[1], [1], [0], [0], [0, 0, 1, 0], [], []>} : vector<8x8xf32>, vector<8x8xf32>, vector<8x8xf32> -> vector<8x8xf32>
    "tpu.trace_stop"() : () -> ()
    %cst_84 = arith.constant 0.353553385 : f32
    %251 = vector.broadcast %cst_84 : f32 to vector<8x8xf32>
    %252 = arith.mulf %250, %251 : vector<8x8xf32>
    %cst_85 = arith.constant -1.000000e+30 : f32
    %253 = vector.broadcast %cst_85 : f32 to vector<8x8xf32>
    %254 = arith.select %6, %252, %253 : vector<8x8xi1>, vector<8x8xf32>
    %cst_86 = arith.constant dense<0xFF800000> : vector<8xf32>
    %255 = vector.multi_reduction <maximumf>, %254, %cst_86 [1] : vector<8x8xf32> to vector<8xf32>
    %256 = vector.shape_cast %255 : vector<8xf32> to vector<8x1xf32>
    %257 = vector.broadcast %256 : vector<8x1xf32> to vector<8x8xf32>
    %258 = arith.subf %254, %257 : vector<8x8xf32>
    %259 = math.exp %258 : vector<8x8xf32>
    %cst_87 = arith.constant dense<0.000000e+00> : vector<8xf32>
    %260 = vector.multi_reduction <add>, %259, %cst_87 [1] : vector<8x8xf32> to vector<8xf32>
    %261 = vector.shape_cast %260 : vector<8xf32> to vector<8x1xf32>
    %262 = tpu.reciprocal %261 {approx = true} : vector<8x1xf32> -> vector<8x1xf32>
    %263 = vector.broadcast %262 : vector<8x1xf32> to vector<8x8xf32>
    %264 = arith.mulf %259, %263 : vector<8x8xf32>
    %cst_88 = arith.constant dense<0.000000e+00> : vector<8x8xf32>
    %265 = tpu.matmul %264, %249, %cst_88 {dimension_numbers = #tpu.dot_dimension_numbers<[1], [0], [0], [1], [0, 0, 1, 1], [], []>} : vector<8x8xf32>, vector<8x8xf32>, vector<8x8xf32> -> vector<8x8xf32>
    %266 = vector.extract_strided_slice %244 {offsets = [0, 8], sizes = [8, 8], strides = [1, 1]} : vector<8x32xf32> to vector<8x8xf32>
    %267 = vector.extract_strided_slice %245 {offsets = [0, 8], sizes = [8, 8], strides = [1, 1]} : vector<8x32xf32> to vector<8x8xf32>
    %268 = vector.extract_strided_slice %246 {offsets = [0, 8], sizes = [8, 8], strides = [1, 1]} : vector<8x32xf32> to vector<8x8xf32>
    "tpu.trace_start"() <{level = 10 : i32, message = "td,sd->ts"}> : () -> ()
    %cst_89 = arith.constant dense<0.000000e+00> : vector<8x8xf32>
    %269 = tpu.matmul %266, %267, %cst_89 {dimension_numbers = #tpu.dot_dimension_numbers<[1], [1], [0], [0], [0, 0, 1, 0], [], []>} : vector<8x8xf32>, vector<8x8xf32>, vector<8x8xf32> -> vector<8x8xf32>
    "tpu.trace_stop"() : () -> ()
    %cst_90 = arith.constant 0.353553385 : f32
    %270 = vector.broadcast %cst_90 : f32 to vector<8x8xf32>
    %271 = arith.mulf %269, %270 : vector<8x8xf32>
    %cst_91 = arith.constant -1.000000e+30 : f32
    %272 = vector.broadcast %cst_91 : f32 to vector<8x8xf32>
    %273 = arith.select %6, %271, %272 : vector<8x8xi1>, vector<8x8xf32>
    %cst_92 = arith.constant dense<0xFF800000> : vector<8xf32>
    %274 = vector.multi_reduction <maximumf>, %273, %cst_92 [1] : vector<8x8xf32> to vector<8xf32>
    %275 = vector.shape_cast %274 : vector<8xf32> to vector<8x1xf32>
    %276 = vector.broadcast %275 : vector<8x1xf32> to vector<8x8xf32>
    %277 = arith.subf %273, %276 : vector<8x8xf32>
    %278 = math.exp %277 : vector<8x8xf32>
    %cst_93 = arith.constant dense<0.000000e+00> : vector<8xf32>
    %279 = vector.multi_reduction <add>, %278, %cst_93 [1] : vector<8x8xf32> to vector<8xf32>
    %280 = vector.shape_cast %279 : vector<8xf32> to vector<8x1xf32>
    %281 = tpu.reciprocal %280 {approx = true} : vector<8x1xf32> -> vector<8x1xf32>
    %282 = vector.broadcast %281 : vector<8x1xf32> to vector<8x8xf32>
    %283 = arith.mulf %278, %282 : vector<8x8xf32>
    %cst_94 = arith.constant dense<0.000000e+00> : vector<8x8xf32>
    %284 = tpu.matmul %283, %268, %cst_94 {dimension_numbers = #tpu.dot_dimension_numbers<[1], [0], [0], [1], [0, 0, 1, 1], [], []>} : vector<8x8xf32>, vector<8x8xf32>, vector<8x8xf32> -> vector<8x8xf32>
    %285 = vector.extract_strided_slice %244 {offsets = [0, 16], sizes = [8, 8], strides = [1, 1]} : vector<8x32xf32> to vector<8x8xf32>
    %286 = vector.extract_strided_slice %245 {offsets = [0, 16], sizes = [8, 8], strides = [1, 1]} : vector<8x32xf32> to vector<8x8xf32>
    %287 = vector.extract_strided_slice %246 {offsets = [0, 16], sizes = [8, 8], strides = [1, 1]} : vector<8x32xf32> to vector<8x8xf32>
    "tpu.trace_start"() <{level = 10 : i32, message = "td,sd->ts"}> : () -> ()
    %cst_95 = arith.constant dense<0.000000e+00> : vector<8x8xf32>
    %288 = tpu.matmul %285, %286, %cst_95 {dimension_numbers = #tpu.dot_dimension_numbers<[1], [1], [0], [0], [0, 0, 1, 0], [], []>} : vector<8x8xf32>, vector<8x8xf32>, vector<8x8xf32> -> vector<8x8xf32>
    "tpu.trace_stop"() : () -> ()
    %cst_96 = arith.constant 0.353553385 : f32
    %289 = vector.broadcast %cst_96 : f32 to vector<8x8xf32>
    %290 = arith.mulf %288, %289 : vector<8x8xf32>
    %cst_97 = arith.constant -1.000000e+30 : f32
    %291 = vector.broadcast %cst_97 : f32 to vector<8x8xf32>
    %292 = arith.select %6, %290, %291 : vector<8x8xi1>, vector<8x8xf32>
    %cst_98 = arith.constant dense<0xFF800000> : vector<8xf32>
    %293 = vector.multi_reduction <maximumf>, %292, %cst_98 [1] : vector<8x8xf32> to vector<8xf32>
    %294 = vector.shape_cast %293 : vector<8xf32> to vector<8x1xf32>
    %295 = vector.broadcast %294 : vector<8x1xf32> to vector<8x8xf32>
    %296 = arith.subf %292, %295 : vector<8x8xf32>
    %297 = math.exp %296 : vector<8x8xf32>
    %cst_99 = arith.constant dense<0.000000e+00> : vector<8xf32>
    %298 = vector.multi_reduction <add>, %297, %cst_99 [1] : vector<8x8xf32> to vector<8xf32>
    %299 = vector.shape_cast %298 : vector<8xf32> to vector<8x1xf32>
    %300 = tpu.reciprocal %299 {approx = true} : vector<8x1xf32> -> vector<8x1xf32>
    %301 = vector.broadcast %300 : vector<8x1xf32> to vector<8x8xf32>
    %302 = arith.mulf %297, %301 : vector<8x8xf32>
    %cst_100 = arith.constant dense<0.000000e+00> : vector<8x8xf32>
    %303 = tpu.matmul %302, %287, %cst_100 {dimension_numbers = #tpu.dot_dimension_numbers<[1], [0], [0], [1], [0, 0, 1, 1], [], []>} : vector<8x8xf32>, vector<8x8xf32>, vector<8x8xf32> -> vector<8x8xf32>
    %304 = vector.extract_strided_slice %244 {offsets = [0, 24], sizes = [8, 8], strides = [1, 1]} : vector<8x32xf32> to vector<8x8xf32>
    %305 = vector.extract_strided_slice %245 {offsets = [0, 24], sizes = [8, 8], strides = [1, 1]} : vector<8x32xf32> to vector<8x8xf32>
    %306 = vector.extract_strided_slice %246 {offsets = [0, 24], sizes = [8, 8], strides = [1, 1]} : vector<8x32xf32> to vector<8x8xf32>
    "tpu.trace_start"() <{level = 10 : i32, message = "td,sd->ts"}> : () -> ()
    %cst_101 = arith.constant dense<0.000000e+00> : vector<8x8xf32>
    %307 = tpu.matmul %304, %305, %cst_101 {dimension_numbers = #tpu.dot_dimension_numbers<[1], [1], [0], [0], [0, 0, 1, 0], [], []>} : vector<8x8xf32>, vector<8x8xf32>, vector<8x8xf32> -> vector<8x8xf32>
    "tpu.trace_stop"() : () -> ()
    %cst_102 = arith.constant 0.353553385 : f32
    %308 = vector.broadcast %cst_102 : f32 to vector<8x8xf32>
    %309 = arith.mulf %307, %308 : vector<8x8xf32>
    %cst_103 = arith.constant -1.000000e+30 : f32
    %310 = vector.broadcast %cst_103 : f32 to vector<8x8xf32>
    %311 = arith.select %6, %309, %310 : vector<8x8xi1>, vector<8x8xf32>
    %cst_104 = arith.constant dense<0xFF800000> : vector<8xf32>
    %312 = vector.multi_reduction <maximumf>, %311, %cst_104 [1] : vector<8x8xf32> to vector<8xf32>
    %313 = vector.shape_cast %312 : vector<8xf32> to vector<8x1xf32>
    %314 = vector.broadcast %313 : vector<8x1xf32> to vector<8x8xf32>
    %315 = arith.subf %311, %314 : vector<8x8xf32>
    %316 = math.exp %315 : vector<8x8xf32>
    %cst_105 = arith.constant dense<0.000000e+00> : vector<8xf32>
    %317 = vector.multi_reduction <add>, %316, %cst_105 [1] : vector<8x8xf32> to vector<8xf32>
    %318 = vector.shape_cast %317 : vector<8xf32> to vector<8x1xf32>
    %319 = tpu.reciprocal %318 {approx = true} : vector<8x1xf32> -> vector<8x1xf32>
    %320 = vector.broadcast %319 : vector<8x1xf32> to vector<8x8xf32>
    %321 = arith.mulf %316, %320 : vector<8x8xf32>
    %cst_106 = arith.constant dense<0.000000e+00> : vector<8x8xf32>
    %322 = tpu.matmul %321, %306, %cst_106 {dimension_numbers = #tpu.dot_dimension_numbers<[1], [0], [0], [1], [0, 0, 1, 1], [], []>} : vector<8x8xf32>, vector<8x8xf32>, vector<8x8xf32> -> vector<8x8xf32>
    %323 = tpu.concatenate %265, %284, %303, %322 in 1 : vector<8x8xf32>, vector<8x8xf32>, vector<8x8xf32>, vector<8x8xf32> -> vector<8x32xf32>
    %324 = vector.extract_strided_slice %238 {offsets = [8, 0], sizes = [8, 32], strides = [1, 1]} : vector<16x32xf32> to vector<8x32xf32>
    %325 = vector.extract_strided_slice %243 {offsets = [8, 0], sizes = [8, 32], strides = [1, 1]} : vector<16x64xf32> to vector<8x32xf32>
    %326 = vector.extract_strided_slice %243 {offsets = [8, 32], sizes = [8, 32], strides = [1, 1]} : vector<16x64xf32> to vector<8x32xf32>
    %327 = vector.extract_strided_slice %324 {offsets = [0, 0], sizes = [8, 8], strides = [1, 1]} : vector<8x32xf32> to vector<8x8xf32>
    %328 = vector.extract_strided_slice %325 {offsets = [0, 0], sizes = [8, 8], strides = [1, 1]} : vector<8x32xf32> to vector<8x8xf32>
    %329 = vector.extract_strided_slice %326 {offsets = [0, 0], sizes = [8, 8], strides = [1, 1]} : vector<8x32xf32> to vector<8x8xf32>
    "tpu.trace_start"() <{level = 10 : i32, message = "td,sd->ts"}> : () -> ()
    %cst_107 = arith.constant dense<0.000000e+00> : vector<8x8xf32>
    %330 = tpu.matmul %327, %328, %cst_107 {dimension_numbers = #tpu.dot_dimension_numbers<[1], [1], [0], [0], [0, 0, 1, 0], [], []>} : vector<8x8xf32>, vector<8x8xf32>, vector<8x8xf32> -> vector<8x8xf32>
    "tpu.trace_stop"() : () -> ()
    %cst_108 = arith.constant 0.353553385 : f32
    %331 = vector.broadcast %cst_108 : f32 to vector<8x8xf32>
    %332 = arith.mulf %330, %331 : vector<8x8xf32>
    %cst_109 = arith.constant -1.000000e+30 : f32
    %333 = vector.broadcast %cst_109 : f32 to vector<8x8xf32>
    %334 = arith.select %6, %332, %333 : vector<8x8xi1>, vector<8x8xf32>
    %cst_110 = arith.constant dense<0xFF800000> : vector<8xf32>
    %335 = vector.multi_reduction <maximumf>, %334, %cst_110 [1] : vector<8x8xf32> to vector<8xf32>
    %336 = vector.shape_cast %335 : vector<8xf32> to vector<8x1xf32>
    %337 = vector.broadcast %336 : vector<8x1xf32> to vector<8x8xf32>
    %338 = arith.subf %334, %337 : vector<8x8xf32>
    %339 = math.exp %338 : vector<8x8xf32>
    %cst_111 = arith.constant dense<0.000000e+00> : vector<8xf32>
    %340 = vector.multi_reduction <add>, %339, %cst_111 [1] : vector<8x8xf32> to vector<8xf32>
    %341 = vector.shape_cast %340 : vector<8xf32> to vector<8x1xf32>
    %342 = tpu.reciprocal %341 {approx = true} : vector<8x1xf32> -> vector<8x1xf32>
    %343 = vector.broadcast %342 : vector<8x1xf32> to vector<8x8xf32>
    %344 = arith.mulf %339, %343 : vector<8x8xf32>
    %cst_112 = arith.constant dense<0.000000e+00> : vector<8x8xf32>
    %345 = tpu.matmul %344, %329, %cst_112 {dimension_numbers = #tpu.dot_dimension_numbers<[1], [0], [0], [1], [0, 0, 1, 1], [], []>} : vector<8x8xf32>, vector<8x8xf32>, vector<8x8xf32> -> vector<8x8xf32>
    %346 = vector.extract_strided_slice %324 {offsets = [0, 8], sizes = [8, 8], strides = [1, 1]} : vector<8x32xf32> to vector<8x8xf32>
    %347 = vector.extract_strided_slice %325 {offsets = [0, 8], sizes = [8, 8], strides = [1, 1]} : vector<8x32xf32> to vector<8x8xf32>
    %348 = vector.extract_strided_slice %326 {offsets = [0, 8], sizes = [8, 8], strides = [1, 1]} : vector<8x32xf32> to vector<8x8xf32>
    "tpu.trace_start"() <{level = 10 : i32, message = "td,sd->ts"}> : () -> ()
    %cst_113 = arith.constant dense<0.000000e+00> : vector<8x8xf32>
    %349 = tpu.matmul %346, %347, %cst_113 {dimension_numbers = #tpu.dot_dimension_numbers<[1], [1], [0], [0], [0, 0, 1, 0], [], []>} : vector<8x8xf32>, vector<8x8xf32>, vector<8x8xf32> -> vector<8x8xf32>
    "tpu.trace_stop"() : () -> ()
    %cst_114 = arith.constant 0.353553385 : f32
    %350 = vector.broadcast %cst_114 : f32 to vector<8x8xf32>
    %351 = arith.mulf %349, %350 : vector<8x8xf32>
    %cst_115 = arith.constant -1.000000e+30 : f32
    %352 = vector.broadcast %cst_115 : f32 to vector<8x8xf32>
    %353 = arith.select %6, %351, %352 : vector<8x8xi1>, vector<8x8xf32>
    %cst_116 = arith.constant dense<0xFF800000> : vector<8xf32>
    %354 = vector.multi_reduction <maximumf>, %353, %cst_116 [1] : vector<8x8xf32> to vector<8xf32>
    %355 = vector.shape_cast %354 : vector<8xf32> to vector<8x1xf32>
    %356 = vector.broadcast %355 : vector<8x1xf32> to vector<8x8xf32>
    %357 = arith.subf %353, %356 : vector<8x8xf32>
    %358 = math.exp %357 : vector<8x8xf32>
    %cst_117 = arith.constant dense<0.000000e+00> : vector<8xf32>
    %359 = vector.multi_reduction <add>, %358, %cst_117 [1] : vector<8x8xf32> to vector<8xf32>
    %360 = vector.shape_cast %359 : vector<8xf32> to vector<8x1xf32>
    %361 = tpu.reciprocal %360 {approx = true} : vector<8x1xf32> -> vector<8x1xf32>
    %362 = vector.broadcast %361 : vector<8x1xf32> to vector<8x8xf32>
    %363 = arith.mulf %358, %362 : vector<8x8xf32>
    %cst_118 = arith.constant dense<0.000000e+00> : vector<8x8xf32>
    %364 = tpu.matmul %363, %348, %cst_118 {dimension_numbers = #tpu.dot_dimension_numbers<[1], [0], [0], [1], [0, 0, 1, 1], [], []>} : vector<8x8xf32>, vector<8x8xf32>, vector<8x8xf32> -> vector<8x8xf32>
    %365 = vector.extract_strided_slice %324 {offsets = [0, 16], sizes = [8, 8], strides = [1, 1]} : vector<8x32xf32> to vector<8x8xf32>
    %366 = vector.extract_strided_slice %325 {offsets = [0, 16], sizes = [8, 8], strides = [1, 1]} : vector<8x32xf32> to vector<8x8xf32>
    %367 = vector.extract_strided_slice %326 {offsets = [0, 16], sizes = [8, 8], strides = [1, 1]} : vector<8x32xf32> to vector<8x8xf32>
    "tpu.trace_start"() <{level = 10 : i32, message = "td,sd->ts"}> : () -> ()
    %cst_119 = arith.constant dense<0.000000e+00> : vector<8x8xf32>
    %368 = tpu.matmul %365, %366, %cst_119 {dimension_numbers = #tpu.dot_dimension_numbers<[1], [1], [0], [0], [0, 0, 1, 0], [], []>} : vector<8x8xf32>, vector<8x8xf32>, vector<8x8xf32> -> vector<8x8xf32>
    "tpu.trace_stop"() : () -> ()
    %cst_120 = arith.constant 0.353553385 : f32
    %369 = vector.broadcast %cst_120 : f32 to vector<8x8xf32>
    %370 = arith.mulf %368, %369 : vector<8x8xf32>
    %cst_121 = arith.constant -1.000000e+30 : f32
    %371 = vector.broadcast %cst_121 : f32 to vector<8x8xf32>
    %372 = arith.select %6, %370, %371 : vector<8x8xi1>, vector<8x8xf32>
    %cst_122 = arith.constant dense<0xFF800000> : vector<8xf32>
    %373 = vector.multi_reduction <maximumf>, %372, %cst_122 [1] : vector<8x8xf32> to vector<8xf32>
    %374 = vector.shape_cast %373 : vector<8xf32> to vector<8x1xf32>
    %375 = vector.broadcast %374 : vector<8x1xf32> to vector<8x8xf32>
    %376 = arith.subf %372, %375 : vector<8x8xf32>
    %377 = math.exp %376 : vector<8x8xf32>
    %cst_123 = arith.constant dense<0.000000e+00> : vector<8xf32>
    %378 = vector.multi_reduction <add>, %377, %cst_123 [1] : vector<8x8xf32> to vector<8xf32>
    %379 = vector.shape_cast %378 : vector<8xf32> to vector<8x1xf32>
    %380 = tpu.reciprocal %379 {approx = true} : vector<8x1xf32> -> vector<8x1xf32>
    %381 = vector.broadcast %380 : vector<8x1xf32> to vector<8x8xf32>
    %382 = arith.mulf %377, %381 : vector<8x8xf32>
    %cst_124 = arith.constant dense<0.000000e+00> : vector<8x8xf32>
    %383 = tpu.matmul %382, %367, %cst_124 {dimension_numbers = #tpu.dot_dimension_numbers<[1], [0], [0], [1], [0, 0, 1, 1], [], []>} : vector<8x8xf32>, vector<8x8xf32>, vector<8x8xf32> -> vector<8x8xf32>
    %384 = vector.extract_strided_slice %324 {offsets = [0, 24], sizes = [8, 8], strides = [1, 1]} : vector<8x32xf32> to vector<8x8xf32>
    %385 = vector.extract_strided_slice %325 {offsets = [0, 24], sizes = [8, 8], strides = [1, 1]} : vector<8x32xf32> to vector<8x8xf32>
    %386 = vector.extract_strided_slice %326 {offsets = [0, 24], sizes = [8, 8], strides = [1, 1]} : vector<8x32xf32> to vector<8x8xf32>
    "tpu.trace_start"() <{level = 10 : i32, message = "td,sd->ts"}> : () -> ()
    %cst_125 = arith.constant dense<0.000000e+00> : vector<8x8xf32>
    %387 = tpu.matmul %384, %385, %cst_125 {dimension_numbers = #tpu.dot_dimension_numbers<[1], [1], [0], [0], [0, 0, 1, 0], [], []>} : vector<8x8xf32>, vector<8x8xf32>, vector<8x8xf32> -> vector<8x8xf32>
    "tpu.trace_stop"() : () -> ()
    %cst_126 = arith.constant 0.353553385 : f32
    %388 = vector.broadcast %cst_126 : f32 to vector<8x8xf32>
    %389 = arith.mulf %387, %388 : vector<8x8xf32>
    %cst_127 = arith.constant -1.000000e+30 : f32
    %390 = vector.broadcast %cst_127 : f32 to vector<8x8xf32>
    %391 = arith.select %6, %389, %390 : vector<8x8xi1>, vector<8x8xf32>
    %cst_128 = arith.constant dense<0xFF800000> : vector<8xf32>
    %392 = vector.multi_reduction <maximumf>, %391, %cst_128 [1] : vector<8x8xf32> to vector<8xf32>
    %393 = vector.shape_cast %392 : vector<8xf32> to vector<8x1xf32>
    %394 = vector.broadcast %393 : vector<8x1xf32> to vector<8x8xf32>
    %395 = arith.subf %391, %394 : vector<8x8xf32>
    %396 = math.exp %395 : vector<8x8xf32>
    %cst_129 = arith.constant dense<0.000000e+00> : vector<8xf32>
    %397 = vector.multi_reduction <add>, %396, %cst_129 [1] : vector<8x8xf32> to vector<8xf32>
    %398 = vector.shape_cast %397 : vector<8xf32> to vector<8x1xf32>
    %399 = tpu.reciprocal %398 {approx = true} : vector<8x1xf32> -> vector<8x1xf32>
    %400 = vector.broadcast %399 : vector<8x1xf32> to vector<8x8xf32>
    %401 = arith.mulf %396, %400 : vector<8x8xf32>
    %cst_130 = arith.constant dense<0.000000e+00> : vector<8x8xf32>
    %402 = tpu.matmul %401, %386, %cst_130 {dimension_numbers = #tpu.dot_dimension_numbers<[1], [0], [0], [1], [0, 0, 1, 1], [], []>} : vector<8x8xf32>, vector<8x8xf32>, vector<8x8xf32> -> vector<8x8xf32>
    %403 = tpu.concatenate %345, %364, %383, %402 in 1 : vector<8x8xf32>, vector<8x8xf32>, vector<8x8xf32>, vector<8x8xf32> -> vector<8x32xf32>
    %404 = tpu.concatenate %323, %403 in 0 : vector<8x32xf32>, vector<8x32xf32> -> vector<16x32xf32>
    %cst_131 = arith.constant dense<0.000000e+00> : vector<16x32xf32>
    %405 = tpu.matmul %404, %233, %cst_131 {dimension_numbers = #tpu.dot_dimension_numbers<[1], [0], [0], [1], [0, 0, 1, 1], [], []>} : vector<16x32xf32>, vector<32x32xf32>, vector<16x32xf32> -> vector<16x32xf32>
    %406 = vector.extract_strided_slice %2 {offsets = [5, 0], sizes = [1, 32], strides = [1, 1]} : vector<16x32xf32> to vector<1x32xf32>
    %407 = vector.broadcast %406 : vector<1x32xf32> to vector<16x32xf32>
    %408 = arith.addf %405, %407 : vector<16x32xf32>
    %409 = arith.addf %204, %408 : vector<16x32xf32>
    %410 = vector.extract_strided_slice %2 {offsets = [2, 0], sizes = [1, 32], strides = [1, 1]} : vector<16x32xf32> to vector<1x32xf32>
    %411 = vector.extract_strided_slice %2 {offsets = [3, 0], sizes = [1, 32], strides = [1, 1]} : vector<16x32xf32> to vector<1x32xf32>
    %cst_132 = arith.constant dense<0.000000e+00> : vector<16xf32>
    %412 = vector.multi_reduction <add>, %409, %cst_132 [1] : vector<16x32xf32> to vector<16xf32>
    %413 = vector.shape_cast %412 : vector<16xf32> to vector<16x1xf32>
    %cst_133 = arith.constant 3.200000e+01 : f32
    %414 = vector.broadcast %cst_133 : f32 to vector<16x1xf32>
    %415 = arith.divf %413, %414 : vector<16x1xf32>
    %416 = vector.broadcast %415 : vector<16x1xf32> to vector<16x32xf32>
    %417 = arith.subf %409, %416 : vector<16x32xf32>
    %418 = arith.mulf %417, %417 : vector<16x32xf32>
    %cst_134 = arith.constant dense<0.000000e+00> : vector<16xf32>
    %419 = vector.multi_reduction <add>, %418, %cst_134 [1] : vector<16x32xf32> to vector<16xf32>
    %420 = vector.shape_cast %419 : vector<16xf32> to vector<16x1xf32>
    %cst_135 = arith.constant 3.200000e+01 : f32
    %421 = vector.broadcast %cst_135 : f32 to vector<16x1xf32>
    %422 = arith.divf %420, %421 : vector<16x1xf32>
    %423 = vector.broadcast %415 : vector<16x1xf32> to vector<16x32xf32>
    %424 = arith.subf %409, %423 : vector<16x32xf32>
    %cst_136 = arith.constant 9.99999974E-6 : f32
    %425 = vector.broadcast %cst_136 : f32 to vector<16x1xf32>
    %426 = arith.addf %422, %425 : vector<16x1xf32>
    %427 = math.rsqrt %426 : vector<16x1xf32>
    %428 = vector.broadcast %427 : vector<16x1xf32> to vector<16x32xf32>
    %429 = arith.mulf %424, %428 : vector<16x32xf32>
    %430 = vector.broadcast %410 : vector<1x32xf32> to vector<16x32xf32>
    %431 = arith.mulf %429, %430 : vector<16x32xf32>
    %432 = vector.broadcast %411 : vector<1x32xf32> to vector<16x32xf32>
    %433 = arith.addf %431, %432 : vector<16x32xf32>
    %c0_137 = arith.constant 0 : index
    %c0_138 = arith.constant 0 : index
    %434 = vector.load %arg6[%c0_137, %c0_138] : memref<32x256xf32, #tpu.memory_space<vmem>>, vector<32x128xf32>
    %c0_139 = arith.constant 0 : index
    %c0_140 = arith.constant 0 : index
    %435 = vector.load %arg7[%c0_139, %c0_140] : memref<256x32xf32, #tpu.memory_space<vmem>>, vector<128x32xf32>
    %cst_141 = arith.constant dense<0.000000e+00> : vector<16x128xf32>
    %436 = tpu.matmul %433, %434, %cst_141 {dimension_numbers = #tpu.dot_dimension_numbers<[1], [0], [0], [1], [0, 0, 1, 1], [], []>} : vector<16x32xf32>, vector<32x128xf32>, vector<16x128xf32> -> vector<16x128xf32>
    %437 = vector.extract_strided_slice %3 {offsets = [0, 0], sizes = [1, 128], strides = [1, 1]} : vector<2x128xf32> to vector<1x128xf32>
    %438 = vector.broadcast %437 : vector<1x128xf32> to vector<16x128xf32>
    %439 = arith.addf %436, %438 : vector<16x128xf32>
    %cst_142 = arith.constant 5.000000e-01 : f32
    %440 = vector.broadcast %cst_142 : f32 to vector<16x128xf32>
    %441 = arith.mulf %440, %439 : vector<16x128xf32>
    %cst_143 = arith.constant 4.471500e-02 : f32
    %442 = vector.broadcast %cst_143 : f32 to vector<16x128xf32>
    %443 = arith.mulf %442, %439 : vector<16x128xf32>
    %444 = arith.mulf %443, %439 : vector<16x128xf32>
    %445 = arith.mulf %444, %439 : vector<16x128xf32>
    %446 = arith.addf %439, %445 : vector<16x128xf32>
    %cst_144 = arith.constant 0.797884583 : f32
    %447 = vector.broadcast %cst_144 : f32 to vector<16x128xf32>
    %448 = arith.mulf %447, %446 : vector<16x128xf32>
    %449 = math.tanh %448 : vector<16x128xf32>
    %cst_145 = arith.constant 1.000000e+00 : f32
    %450 = vector.broadcast %cst_145 : f32 to vector<16x128xf32>
    %451 = arith.addf %450, %449 : vector<16x128xf32>
    %452 = arith.mulf %441, %451 : vector<16x128xf32>
    %cst_146 = arith.constant dense<0.000000e+00> : vector<16x32xf32>
    %453 = tpu.matmul %452, %435, %cst_146 {dimension_numbers = #tpu.dot_dimension_numbers<[1], [0], [0], [1], [0, 0, 1, 1], [], []>} : vector<16x128xf32>, vector<128x32xf32>, vector<16x32xf32> -> vector<16x32xf32>
    %454 = vector.extract_strided_slice %2 {offsets = [6, 0], sizes = [1, 32], strides = [1, 1]} : vector<16x32xf32> to vector<1x32xf32>
    %455 = vector.broadcast %454 : vector<1x32xf32> to vector<16x32xf32>
    %456 = arith.addf %453, %455 : vector<16x32xf32>
    %457 = arith.addf %409, %456 : vector<16x32xf32>
    %458 = vector.extract_strided_slice %2 {offsets = [7, 0], sizes = [1, 32], strides = [1, 1]} : vector<16x32xf32> to vector<1x32xf32>
    %459 = vector.extract_strided_slice %2 {offsets = [8, 0], sizes = [1, 32], strides = [1, 1]} : vector<16x32xf32> to vector<1x32xf32>
    %cst_147 = arith.constant dense<0.000000e+00> : vector<16xf32>
    %460 = vector.multi_reduction <add>, %457, %cst_147 [1] : vector<16x32xf32> to vector<16xf32>
    %461 = vector.shape_cast %460 : vector<16xf32> to vector<16x1xf32>
    %cst_148 = arith.constant 3.200000e+01 : f32
    %462 = vector.broadcast %cst_148 : f32 to vector<16x1xf32>
    %463 = arith.divf %461, %462 : vector<16x1xf32>
    %464 = vector.broadcast %463 : vector<16x1xf32> to vector<16x32xf32>
    %465 = arith.subf %457, %464 : vector<16x32xf32>
    %466 = arith.mulf %465, %465 : vector<16x32xf32>
    %cst_149 = arith.constant dense<0.000000e+00> : vector<16xf32>
    %467 = vector.multi_reduction <add>, %466, %cst_149 [1] : vector<16x32xf32> to vector<16xf32>
    %468 = vector.shape_cast %467 : vector<16xf32> to vector<16x1xf32>
    %cst_150 = arith.constant 3.200000e+01 : f32
    %469 = vector.broadcast %cst_150 : f32 to vector<16x1xf32>
    %470 = arith.divf %468, %469 : vector<16x1xf32>
    %471 = vector.broadcast %463 : vector<16x1xf32> to vector<16x32xf32>
    %472 = arith.subf %457, %471 : vector<16x32xf32>
    %cst_151 = arith.constant 9.99999974E-6 : f32
    %473 = vector.broadcast %cst_151 : f32 to vector<16x1xf32>
    %474 = arith.addf %470, %473 : vector<16x1xf32>
    %475 = math.rsqrt %474 : vector<16x1xf32>
    %476 = vector.broadcast %475 : vector<16x1xf32> to vector<16x32xf32>
    %477 = arith.mulf %472, %476 : vector<16x32xf32>
    %478 = vector.broadcast %458 : vector<1x32xf32> to vector<16x32xf32>
    %479 = arith.mulf %477, %478 : vector<16x32xf32>
    %480 = vector.broadcast %459 : vector<1x32xf32> to vector<16x32xf32>
    %481 = arith.addf %479, %480 : vector<16x32xf32>
    %c2 = arith.constant 2 : index
    %c0_152 = arith.constant 0 : index
    %c0_153 = arith.constant 0 : index
    %482 = vector.load %arg3[%c2, %c0_152, %c0_153] : memref<4x32x96xf32, #tpu.memory_space<vmem>>, vector<1x32x96xf32>
    %483 = vector.shape_cast %482 : vector<1x32x96xf32> to vector<32x96xf32>
    %c2_154 = arith.constant 2 : index
    %c0_155 = arith.constant 0 : index
    %484 = vector.load %arg4[%c2_154, %c0_155] : memref<4x96xf32, #tpu.memory_space<vmem>>, vector<1x96xf32>
    %c2_156 = arith.constant 2 : index
    %c0_157 = arith.constant 0 : index
    %c0_158 = arith.constant 0 : index
    %485 = vector.load %arg5[%c2_156, %c0_157, %c0_158] : memref<4x32x32xf32, #tpu.memory_space<vmem>>, vector<1x32x32xf32>
    %486 = vector.shape_cast %485 : vector<1x32x32xf32> to vector<32x32xf32>
    %cst_159 = arith.constant dense<0.000000e+00> : vector<16x96xf32>
    %487 = tpu.matmul %481, %483, %cst_159 {dimension_numbers = #tpu.dot_dimension_numbers<[1], [0], [0], [1], [0, 0, 1, 1], [], []>} : vector<16x32xf32>, vector<32x96xf32>, vector<16x96xf32> -> vector<16x96xf32>
    %488 = vector.broadcast %484 : vector<1x96xf32> to vector<16x96xf32>
    %489 = arith.addf %487, %488 : vector<16x96xf32>
    %490 = vector.extract_strided_slice %489 {offsets = [0, 0], sizes = [8, 32], strides = [1, 1]} : vector<16x96xf32> to vector<8x32xf32>
    %491 = vector.extract_strided_slice %489 {offsets = [0, 32], sizes = [8, 32], strides = [1, 1]} : vector<16x96xf32> to vector<8x32xf32>
    %492 = vector.extract_strided_slice %489 {offsets = [0, 64], sizes = [8, 32], strides = [1, 1]} : vector<16x96xf32> to vector<8x32xf32>
    %493 = vector.extract_strided_slice %490 {offsets = [0, 0], sizes = [8, 8], strides = [1, 1]} : vector<8x32xf32> to vector<8x8xf32>
    %494 = vector.extract_strided_slice %491 {offsets = [0, 0], sizes = [8, 8], strides = [1, 1]} : vector<8x32xf32> to vector<8x8xf32>
    %495 = vector.extract_strided_slice %492 {offsets = [0, 0], sizes = [8, 8], strides = [1, 1]} : vector<8x32xf32> to vector<8x8xf32>
    "tpu.trace_start"() <{level = 10 : i32, message = "td,sd->ts"}> : () -> ()
    %cst_160 = arith.constant dense<0.000000e+00> : vector<8x8xf32>
    %496 = tpu.matmul %493, %494, %cst_160 {dimension_numbers = #tpu.dot_dimension_numbers<[1], [1], [0], [0], [0, 0, 1, 0], [], []>} : vector<8x8xf32>, vector<8x8xf32>, vector<8x8xf32> -> vector<8x8xf32>
    "tpu.trace_stop"() : () -> ()
    %cst_161 = arith.constant 0.353553385 : f32
    %497 = vector.broadcast %cst_161 : f32 to vector<8x8xf32>
    %498 = arith.mulf %496, %497 : vector<8x8xf32>
    %cst_162 = arith.constant -1.000000e+30 : f32
    %499 = vector.broadcast %cst_162 : f32 to vector<8x8xf32>
    %500 = arith.select %6, %498, %499 : vector<8x8xi1>, vector<8x8xf32>
    %cst_163 = arith.constant dense<0xFF800000> : vector<8xf32>
    %501 = vector.multi_reduction <maximumf>, %500, %cst_163 [1] : vector<8x8xf32> to vector<8xf32>
    %502 = vector.shape_cast %501 : vector<8xf32> to vector<8x1xf32>
    %503 = vector.broadcast %502 : vector<8x1xf32> to vector<8x8xf32>
    %504 = arith.subf %500, %503 : vector<8x8xf32>
    %505 = math.exp %504 : vector<8x8xf32>
    %cst_164 = arith.constant dense<0.000000e+00> : vector<8xf32>
    %506 = vector.multi_reduction <add>, %505, %cst_164 [1] : vector<8x8xf32> to vector<8xf32>
    %507 = vector.shape_cast %506 : vector<8xf32> to vector<8x1xf32>
    %508 = tpu.reciprocal %507 {approx = true} : vector<8x1xf32> -> vector<8x1xf32>
    %509 = vector.broadcast %508 : vector<8x1xf32> to vector<8x8xf32>
    %510 = arith.mulf %505, %509 : vector<8x8xf32>
    %cst_165 = arith.constant dense<0.000000e+00> : vector<8x8xf32>
    %511 = tpu.matmul %510, %495, %cst_165 {dimension_numbers = #tpu.dot_dimension_numbers<[1], [0], [0], [1], [0, 0, 1, 1], [], []>} : vector<8x8xf32>, vector<8x8xf32>, vector<8x8xf32> -> vector<8x8xf32>
    %512 = vector.extract_strided_slice %490 {offsets = [0, 8], sizes = [8, 8], strides = [1, 1]} : vector<8x32xf32> to vector<8x8xf32>
    %513 = vector.extract_strided_slice %491 {offsets = [0, 8], sizes = [8, 8], strides = [1, 1]} : vector<8x32xf32> to vector<8x8xf32>
    %514 = vector.extract_strided_slice %492 {offsets = [0, 8], sizes = [8, 8], strides = [1, 1]} : vector<8x32xf32> to vector<8x8xf32>
    "tpu.trace_start"() <{level = 10 : i32, message = "td,sd->ts"}> : () -> ()
    %cst_166 = arith.constant dense<0.000000e+00> : vector<8x8xf32>
    %515 = tpu.matmul %512, %513, %cst_166 {dimension_numbers = #tpu.dot_dimension_numbers<[1], [1], [0], [0], [0, 0, 1, 0], [], []>} : vector<8x8xf32>, vector<8x8xf32>, vector<8x8xf32> -> vector<8x8xf32>
    "tpu.trace_stop"() : () -> ()
    %cst_167 = arith.constant 0.353553385 : f32
    %516 = vector.broadcast %cst_167 : f32 to vector<8x8xf32>
    %517 = arith.mulf %515, %516 : vector<8x8xf32>
    %cst_168 = arith.constant -1.000000e+30 : f32
    %518 = vector.broadcast %cst_168 : f32 to vector<8x8xf32>
    %519 = arith.select %6, %517, %518 : vector<8x8xi1>, vector<8x8xf32>
    %cst_169 = arith.constant dense<0xFF800000> : vector<8xf32>
    %520 = vector.multi_reduction <maximumf>, %519, %cst_169 [1] : vector<8x8xf32> to vector<8xf32>
    %521 = vector.shape_cast %520 : vector<8xf32> to vector<8x1xf32>
    %522 = vector.broadcast %521 : vector<8x1xf32> to vector<8x8xf32>
    %523 = arith.subf %519, %522 : vector<8x8xf32>
    %524 = math.exp %523 : vector<8x8xf32>
    %cst_170 = arith.constant dense<0.000000e+00> : vector<8xf32>
    %525 = vector.multi_reduction <add>, %524, %cst_170 [1] : vector<8x8xf32> to vector<8xf32>
    %526 = vector.shape_cast %525 : vector<8xf32> to vector<8x1xf32>
    %527 = tpu.reciprocal %526 {approx = true} : vector<8x1xf32> -> vector<8x1xf32>
    %528 = vector.broadcast %527 : vector<8x1xf32> to vector<8x8xf32>
    %529 = arith.mulf %524, %528 : vector<8x8xf32>
    %cst_171 = arith.constant dense<0.000000e+00> : vector<8x8xf32>
    %530 = tpu.matmul %529, %514, %cst_171 {dimension_numbers = #tpu.dot_dimension_numbers<[1], [0], [0], [1], [0, 0, 1, 1], [], []>} : vector<8x8xf32>, vector<8x8xf32>, vector<8x8xf32> -> vector<8x8xf32>
    %531 = vector.extract_strided_slice %490 {offsets = [0, 16], sizes = [8, 8], strides = [1, 1]} : vector<8x32xf32> to vector<8x8xf32>
    %532 = vector.extract_strided_slice %491 {offsets = [0, 16], sizes = [8, 8], strides = [1, 1]} : vector<8x32xf32> to vector<8x8xf32>
    %533 = vector.extract_strided_slice %492 {offsets = [0, 16], sizes = [8, 8], strides = [1, 1]} : vector<8x32xf32> to vector<8x8xf32>
    "tpu.trace_start"() <{level = 10 : i32, message = "td,sd->ts"}> : () -> ()
    %cst_172 = arith.constant dense<0.000000e+00> : vector<8x8xf32>
    %534 = tpu.matmul %531, %532, %cst_172 {dimension_numbers = #tpu.dot_dimension_numbers<[1], [1], [0], [0], [0, 0, 1, 0], [], []>} : vector<8x8xf32>, vector<8x8xf32>, vector<8x8xf32> -> vector<8x8xf32>
    "tpu.trace_stop"() : () -> ()
    %cst_173 = arith.constant 0.353553385 : f32
    %535 = vector.broadcast %cst_173 : f32 to vector<8x8xf32>
    %536 = arith.mulf %534, %535 : vector<8x8xf32>
    %cst_174 = arith.constant -1.000000e+30 : f32
    %537 = vector.broadcast %cst_174 : f32 to vector<8x8xf32>
    %538 = arith.select %6, %536, %537 : vector<8x8xi1>, vector<8x8xf32>
    %cst_175 = arith.constant dense<0xFF800000> : vector<8xf32>
    %539 = vector.multi_reduction <maximumf>, %538, %cst_175 [1] : vector<8x8xf32> to vector<8xf32>
    %540 = vector.shape_cast %539 : vector<8xf32> to vector<8x1xf32>
    %541 = vector.broadcast %540 : vector<8x1xf32> to vector<8x8xf32>
    %542 = arith.subf %538, %541 : vector<8x8xf32>
    %543 = math.exp %542 : vector<8x8xf32>
    %cst_176 = arith.constant dense<0.000000e+00> : vector<8xf32>
    %544 = vector.multi_reduction <add>, %543, %cst_176 [1] : vector<8x8xf32> to vector<8xf32>
    %545 = vector.shape_cast %544 : vector<8xf32> to vector<8x1xf32>
    %546 = tpu.reciprocal %545 {approx = true} : vector<8x1xf32> -> vector<8x1xf32>
    %547 = vector.broadcast %546 : vector<8x1xf32> to vector<8x8xf32>
    %548 = arith.mulf %543, %547 : vector<8x8xf32>
    %cst_177 = arith.constant dense<0.000000e+00> : vector<8x8xf32>
    %549 = tpu.matmul %548, %533, %cst_177 {dimension_numbers = #tpu.dot_dimension_numbers<[1], [0], [0], [1], [0, 0, 1, 1], [], []>} : vector<8x8xf32>, vector<8x8xf32>, vector<8x8xf32> -> vector<8x8xf32>
    %550 = vector.extract_strided_slice %490 {offsets = [0, 24], sizes = [8, 8], strides = [1, 1]} : vector<8x32xf32> to vector<8x8xf32>
    %551 = vector.extract_strided_slice %491 {offsets = [0, 24], sizes = [8, 8], strides = [1, 1]} : vector<8x32xf32> to vector<8x8xf32>
    %552 = vector.extract_strided_slice %492 {offsets = [0, 24], sizes = [8, 8], strides = [1, 1]} : vector<8x32xf32> to vector<8x8xf32>
    "tpu.trace_start"() <{level = 10 : i32, message = "td,sd->ts"}> : () -> ()
    %cst_178 = arith.constant dense<0.000000e+00> : vector<8x8xf32>
    %553 = tpu.matmul %550, %551, %cst_178 {dimension_numbers = #tpu.dot_dimension_numbers<[1], [1], [0], [0], [0, 0, 1, 0], [], []>} : vector<8x8xf32>, vector<8x8xf32>, vector<8x8xf32> -> vector<8x8xf32>
    "tpu.trace_stop"() : () -> ()
    %cst_179 = arith.constant 0.353553385 : f32
    %554 = vector.broadcast %cst_179 : f32 to vector<8x8xf32>
    %555 = arith.mulf %553, %554 : vector<8x8xf32>
    %cst_180 = arith.constant -1.000000e+30 : f32
    %556 = vector.broadcast %cst_180 : f32 to vector<8x8xf32>
    %557 = arith.select %6, %555, %556 : vector<8x8xi1>, vector<8x8xf32>
    %cst_181 = arith.constant dense<0xFF800000> : vector<8xf32>
    %558 = vector.multi_reduction <maximumf>, %557, %cst_181 [1] : vector<8x8xf32> to vector<8xf32>
    %559 = vector.shape_cast %558 : vector<8xf32> to vector<8x1xf32>
    %560 = vector.broadcast %559 : vector<8x1xf32> to vector<8x8xf32>
    %561 = arith.subf %557, %560 : vector<8x8xf32>
    %562 = math.exp %561 : vector<8x8xf32>
    %cst_182 = arith.constant dense<0.000000e+00> : vector<8xf32>
    %563 = vector.multi_reduction <add>, %562, %cst_182 [1] : vector<8x8xf32> to vector<8xf32>
    %564 = vector.shape_cast %563 : vector<8xf32> to vector<8x1xf32>
    %565 = tpu.reciprocal %564 {approx = true} : vector<8x1xf32> -> vector<8x1xf32>
    %566 = vector.broadcast %565 : vector<8x1xf32> to vector<8x8xf32>
    %567 = arith.mulf %562, %566 : vector<8x8xf32>
    %cst_183 = arith.constant dense<0.000000e+00> : vector<8x8xf32>
    %568 = tpu.matmul %567, %552, %cst_183 {dimension_numbers = #tpu.dot_dimension_numbers<[1], [0], [0], [1], [0, 0, 1, 1], [], []>} : vector<8x8xf32>, vector<8x8xf32>, vector<8x8xf32> -> vector<8x8xf32>
    %569 = tpu.concatenate %511, %530, %549, %568 in 1 : vector<8x8xf32>, vector<8x8xf32>, vector<8x8xf32>, vector<8x8xf32> -> vector<8x32xf32>
    %570 = vector.extract_strided_slice %489 {offsets = [8, 0], sizes = [8, 32], strides = [1, 1]} : vector<16x96xf32> to vector<8x32xf32>
    %571 = vector.extract_strided_slice %489 {offsets = [8, 32], sizes = [8, 32], strides = [1, 1]} : vector<16x96xf32> to vector<8x32xf32>
    %572 = vector.extract_strided_slice %489 {offsets = [8, 64], sizes = [8, 32], strides = [1, 1]} : vector<16x96xf32> to vector<8x32xf32>
    %573 = vector.extract_strided_slice %570 {offsets = [0, 0], sizes = [8, 8], strides = [1, 1]} : vector<8x32xf32> to vector<8x8xf32>
    %574 = vector.extract_strided_slice %571 {offsets = [0, 0], sizes = [8, 8], strides = [1, 1]} : vector<8x32xf32> to vector<8x8xf32>
    %575 = vector.extract_strided_slice %572 {offsets = [0, 0], sizes = [8, 8], strides = [1, 1]} : vector<8x32xf32> to vector<8x8xf32>
    "tpu.trace_start"() <{level = 10 : i32, message = "td,sd->ts"}> : () -> ()
    %cst_184 = arith.constant dense<0.000000e+00> : vector<8x8xf32>
    %576 = tpu.matmul %573, %574, %cst_184 {dimension_numbers = #tpu.dot_dimension_numbers<[1], [1], [0], [0], [0, 0, 1, 0], [], []>} : vector<8x8xf32>, vector<8x8xf32>, vector<8x8xf32> -> vector<8x8xf32>
    "tpu.trace_stop"() : () -> ()
    %cst_185 = arith.constant 0.353553385 : f32
    %577 = vector.broadcast %cst_185 : f32 to vector<8x8xf32>
    %578 = arith.mulf %576, %577 : vector<8x8xf32>
    %cst_186 = arith.constant -1.000000e+30 : f32
    %579 = vector.broadcast %cst_186 : f32 to vector<8x8xf32>
    %580 = arith.select %6, %578, %579 : vector<8x8xi1>, vector<8x8xf32>
    %cst_187 = arith.constant dense<0xFF800000> : vector<8xf32>
    %581 = vector.multi_reduction <maximumf>, %580, %cst_187 [1] : vector<8x8xf32> to vector<8xf32>
    %582 = vector.shape_cast %581 : vector<8xf32> to vector<8x1xf32>
    %583 = vector.broadcast %582 : vector<8x1xf32> to vector<8x8xf32>
    %584 = arith.subf %580, %583 : vector<8x8xf32>
    %585 = math.exp %584 : vector<8x8xf32>
    %cst_188 = arith.constant dense<0.000000e+00> : vector<8xf32>
    %586 = vector.multi_reduction <add>, %585, %cst_188 [1] : vector<8x8xf32> to vector<8xf32>
    %587 = vector.shape_cast %586 : vector<8xf32> to vector<8x1xf32>
    %588 = tpu.reciprocal %587 {approx = true} : vector<8x1xf32> -> vector<8x1xf32>
    %589 = vector.broadcast %588 : vector<8x1xf32> to vector<8x8xf32>
    %590 = arith.mulf %585, %589 : vector<8x8xf32>
    %cst_189 = arith.constant dense<0.000000e+00> : vector<8x8xf32>
    %591 = tpu.matmul %590, %575, %cst_189 {dimension_numbers = #tpu.dot_dimension_numbers<[1], [0], [0], [1], [0, 0, 1, 1], [], []>} : vector<8x8xf32>, vector<8x8xf32>, vector<8x8xf32> -> vector<8x8xf32>
    %592 = vector.extract_strided_slice %570 {offsets = [0, 8], sizes = [8, 8], strides = [1, 1]} : vector<8x32xf32> to vector<8x8xf32>
    %593 = vector.extract_strided_slice %571 {offsets = [0, 8], sizes = [8, 8], strides = [1, 1]} : vector<8x32xf32> to vector<8x8xf32>
    %594 = vector.extract_strided_slice %572 {offsets = [0, 8], sizes = [8, 8], strides = [1, 1]} : vector<8x32xf32> to vector<8x8xf32>
    "tpu.trace_start"() <{level = 10 : i32, message = "td,sd->ts"}> : () -> ()
    %cst_190 = arith.constant dense<0.000000e+00> : vector<8x8xf32>
    %595 = tpu.matmul %592, %593, %cst_190 {dimension_numbers = #tpu.dot_dimension_numbers<[1], [1], [0], [0], [0, 0, 1, 0], [], []>} : vector<8x8xf32>, vector<8x8xf32>, vector<8x8xf32> -> vector<8x8xf32>
    "tpu.trace_stop"() : () -> ()
    %cst_191 = arith.constant 0.353553385 : f32
    %596 = vector.broadcast %cst_191 : f32 to vector<8x8xf32>
    %597 = arith.mulf %595, %596 : vector<8x8xf32>
    %cst_192 = arith.constant -1.000000e+30 : f32
    %598 = vector.broadcast %cst_192 : f32 to vector<8x8xf32>
    %599 = arith.select %6, %597, %598 : vector<8x8xi1>, vector<8x8xf32>
    %cst_193 = arith.constant dense<0xFF800000> : vector<8xf32>
    %600 = vector.multi_reduction <maximumf>, %599, %cst_193 [1] : vector<8x8xf32> to vector<8xf32>
    %601 = vector.shape_cast %600 : vector<8xf32> to vector<8x1xf32>
    %602 = vector.broadcast %601 : vector<8x1xf32> to vector<8x8xf32>
    %603 = arith.subf %599, %602 : vector<8x8xf32>
    %604 = math.exp %603 : vector<8x8xf32>
    %cst_194 = arith.constant dense<0.000000e+00> : vector<8xf32>
    %605 = vector.multi_reduction <add>, %604, %cst_194 [1] : vector<8x8xf32> to vector<8xf32>
    %606 = vector.shape_cast %605 : vector<8xf32> to vector<8x1xf32>
    %607 = tpu.reciprocal %606 {approx = true} : vector<8x1xf32> -> vector<8x1xf32>
    %608 = vector.broadcast %607 : vector<8x1xf32> to vector<8x8xf32>
    %609 = arith.mulf %604, %608 : vector<8x8xf32>
    %cst_195 = arith.constant dense<0.000000e+00> : vector<8x8xf32>
    %610 = tpu.matmul %609, %594, %cst_195 {dimension_numbers = #tpu.dot_dimension_numbers<[1], [0], [0], [1], [0, 0, 1, 1], [], []>} : vector<8x8xf32>, vector<8x8xf32>, vector<8x8xf32> -> vector<8x8xf32>
    %611 = vector.extract_strided_slice %570 {offsets = [0, 16], sizes = [8, 8], strides = [1, 1]} : vector<8x32xf32> to vector<8x8xf32>
    %612 = vector.extract_strided_slice %571 {offsets = [0, 16], sizes = [8, 8], strides = [1, 1]} : vector<8x32xf32> to vector<8x8xf32>
    %613 = vector.extract_strided_slice %572 {offsets = [0, 16], sizes = [8, 8], strides = [1, 1]} : vector<8x32xf32> to vector<8x8xf32>
    "tpu.trace_start"() <{level = 10 : i32, message = "td,sd->ts"}> : () -> ()
    %cst_196 = arith.constant dense<0.000000e+00> : vector<8x8xf32>
    %614 = tpu.matmul %611, %612, %cst_196 {dimension_numbers = #tpu.dot_dimension_numbers<[1], [1], [0], [0], [0, 0, 1, 0], [], []>} : vector<8x8xf32>, vector<8x8xf32>, vector<8x8xf32> -> vector<8x8xf32>
    "tpu.trace_stop"() : () -> ()
    %cst_197 = arith.constant 0.353553385 : f32
    %615 = vector.broadcast %cst_197 : f32 to vector<8x8xf32>
    %616 = arith.mulf %614, %615 : vector<8x8xf32>
    %cst_198 = arith.constant -1.000000e+30 : f32
    %617 = vector.broadcast %cst_198 : f32 to vector<8x8xf32>
    %618 = arith.select %6, %616, %617 : vector<8x8xi1>, vector<8x8xf32>
    %cst_199 = arith.constant dense<0xFF800000> : vector<8xf32>
    %619 = vector.multi_reduction <maximumf>, %618, %cst_199 [1] : vector<8x8xf32> to vector<8xf32>
    %620 = vector.shape_cast %619 : vector<8xf32> to vector<8x1xf32>
    %621 = vector.broadcast %620 : vector<8x1xf32> to vector<8x8xf32>
    %622 = arith.subf %618, %621 : vector<8x8xf32>
    %623 = math.exp %622 : vector<8x8xf32>
    %cst_200 = arith.constant dense<0.000000e+00> : vector<8xf32>
    %624 = vector.multi_reduction <add>, %623, %cst_200 [1] : vector<8x8xf32> to vector<8xf32>
    %625 = vector.shape_cast %624 : vector<8xf32> to vector<8x1xf32>
    %626 = tpu.reciprocal %625 {approx = true} : vector<8x1xf32> -> vector<8x1xf32>
    %627 = vector.broadcast %626 : vector<8x1xf32> to vector<8x8xf32>
    %628 = arith.mulf %623, %627 : vector<8x8xf32>
    %cst_201 = arith.constant dense<0.000000e+00> : vector<8x8xf32>
    %629 = tpu.matmul %628, %613, %cst_201 {dimension_numbers = #tpu.dot_dimension_numbers<[1], [0], [0], [1], [0, 0, 1, 1], [], []>} : vector<8x8xf32>, vector<8x8xf32>, vector<8x8xf32> -> vector<8x8xf32>
    %630 = vector.extract_strided_slice %570 {offsets = [0, 24], sizes = [8, 8], strides = [1, 1]} : vector<8x32xf32> to vector<8x8xf32>
    %631 = vector.extract_strided_slice %571 {offsets = [0, 24], sizes = [8, 8], strides = [1, 1]} : vector<8x32xf32> to vector<8x8xf32>
    %632 = vector.extract_strided_slice %572 {offsets = [0, 24], sizes = [8, 8], strides = [1, 1]} : vector<8x32xf32> to vector<8x8xf32>
    "tpu.trace_start"() <{level = 10 : i32, message = "td,sd->ts"}> : () -> ()
    %cst_202 = arith.constant dense<0.000000e+00> : vector<8x8xf32>
    %633 = tpu.matmul %630, %631, %cst_202 {dimension_numbers = #tpu.dot_dimension_numbers<[1], [1], [0], [0], [0, 0, 1, 0], [], []>} : vector<8x8xf32>, vector<8x8xf32>, vector<8x8xf32> -> vector<8x8xf32>
    "tpu.trace_stop"() : () -> ()
    %cst_203 = arith.constant 0.353553385 : f32
    %634 = vector.broadcast %cst_203 : f32 to vector<8x8xf32>
    %635 = arith.mulf %633, %634 : vector<8x8xf32>
    %cst_204 = arith.constant -1.000000e+30 : f32
    %636 = vector.broadcast %cst_204 : f32 to vector<8x8xf32>
    %637 = arith.select %6, %635, %636 : vector<8x8xi1>, vector<8x8xf32>
    %cst_205 = arith.constant dense<0xFF800000> : vector<8xf32>
    %638 = vector.multi_reduction <maximumf>, %637, %cst_205 [1] : vector<8x8xf32> to vector<8xf32>
    %639 = vector.shape_cast %638 : vector<8xf32> to vector<8x1xf32>
    %640 = vector.broadcast %639 : vector<8x1xf32> to vector<8x8xf32>
    %641 = arith.subf %637, %640 : vector<8x8xf32>
    %642 = math.exp %641 : vector<8x8xf32>
    %cst_206 = arith.constant dense<0.000000e+00> : vector<8xf32>
    %643 = vector.multi_reduction <add>, %642, %cst_206 [1] : vector<8x8xf32> to vector<8xf32>
    %644 = vector.shape_cast %643 : vector<8xf32> to vector<8x1xf32>
    %645 = tpu.reciprocal %644 {approx = true} : vector<8x1xf32> -> vector<8x1xf32>
    %646 = vector.broadcast %645 : vector<8x1xf32> to vector<8x8xf32>
    %647 = arith.mulf %642, %646 : vector<8x8xf32>
    %cst_207 = arith.constant dense<0.000000e+00> : vector<8x8xf32>
    %648 = tpu.matmul %647, %632, %cst_207 {dimension_numbers = #tpu.dot_dimension_numbers<[1], [0], [0], [1], [0, 0, 1, 1], [], []>} : vector<8x8xf32>, vector<8x8xf32>, vector<8x8xf32> -> vector<8x8xf32>
    %649 = tpu.concatenate %591, %610, %629, %648 in 1 : vector<8x8xf32>, vector<8x8xf32>, vector<8x8xf32>, vector<8x8xf32> -> vector<8x32xf32>
    %650 = tpu.concatenate %569, %649 in 0 : vector<8x32xf32>, vector<8x32xf32> -> vector<16x32xf32>
    %cst_208 = arith.constant dense<0.000000e+00> : vector<16x32xf32>
    %651 = tpu.matmul %650, %486, %cst_208 {dimension_numbers = #tpu.dot_dimension_numbers<[1], [0], [0], [1], [0, 0, 1, 1], [], []>} : vector<16x32xf32>, vector<32x32xf32>, vector<16x32xf32> -> vector<16x32xf32>
    %652 = vector.extract_strided_slice %2 {offsets = [11, 0], sizes = [1, 32], strides = [1, 1]} : vector<16x32xf32> to vector<1x32xf32>
    %653 = vector.broadcast %652 : vector<1x32xf32> to vector<16x32xf32>
    %654 = arith.addf %651, %653 : vector<16x32xf32>
    %655 = arith.addf %457, %654 : vector<16x32xf32>
    %656 = vector.extract_strided_slice %2 {offsets = [7, 0], sizes = [1, 32], strides = [1, 1]} : vector<16x32xf32> to vector<1x32xf32>
    %657 = vector.extract_strided_slice %2 {offsets = [8, 0], sizes = [1, 32], strides = [1, 1]} : vector<16x32xf32> to vector<1x32xf32>
    %cst_209 = arith.constant dense<0.000000e+00> : vector<16xf32>
    %658 = vector.multi_reduction <add>, %655, %cst_209 [1] : vector<16x32xf32> to vector<16xf32>
    %659 = vector.shape_cast %658 : vector<16xf32> to vector<16x1xf32>
    %cst_210 = arith.constant 3.200000e+01 : f32
    %660 = vector.broadcast %cst_210 : f32 to vector<16x1xf32>
    %661 = arith.divf %659, %660 : vector<16x1xf32>
    %662 = vector.broadcast %661 : vector<16x1xf32> to vector<16x32xf32>
    %663 = arith.subf %655, %662 : vector<16x32xf32>
    %664 = arith.mulf %663, %663 : vector<16x32xf32>
    %cst_211 = arith.constant dense<0.000000e+00> : vector<16xf32>
    %665 = vector.multi_reduction <add>, %664, %cst_211 [1] : vector<16x32xf32> to vector<16xf32>
    %666 = vector.shape_cast %665 : vector<16xf32> to vector<16x1xf32>
    %cst_212 = arith.constant 3.200000e+01 : f32
    %667 = vector.broadcast %cst_212 : f32 to vector<16x1xf32>
    %668 = arith.divf %666, %667 : vector<16x1xf32>
    %669 = vector.broadcast %661 : vector<16x1xf32> to vector<16x32xf32>
    %670 = arith.subf %655, %669 : vector<16x32xf32>
    %cst_213 = arith.constant 9.99999974E-6 : f32
    %671 = vector.broadcast %cst_213 : f32 to vector<16x1xf32>
    %672 = arith.addf %668, %671 : vector<16x1xf32>
    %673 = math.rsqrt %672 : vector<16x1xf32>
    %674 = vector.broadcast %673 : vector<16x1xf32> to vector<16x32xf32>
    %675 = arith.mulf %670, %674 : vector<16x32xf32>
    %676 = vector.broadcast %656 : vector<1x32xf32> to vector<16x32xf32>
    %677 = arith.mulf %675, %676 : vector<16x32xf32>
    %678 = vector.broadcast %657 : vector<1x32xf32> to vector<16x32xf32>
    %679 = arith.addf %677, %678 : vector<16x32xf32>
    %c3 = arith.constant 3 : index
    %c0_214 = arith.constant 0 : index
    %c0_215 = arith.constant 0 : index
    %680 = vector.load %arg3[%c3, %c0_214, %c0_215] : memref<4x32x96xf32, #tpu.memory_space<vmem>>, vector<1x32x96xf32>
    %681 = vector.shape_cast %680 : vector<1x32x96xf32> to vector<32x96xf32>
    %c3_216 = arith.constant 3 : index
    %c0_217 = arith.constant 0 : index
    %682 = vector.load %arg4[%c3_216, %c0_217] : memref<4x96xf32, #tpu.memory_space<vmem>>, vector<1x96xf32>
    %c3_218 = arith.constant 3 : index
    %c0_219 = arith.constant 0 : index
    %c0_220 = arith.constant 0 : index
    %683 = vector.load %arg5[%c3_218, %c0_219, %c0_220] : memref<4x32x32xf32, #tpu.memory_space<vmem>>, vector<1x32x32xf32>
    %684 = vector.shape_cast %683 : vector<1x32x32xf32> to vector<32x32xf32>
    %685 = vector.extract_strided_slice %681 {offsets = [0, 0], sizes = [32, 32], strides = [1, 1]} : vector<32x96xf32> to vector<32x32xf32>
    %cst_221 = arith.constant dense<0.000000e+00> : vector<16x32xf32>
    %686 = tpu.matmul %679, %685, %cst_221 {dimension_numbers = #tpu.dot_dimension_numbers<[1], [0], [0], [1], [0, 0, 1, 1], [], []>} : vector<16x32xf32>, vector<32x32xf32>, vector<16x32xf32> -> vector<16x32xf32>
    %687 = vector.extract_strided_slice %682 {offsets = [0, 0], sizes = [1, 32], strides = [1, 1]} : vector<1x96xf32> to vector<1x32xf32>
    %688 = vector.broadcast %687 : vector<1x32xf32> to vector<16x32xf32>
    %689 = arith.addf %686, %688 : vector<16x32xf32>
    %690 = vector.extract_strided_slice %681 {offsets = [0, 32], sizes = [32, 64], strides = [1, 1]} : vector<32x96xf32> to vector<32x64xf32>
    %cst_222 = arith.constant dense<0.000000e+00> : vector<16x64xf32>
    %691 = tpu.matmul %1, %690, %cst_222 {dimension_numbers = #tpu.dot_dimension_numbers<[1], [0], [0], [1], [0, 0, 1, 1], [], []>} : vector<16x32xf32>, vector<32x64xf32>, vector<16x64xf32> -> vector<16x64xf32>
    %692 = vector.extract_strided_slice %682 {offsets = [0, 32], sizes = [1, 64], strides = [1, 1]} : vector<1x96xf32> to vector<1x64xf32>
    %693 = vector.broadcast %692 : vector<1x64xf32> to vector<16x64xf32>
    %694 = arith.addf %691, %693 : vector<16x64xf32>
    %695 = vector.extract_strided_slice %689 {offsets = [0, 0], sizes = [8, 32], strides = [1, 1]} : vector<16x32xf32> to vector<8x32xf32>
    %696 = vector.extract_strided_slice %694 {offsets = [0, 0], sizes = [8, 32], strides = [1, 1]} : vector<16x64xf32> to vector<8x32xf32>
    %697 = vector.extract_strided_slice %694 {offsets = [0, 32], sizes = [8, 32], strides = [1, 1]} : vector<16x64xf32> to vector<8x32xf32>
    %698 = vector.extract_strided_slice %695 {offsets = [0, 0], sizes = [8, 8], strides = [1, 1]} : vector<8x32xf32> to vector<8x8xf32>
    %699 = vector.extract_strided_slice %696 {offsets = [0, 0], sizes = [8, 8], strides = [1, 1]} : vector<8x32xf32> to vector<8x8xf32>
    %700 = vector.extract_strided_slice %697 {offsets = [0, 0], sizes = [8, 8], strides = [1, 1]} : vector<8x32xf32> to vector<8x8xf32>
    "tpu.trace_start"() <{level = 10 : i32, message = "td,sd->ts"}> : () -> ()
    %cst_223 = arith.constant dense<0.000000e+00> : vector<8x8xf32>
    %701 = tpu.matmul %698, %699, %cst_223 {dimension_numbers = #tpu.dot_dimension_numbers<[1], [1], [0], [0], [0, 0, 1, 0], [], []>} : vector<8x8xf32>, vector<8x8xf32>, vector<8x8xf32> -> vector<8x8xf32>
    "tpu.trace_stop"() : () -> ()
    %cst_224 = arith.constant 0.353553385 : f32
    %702 = vector.broadcast %cst_224 : f32 to vector<8x8xf32>
    %703 = arith.mulf %701, %702 : vector<8x8xf32>
    %cst_225 = arith.constant -1.000000e+30 : f32
    %704 = vector.broadcast %cst_225 : f32 to vector<8x8xf32>
    %705 = arith.select %6, %703, %704 : vector<8x8xi1>, vector<8x8xf32>
    %cst_226 = arith.constant dense<0xFF800000> : vector<8xf32>
    %706 = vector.multi_reduction <maximumf>, %705, %cst_226 [1] : vector<8x8xf32> to vector<8xf32>
    %707 = vector.shape_cast %706 : vector<8xf32> to vector<8x1xf32>
    %708 = vector.broadcast %707 : vector<8x1xf32> to vector<8x8xf32>
    %709 = arith.subf %705, %708 : vector<8x8xf32>
    %710 = math.exp %709 : vector<8x8xf32>
    %cst_227 = arith.constant dense<0.000000e+00> : vector<8xf32>
    %711 = vector.multi_reduction <add>, %710, %cst_227 [1] : vector<8x8xf32> to vector<8xf32>
    %712 = vector.shape_cast %711 : vector<8xf32> to vector<8x1xf32>
    %713 = tpu.reciprocal %712 {approx = true} : vector<8x1xf32> -> vector<8x1xf32>
    %714 = vector.broadcast %713 : vector<8x1xf32> to vector<8x8xf32>
    %715 = arith.mulf %710, %714 : vector<8x8xf32>
    %cst_228 = arith.constant dense<0.000000e+00> : vector<8x8xf32>
    %716 = tpu.matmul %715, %700, %cst_228 {dimension_numbers = #tpu.dot_dimension_numbers<[1], [0], [0], [1], [0, 0, 1, 1], [], []>} : vector<8x8xf32>, vector<8x8xf32>, vector<8x8xf32> -> vector<8x8xf32>
    %717 = vector.extract_strided_slice %695 {offsets = [0, 8], sizes = [8, 8], strides = [1, 1]} : vector<8x32xf32> to vector<8x8xf32>
    %718 = vector.extract_strided_slice %696 {offsets = [0, 8], sizes = [8, 8], strides = [1, 1]} : vector<8x32xf32> to vector<8x8xf32>
    %719 = vector.extract_strided_slice %697 {offsets = [0, 8], sizes = [8, 8], strides = [1, 1]} : vector<8x32xf32> to vector<8x8xf32>
    "tpu.trace_start"() <{level = 10 : i32, message = "td,sd->ts"}> : () -> ()
    %cst_229 = arith.constant dense<0.000000e+00> : vector<8x8xf32>
    %720 = tpu.matmul %717, %718, %cst_229 {dimension_numbers = #tpu.dot_dimension_numbers<[1], [1], [0], [0], [0, 0, 1, 0], [], []>} : vector<8x8xf32>, vector<8x8xf32>, vector<8x8xf32> -> vector<8x8xf32>
    "tpu.trace_stop"() : () -> ()
    %cst_230 = arith.constant 0.353553385 : f32
    %721 = vector.broadcast %cst_230 : f32 to vector<8x8xf32>
    %722 = arith.mulf %720, %721 : vector<8x8xf32>
    %cst_231 = arith.constant -1.000000e+30 : f32
    %723 = vector.broadcast %cst_231 : f32 to vector<8x8xf32>
    %724 = arith.select %6, %722, %723 : vector<8x8xi1>, vector<8x8xf32>
    %cst_232 = arith.constant dense<0xFF800000> : vector<8xf32>
    %725 = vector.multi_reduction <maximumf>, %724, %cst_232 [1] : vector<8x8xf32> to vector<8xf32>
    %726 = vector.shape_cast %725 : vector<8xf32> to vector<8x1xf32>
    %727 = vector.broadcast %726 : vector<8x1xf32> to vector<8x8xf32>
    %728 = arith.subf %724, %727 : vector<8x8xf32>
    %729 = math.exp %728 : vector<8x8xf32>
    %cst_233 = arith.constant dense<0.000000e+00> : vector<8xf32>
    %730 = vector.multi_reduction <add>, %729, %cst_233 [1] : vector<8x8xf32> to vector<8xf32>
    %731 = vector.shape_cast %730 : vector<8xf32> to vector<8x1xf32>
    %732 = tpu.reciprocal %731 {approx = true} : vector<8x1xf32> -> vector<8x1xf32>
    %733 = vector.broadcast %732 : vector<8x1xf32> to vector<8x8xf32>
    %734 = arith.mulf %729, %733 : vector<8x8xf32>
    %cst_234 = arith.constant dense<0.000000e+00> : vector<8x8xf32>
    %735 = tpu.matmul %734, %719, %cst_234 {dimension_numbers = #tpu.dot_dimension_numbers<[1], [0], [0], [1], [0, 0, 1, 1], [], []>} : vector<8x8xf32>, vector<8x8xf32>, vector<8x8xf32> -> vector<8x8xf32>
    %736 = vector.extract_strided_slice %695 {offsets = [0, 16], sizes = [8, 8], strides = [1, 1]} : vector<8x32xf32> to vector<8x8xf32>
    %737 = vector.extract_strided_slice %696 {offsets = [0, 16], sizes = [8, 8], strides = [1, 1]} : vector<8x32xf32> to vector<8x8xf32>
    %738 = vector.extract_strided_slice %697 {offsets = [0, 16], sizes = [8, 8], strides = [1, 1]} : vector<8x32xf32> to vector<8x8xf32>
    "tpu.trace_start"() <{level = 10 : i32, message = "td,sd->ts"}> : () -> ()
    %cst_235 = arith.constant dense<0.000000e+00> : vector<8x8xf32>
    %739 = tpu.matmul %736, %737, %cst_235 {dimension_numbers = #tpu.dot_dimension_numbers<[1], [1], [0], [0], [0, 0, 1, 0], [], []>} : vector<8x8xf32>, vector<8x8xf32>, vector<8x8xf32> -> vector<8x8xf32>
    "tpu.trace_stop"() : () -> ()
    %cst_236 = arith.constant 0.353553385 : f32
    %740 = vector.broadcast %cst_236 : f32 to vector<8x8xf32>
    %741 = arith.mulf %739, %740 : vector<8x8xf32>
    %cst_237 = arith.constant -1.000000e+30 : f32
    %742 = vector.broadcast %cst_237 : f32 to vector<8x8xf32>
    %743 = arith.select %6, %741, %742 : vector<8x8xi1>, vector<8x8xf32>
    %cst_238 = arith.constant dense<0xFF800000> : vector<8xf32>
    %744 = vector.multi_reduction <maximumf>, %743, %cst_238 [1] : vector<8x8xf32> to vector<8xf32>
    %745 = vector.shape_cast %744 : vector<8xf32> to vector<8x1xf32>
    %746 = vector.broadcast %745 : vector<8x1xf32> to vector<8x8xf32>
    %747 = arith.subf %743, %746 : vector<8x8xf32>
    %748 = math.exp %747 : vector<8x8xf32>
    %cst_239 = arith.constant dense<0.000000e+00> : vector<8xf32>
    %749 = vector.multi_reduction <add>, %748, %cst_239 [1] : vector<8x8xf32> to vector<8xf32>
    %750 = vector.shape_cast %749 : vector<8xf32> to vector<8x1xf32>
    %751 = tpu.reciprocal %750 {approx = true} : vector<8x1xf32> -> vector<8x1xf32>
    %752 = vector.broadcast %751 : vector<8x1xf32> to vector<8x8xf32>
    %753 = arith.mulf %748, %752 : vector<8x8xf32>
    %cst_240 = arith.constant dense<0.000000e+00> : vector<8x8xf32>
    %754 = tpu.matmul %753, %738, %cst_240 {dimension_numbers = #tpu.dot_dimension_numbers<[1], [0], [0], [1], [0, 0, 1, 1], [], []>} : vector<8x8xf32>, vector<8x8xf32>, vector<8x8xf32> -> vector<8x8xf32>
    %755 = vector.extract_strided_slice %695 {offsets = [0, 24], sizes = [8, 8], strides = [1, 1]} : vector<8x32xf32> to vector<8x8xf32>
    %756 = vector.extract_strided_slice %696 {offsets = [0, 24], sizes = [8, 8], strides = [1, 1]} : vector<8x32xf32> to vector<8x8xf32>
    %757 = vector.extract_strided_slice %697 {offsets = [0, 24], sizes = [8, 8], strides = [1, 1]} : vector<8x32xf32> to vector<8x8xf32>
    "tpu.trace_start"() <{level = 10 : i32, message = "td,sd->ts"}> : () -> ()
    %cst_241 = arith.constant dense<0.000000e+00> : vector<8x8xf32>
    %758 = tpu.matmul %755, %756, %cst_241 {dimension_numbers = #tpu.dot_dimension_numbers<[1], [1], [0], [0], [0, 0, 1, 0], [], []>} : vector<8x8xf32>, vector<8x8xf32>, vector<8x8xf32> -> vector<8x8xf32>
    "tpu.trace_stop"() : () -> ()
    %cst_242 = arith.constant 0.353553385 : f32
    %759 = vector.broadcast %cst_242 : f32 to vector<8x8xf32>
    %760 = arith.mulf %758, %759 : vector<8x8xf32>
    %cst_243 = arith.constant -1.000000e+30 : f32
    %761 = vector.broadcast %cst_243 : f32 to vector<8x8xf32>
    %762 = arith.select %6, %760, %761 : vector<8x8xi1>, vector<8x8xf32>
    %cst_244 = arith.constant dense<0xFF800000> : vector<8xf32>
    %763 = vector.multi_reduction <maximumf>, %762, %cst_244 [1] : vector<8x8xf32> to vector<8xf32>
    %764 = vector.shape_cast %763 : vector<8xf32> to vector<8x1xf32>
    %765 = vector.broadcast %764 : vector<8x1xf32> to vector<8x8xf32>
    %766 = arith.subf %762, %765 : vector<8x8xf32>
    %767 = math.exp %766 : vector<8x8xf32>
    %cst_245 = arith.constant dense<0.000000e+00> : vector<8xf32>
    %768 = vector.multi_reduction <add>, %767, %cst_245 [1] : vector<8x8xf32> to vector<8xf32>
    %769 = vector.shape_cast %768 : vector<8xf32> to vector<8x1xf32>
    %770 = tpu.reciprocal %769 {approx = true} : vector<8x1xf32> -> vector<8x1xf32>
    %771 = vector.broadcast %770 : vector<8x1xf32> to vector<8x8xf32>
    %772 = arith.mulf %767, %771 : vector<8x8xf32>
    %cst_246 = arith.constant dense<0.000000e+00> : vector<8x8xf32>
    %773 = tpu.matmul %772, %757, %cst_246 {dimension_numbers = #tpu.dot_dimension_numbers<[1], [0], [0], [1], [0, 0, 1, 1], [], []>} : vector<8x8xf32>, vector<8x8xf32>, vector<8x8xf32> -> vector<8x8xf32>
    %774 = tpu.concatenate %716, %735, %754, %773 in 1 : vector<8x8xf32>, vector<8x8xf32>, vector<8x8xf32>, vector<8x8xf32> -> vector<8x32xf32>
    %775 = vector.extract_strided_slice %689 {offsets = [8, 0], sizes = [8, 32], strides = [1, 1]} : vector<16x32xf32> to vector<8x32xf32>
    %776 = vector.extract_strided_slice %694 {offsets = [8, 0], sizes = [8, 32], strides = [1, 1]} : vector<16x64xf32> to vector<8x32xf32>
    %777 = vector.extract_strided_slice %694 {offsets = [8, 32], sizes = [8, 32], strides = [1, 1]} : vector<16x64xf32> to vector<8x32xf32>
    %778 = vector.extract_strided_slice %775 {offsets = [0, 0], sizes = [8, 8], strides = [1, 1]} : vector<8x32xf32> to vector<8x8xf32>
    %779 = vector.extract_strided_slice %776 {offsets = [0, 0], sizes = [8, 8], strides = [1, 1]} : vector<8x32xf32> to vector<8x8xf32>
    %780 = vector.extract_strided_slice %777 {offsets = [0, 0], sizes = [8, 8], strides = [1, 1]} : vector<8x32xf32> to vector<8x8xf32>
    "tpu.trace_start"() <{level = 10 : i32, message = "td,sd->ts"}> : () -> ()
    %cst_247 = arith.constant dense<0.000000e+00> : vector<8x8xf32>
    %781 = tpu.matmul %778, %779, %cst_247 {dimension_numbers = #tpu.dot_dimension_numbers<[1], [1], [0], [0], [0, 0, 1, 0], [], []>} : vector<8x8xf32>, vector<8x8xf32>, vector<8x8xf32> -> vector<8x8xf32>
    "tpu.trace_stop"() : () -> ()
    %cst_248 = arith.constant 0.353553385 : f32
    %782 = vector.broadcast %cst_248 : f32 to vector<8x8xf32>
    %783 = arith.mulf %781, %782 : vector<8x8xf32>
    %cst_249 = arith.constant -1.000000e+30 : f32
    %784 = vector.broadcast %cst_249 : f32 to vector<8x8xf32>
    %785 = arith.select %6, %783, %784 : vector<8x8xi1>, vector<8x8xf32>
    %cst_250 = arith.constant dense<0xFF800000> : vector<8xf32>
    %786 = vector.multi_reduction <maximumf>, %785, %cst_250 [1] : vector<8x8xf32> to vector<8xf32>
    %787 = vector.shape_cast %786 : vector<8xf32> to vector<8x1xf32>
    %788 = vector.broadcast %787 : vector<8x1xf32> to vector<8x8xf32>
    %789 = arith.subf %785, %788 : vector<8x8xf32>
    %790 = math.exp %789 : vector<8x8xf32>
    %cst_251 = arith.constant dense<0.000000e+00> : vector<8xf32>
    %791 = vector.multi_reduction <add>, %790, %cst_251 [1] : vector<8x8xf32> to vector<8xf32>
    %792 = vector.shape_cast %791 : vector<8xf32> to vector<8x1xf32>
    %793 = tpu.reciprocal %792 {approx = true} : vector<8x1xf32> -> vector<8x1xf32>
    %794 = vector.broadcast %793 : vector<8x1xf32> to vector<8x8xf32>
    %795 = arith.mulf %790, %794 : vector<8x8xf32>
    %cst_252 = arith.constant dense<0.000000e+00> : vector<8x8xf32>
    %796 = tpu.matmul %795, %780, %cst_252 {dimension_numbers = #tpu.dot_dimension_numbers<[1], [0], [0], [1], [0, 0, 1, 1], [], []>} : vector<8x8xf32>, vector<8x8xf32>, vector<8x8xf32> -> vector<8x8xf32>
    %797 = vector.extract_strided_slice %775 {offsets = [0, 8], sizes = [8, 8], strides = [1, 1]} : vector<8x32xf32> to vector<8x8xf32>
    %798 = vector.extract_strided_slice %776 {offsets = [0, 8], sizes = [8, 8], strides = [1, 1]} : vector<8x32xf32> to vector<8x8xf32>
    %799 = vector.extract_strided_slice %777 {offsets = [0, 8], sizes = [8, 8], strides = [1, 1]} : vector<8x32xf32> to vector<8x8xf32>
    "tpu.trace_start"() <{level = 10 : i32, message = "td,sd->ts"}> : () -> ()
    %cst_253 = arith.constant dense<0.000000e+00> : vector<8x8xf32>
    %800 = tpu.matmul %797, %798, %cst_253 {dimension_numbers = #tpu.dot_dimension_numbers<[1], [1], [0], [0], [0, 0, 1, 0], [], []>} : vector<8x8xf32>, vector<8x8xf32>, vector<8x8xf32> -> vector<8x8xf32>
    "tpu.trace_stop"() : () -> ()
    %cst_254 = arith.constant 0.353553385 : f32
    %801 = vector.broadcast %cst_254 : f32 to vector<8x8xf32>
    %802 = arith.mulf %800, %801 : vector<8x8xf32>
    %cst_255 = arith.constant -1.000000e+30 : f32
    %803 = vector.broadcast %cst_255 : f32 to vector<8x8xf32>
    %804 = arith.select %6, %802, %803 : vector<8x8xi1>, vector<8x8xf32>
    %cst_256 = arith.constant dense<0xFF800000> : vector<8xf32>
    %805 = vector.multi_reduction <maximumf>, %804, %cst_256 [1] : vector<8x8xf32> to vector<8xf32>
    %806 = vector.shape_cast %805 : vector<8xf32> to vector<8x1xf32>
    %807 = vector.broadcast %806 : vector<8x1xf32> to vector<8x8xf32>
    %808 = arith.subf %804, %807 : vector<8x8xf32>
    %809 = math.exp %808 : vector<8x8xf32>
    %cst_257 = arith.constant dense<0.000000e+00> : vector<8xf32>
    %810 = vector.multi_reduction <add>, %809, %cst_257 [1] : vector<8x8xf32> to vector<8xf32>
    %811 = vector.shape_cast %810 : vector<8xf32> to vector<8x1xf32>
    %812 = tpu.reciprocal %811 {approx = true} : vector<8x1xf32> -> vector<8x1xf32>
    %813 = vector.broadcast %812 : vector<8x1xf32> to vector<8x8xf32>
    %814 = arith.mulf %809, %813 : vector<8x8xf32>
    %cst_258 = arith.constant dense<0.000000e+00> : vector<8x8xf32>
    %815 = tpu.matmul %814, %799, %cst_258 {dimension_numbers = #tpu.dot_dimension_numbers<[1], [0], [0], [1], [0, 0, 1, 1], [], []>} : vector<8x8xf32>, vector<8x8xf32>, vector<8x8xf32> -> vector<8x8xf32>
    %816 = vector.extract_strided_slice %775 {offsets = [0, 16], sizes = [8, 8], strides = [1, 1]} : vector<8x32xf32> to vector<8x8xf32>
    %817 = vector.extract_strided_slice %776 {offsets = [0, 16], sizes = [8, 8], strides = [1, 1]} : vector<8x32xf32> to vector<8x8xf32>
    %818 = vector.extract_strided_slice %777 {offsets = [0, 16], sizes = [8, 8], strides = [1, 1]} : vector<8x32xf32> to vector<8x8xf32>
    "tpu.trace_start"() <{level = 10 : i32, message = "td,sd->ts"}> : () -> ()
    %cst_259 = arith.constant dense<0.000000e+00> : vector<8x8xf32>
    %819 = tpu.matmul %816, %817, %cst_259 {dimension_numbers = #tpu.dot_dimension_numbers<[1], [1], [0], [0], [0, 0, 1, 0], [], []>} : vector<8x8xf32>, vector<8x8xf32>, vector<8x8xf32> -> vector<8x8xf32>
    "tpu.trace_stop"() : () -> ()
    %cst_260 = arith.constant 0.353553385 : f32
    %820 = vector.broadcast %cst_260 : f32 to vector<8x8xf32>
    %821 = arith.mulf %819, %820 : vector<8x8xf32>
    %cst_261 = arith.constant -1.000000e+30 : f32
    %822 = vector.broadcast %cst_261 : f32 to vector<8x8xf32>
    %823 = arith.select %6, %821, %822 : vector<8x8xi1>, vector<8x8xf32>
    %cst_262 = arith.constant dense<0xFF800000> : vector<8xf32>
    %824 = vector.multi_reduction <maximumf>, %823, %cst_262 [1] : vector<8x8xf32> to vector<8xf32>
    %825 = vector.shape_cast %824 : vector<8xf32> to vector<8x1xf32>
    %826 = vector.broadcast %825 : vector<8x1xf32> to vector<8x8xf32>
    %827 = arith.subf %823, %826 : vector<8x8xf32>
    %828 = math.exp %827 : vector<8x8xf32>
    %cst_263 = arith.constant dense<0.000000e+00> : vector<8xf32>
    %829 = vector.multi_reduction <add>, %828, %cst_263 [1] : vector<8x8xf32> to vector<8xf32>
    %830 = vector.shape_cast %829 : vector<8xf32> to vector<8x1xf32>
    %831 = tpu.reciprocal %830 {approx = true} : vector<8x1xf32> -> vector<8x1xf32>
    %832 = vector.broadcast %831 : vector<8x1xf32> to vector<8x8xf32>
    %833 = arith.mulf %828, %832 : vector<8x8xf32>
    %cst_264 = arith.constant dense<0.000000e+00> : vector<8x8xf32>
    %834 = tpu.matmul %833, %818, %cst_264 {dimension_numbers = #tpu.dot_dimension_numbers<[1], [0], [0], [1], [0, 0, 1, 1], [], []>} : vector<8x8xf32>, vector<8x8xf32>, vector<8x8xf32> -> vector<8x8xf32>
    %835 = vector.extract_strided_slice %775 {offsets = [0, 24], sizes = [8, 8], strides = [1, 1]} : vector<8x32xf32> to vector<8x8xf32>
    %836 = vector.extract_strided_slice %776 {offsets = [0, 24], sizes = [8, 8], strides = [1, 1]} : vector<8x32xf32> to vector<8x8xf32>
    %837 = vector.extract_strided_slice %777 {offsets = [0, 24], sizes = [8, 8], strides = [1, 1]} : vector<8x32xf32> to vector<8x8xf32>
    "tpu.trace_start"() <{level = 10 : i32, message = "td,sd->ts"}> : () -> ()
    %cst_265 = arith.constant dense<0.000000e+00> : vector<8x8xf32>
    %838 = tpu.matmul %835, %836, %cst_265 {dimension_numbers = #tpu.dot_dimension_numbers<[1], [1], [0], [0], [0, 0, 1, 0], [], []>} : vector<8x8xf32>, vector<8x8xf32>, vector<8x8xf32> -> vector<8x8xf32>
    "tpu.trace_stop"() : () -> ()
    %cst_266 = arith.constant 0.353553385 : f32
    %839 = vector.broadcast %cst_266 : f32 to vector<8x8xf32>
    %840 = arith.mulf %838, %839 : vector<8x8xf32>
    %cst_267 = arith.constant -1.000000e+30 : f32
    %841 = vector.broadcast %cst_267 : f32 to vector<8x8xf32>
    %842 = arith.select %6, %840, %841 : vector<8x8xi1>, vector<8x8xf32>
    %cst_268 = arith.constant dense<0xFF800000> : vector<8xf32>
    %843 = vector.multi_reduction <maximumf>, %842, %cst_268 [1] : vector<8x8xf32> to vector<8xf32>
    %844 = vector.shape_cast %843 : vector<8xf32> to vector<8x1xf32>
    %845 = vector.broadcast %844 : vector<8x1xf32> to vector<8x8xf32>
    %846 = arith.subf %842, %845 : vector<8x8xf32>
    %847 = math.exp %846 : vector<8x8xf32>
    %cst_269 = arith.constant dense<0.000000e+00> : vector<8xf32>
    %848 = vector.multi_reduction <add>, %847, %cst_269 [1] : vector<8x8xf32> to vector<8xf32>
    %849 = vector.shape_cast %848 : vector<8xf32> to vector<8x1xf32>
    %850 = tpu.reciprocal %849 {approx = true} : vector<8x1xf32> -> vector<8x1xf32>
    %851 = vector.broadcast %850 : vector<8x1xf32> to vector<8x8xf32>
    %852 = arith.mulf %847, %851 : vector<8x8xf32>
    %cst_270 = arith.constant dense<0.000000e+00> : vector<8x8xf32>
    %853 = tpu.matmul %852, %837, %cst_270 {dimension_numbers = #tpu.dot_dimension_numbers<[1], [0], [0], [1], [0, 0, 1, 1], [], []>} : vector<8x8xf32>, vector<8x8xf32>, vector<8x8xf32> -> vector<8x8xf32>
    %854 = tpu.concatenate %796, %815, %834, %853 in 1 : vector<8x8xf32>, vector<8x8xf32>, vector<8x8xf32>, vector<8x8xf32> -> vector<8x32xf32>
    %855 = tpu.concatenate %774, %854 in 0 : vector<8x32xf32>, vector<8x32xf32> -> vector<16x32xf32>
    %cst_271 = arith.constant dense<0.000000e+00> : vector<16x32xf32>
    %856 = tpu.matmul %855, %684, %cst_271 {dimension_numbers = #tpu.dot_dimension_numbers<[1], [0], [0], [1], [0, 0, 1, 1], [], []>} : vector<16x32xf32>, vector<32x32xf32>, vector<16x32xf32> -> vector<16x32xf32>
    %857 = vector.extract_strided_slice %2 {offsets = [12, 0], sizes = [1, 32], strides = [1, 1]} : vector<16x32xf32> to vector<1x32xf32>
    %858 = vector.broadcast %857 : vector<1x32xf32> to vector<16x32xf32>
    %859 = arith.addf %856, %858 : vector<16x32xf32>
    %860 = arith.addf %655, %859 : vector<16x32xf32>
    %861 = vector.extract_strided_slice %2 {offsets = [9, 0], sizes = [1, 32], strides = [1, 1]} : vector<16x32xf32> to vector<1x32xf32>
    %862 = vector.extract_strided_slice %2 {offsets = [10, 0], sizes = [1, 32], strides = [1, 1]} : vector<16x32xf32> to vector<1x32xf32>
    %cst_272 = arith.constant dense<0.000000e+00> : vector<16xf32>
    %863 = vector.multi_reduction <add>, %860, %cst_272 [1] : vector<16x32xf32> to vector<16xf32>
    %864 = vector.shape_cast %863 : vector<16xf32> to vector<16x1xf32>
    %cst_273 = arith.constant 3.200000e+01 : f32
    %865 = vector.broadcast %cst_273 : f32 to vector<16x1xf32>
    %866 = arith.divf %864, %865 : vector<16x1xf32>
    %867 = vector.broadcast %866 : vector<16x1xf32> to vector<16x32xf32>
    %868 = arith.subf %860, %867 : vector<16x32xf32>
    %869 = arith.mulf %868, %868 : vector<16x32xf32>
    %cst_274 = arith.constant dense<0.000000e+00> : vector<16xf32>
    %870 = vector.multi_reduction <add>, %869, %cst_274 [1] : vector<16x32xf32> to vector<16xf32>
    %871 = vector.shape_cast %870 : vector<16xf32> to vector<16x1xf32>
    %cst_275 = arith.constant 3.200000e+01 : f32
    %872 = vector.broadcast %cst_275 : f32 to vector<16x1xf32>
    %873 = arith.divf %871, %872 : vector<16x1xf32>
    %874 = vector.broadcast %866 : vector<16x1xf32> to vector<16x32xf32>
    %875 = arith.subf %860, %874 : vector<16x32xf32>
    %cst_276 = arith.constant 9.99999974E-6 : f32
    %876 = vector.broadcast %cst_276 : f32 to vector<16x1xf32>
    %877 = arith.addf %873, %876 : vector<16x1xf32>
    %878 = math.rsqrt %877 : vector<16x1xf32>
    %879 = vector.broadcast %878 : vector<16x1xf32> to vector<16x32xf32>
    %880 = arith.mulf %875, %879 : vector<16x32xf32>
    %881 = vector.broadcast %861 : vector<1x32xf32> to vector<16x32xf32>
    %882 = arith.mulf %880, %881 : vector<16x32xf32>
    %883 = vector.broadcast %862 : vector<1x32xf32> to vector<16x32xf32>
    %884 = arith.addf %882, %883 : vector<16x32xf32>
    %c0_277 = arith.constant 0 : index
    %c128 = arith.constant 128 : index
    %885 = vector.load %arg6[%c0_277, %c128] : memref<32x256xf32, #tpu.memory_space<vmem>>, vector<32x128xf32>
    %c128_278 = arith.constant 128 : index
    %c0_279 = arith.constant 0 : index
    %886 = vector.load %arg7[%c128_278, %c0_279] : memref<256x32xf32, #tpu.memory_space<vmem>>, vector<128x32xf32>
    %cst_280 = arith.constant dense<0.000000e+00> : vector<16x128xf32>
    %887 = tpu.matmul %884, %885, %cst_280 {dimension_numbers = #tpu.dot_dimension_numbers<[1], [0], [0], [1], [0, 0, 1, 1], [], []>} : vector<16x32xf32>, vector<32x128xf32>, vector<16x128xf32> -> vector<16x128xf32>
    %888 = vector.extract_strided_slice %3 {offsets = [1, 0], sizes = [1, 128], strides = [1, 1]} : vector<2x128xf32> to vector<1x128xf32>
    %889 = vector.broadcast %888 : vector<1x128xf32> to vector<16x128xf32>
    %890 = arith.addf %887, %889 : vector<16x128xf32>
    %cst_281 = arith.constant 5.000000e-01 : f32
    %891 = vector.broadcast %cst_281 : f32 to vector<16x128xf32>
    %892 = arith.mulf %891, %890 : vector<16x128xf32>
    %cst_282 = arith.constant 4.471500e-02 : f32
    %893 = vector.broadcast %cst_282 : f32 to vector<16x128xf32>
    %894 = arith.mulf %893, %890 : vector<16x128xf32>
    %895 = arith.mulf %894, %890 : vector<16x128xf32>
    %896 = arith.mulf %895, %890 : vector<16x128xf32>
    %897 = arith.addf %890, %896 : vector<16x128xf32>
    %cst_283 = arith.constant 0.797884583 : f32
    %898 = vector.broadcast %cst_283 : f32 to vector<16x128xf32>
    %899 = arith.mulf %898, %897 : vector<16x128xf32>
    %900 = math.tanh %899 : vector<16x128xf32>
    %cst_284 = arith.constant 1.000000e+00 : f32
    %901 = vector.broadcast %cst_284 : f32 to vector<16x128xf32>
    %902 = arith.addf %901, %900 : vector<16x128xf32>
    %903 = arith.mulf %892, %902 : vector<16x128xf32>
    %cst_285 = arith.constant dense<0.000000e+00> : vector<16x32xf32>
    %904 = tpu.matmul %903, %886, %cst_285 {dimension_numbers = #tpu.dot_dimension_numbers<[1], [0], [0], [1], [0, 0, 1, 1], [], []>} : vector<16x128xf32>, vector<128x32xf32>, vector<16x32xf32> -> vector<16x32xf32>
    %905 = vector.extract_strided_slice %2 {offsets = [13, 0], sizes = [1, 32], strides = [1, 1]} : vector<16x32xf32> to vector<1x32xf32>
    %906 = vector.broadcast %905 : vector<1x32xf32> to vector<16x32xf32>
    %907 = arith.addf %904, %906 : vector<16x32xf32>
    %908 = arith.addf %860, %907 : vector<16x32xf32>
    %909 = vector.extract_strided_slice %2 {offsets = [14, 0], sizes = [1, 32], strides = [1, 1]} : vector<16x32xf32> to vector<1x32xf32>
    %910 = vector.extract_strided_slice %2 {offsets = [15, 0], sizes = [1, 32], strides = [1, 1]} : vector<16x32xf32> to vector<1x32xf32>
    %cst_286 = arith.constant dense<0.000000e+00> : vector<16xf32>
    %911 = vector.multi_reduction <add>, %908, %cst_286 [1] : vector<16x32xf32> to vector<16xf32>
    %912 = vector.shape_cast %911 : vector<16xf32> to vector<16x1xf32>
    %cst_287 = arith.constant 3.200000e+01 : f32
    %913 = vector.broadcast %cst_287 : f32 to vector<16x1xf32>
    %914 = arith.divf %912, %913 : vector<16x1xf32>
    %915 = vector.broadcast %914 : vector<16x1xf32> to vector<16x32xf32>
    %916 = arith.subf %908, %915 : vector<16x32xf32>
    %917 = arith.mulf %916, %916 : vector<16x32xf32>
    %cst_288 = arith.constant dense<0.000000e+00> : vector<16xf32>
    %918 = vector.multi_reduction <add>, %917, %cst_288 [1] : vector<16x32xf32> to vector<16xf32>
    %919 = vector.shape_cast %918 : vector<16xf32> to vector<16x1xf32>
    %cst_289 = arith.constant 3.200000e+01 : f32
    %920 = vector.broadcast %cst_289 : f32 to vector<16x1xf32>
    %921 = arith.divf %919, %920 : vector<16x1xf32>
    %922 = vector.broadcast %914 : vector<16x1xf32> to vector<16x32xf32>
    %923 = arith.subf %908, %922 : vector<16x32xf32>
    %cst_290 = arith.constant 9.99999974E-6 : f32
    %924 = vector.broadcast %cst_290 : f32 to vector<16x1xf32>
    %925 = arith.addf %921, %924 : vector<16x1xf32>
    %926 = math.rsqrt %925 : vector<16x1xf32>
    %927 = vector.broadcast %926 : vector<16x1xf32> to vector<16x32xf32>
    %928 = arith.mulf %923, %927 : vector<16x32xf32>
    %929 = vector.broadcast %909 : vector<1x32xf32> to vector<16x32xf32>
    %930 = arith.mulf %928, %929 : vector<16x32xf32>
    %931 = vector.broadcast %910 : vector<1x32xf32> to vector<16x32xf32>
    %932 = arith.addf %930, %931 : vector<16x32xf32>
    %c0_291 = arith.constant 0 : index
    %c0_292 = arith.constant 0 : index
    %933 = vector.load %arg10[%c0_291, %c0_292] : memref<32x128xf32, #tpu.memory_space<vmem>>, vector<32x128xf32>
    %cst_293 = arith.constant dense<0.000000e+00> : vector<16x128xf32>
    %934 = tpu.matmul %932, %933, %cst_293 {dimension_numbers = #tpu.dot_dimension_numbers<[1], [0], [0], [1], [0, 0, 1, 1], [], []>} : vector<16x32xf32>, vector<32x128xf32>, vector<16x128xf32> -> vector<16x128xf32>
    %c0_294 = arith.constant 0 : index
    %c0_295 = arith.constant 0 : index
    %935 = vector.load %arg11[%c0_294, %c0_295] : memref<16x128xf32, #tpu.memory_space<vmem>>, vector<16x128xf32>
    tpu.vector_store %arg11[%c0_294, %c0_295], %934 {strides = array<i32>} : memref<16x128xf32, #tpu.memory_space<vmem>>, vector<16x128xf32>,
    return
  }
  func.func @transform_0(%arg0: i32) -> (i32, i32) {
    %c0_i32 = arith.constant 0 : i32
    %c0_i32_0 = arith.constant 0 : i32
    return %arg0, %c0_i32 : i32, i32
  }
  func.func @transform_1(%arg0: i32) -> (i32, i32) {
    %c0_i32 = arith.constant 0 : i32
    %c0_i32_0 = arith.constant 0 : i32
    return %arg0, %c0_i32 : i32, i32
  }
  func.func @transform_2(%arg0: i32) -> (i32, i32, i32) {
    %c0_i32 = arith.constant 0 : i32
    %c0_i32_0 = arith.constant 0 : i32
    %c0_i32_1 = arith.constant 0 : i32
    %c0_i32_2 = arith.constant 0 : i32
    return %c0_i32, %c0_i32_0, %c0_i32_1 : i32, i32, i32
  }
  func.func @transform_3(%arg0: i32) -> (i32, i32) {
    %c0_i32 = arith.constant 0 : i32
    %c0_i32_0 = arith.constant 0 : i32
    %c0_i32_1 = arith.constant 0 : i32
    return %c0_i32, %c0_i32_0 : i32, i32
  }
  func.func @transform_4(%arg0: i32) -> (i32, i32, i32) {
    %c0_i32 = arith.constant 0 : i32
    %c0_i32_0 = arith.constant 0 : i32
    %c0_i32_1 = arith.constant 0 : i32
    %c0_i32_2 = arith.constant 0 : i32
    return %c0_i32, %c0_i32_0, %c0_i32_1 : i32, i32, i32
  }
  func.func @transform_5(%arg0: i32) -> (i32, i32) {
    %c0_i32 = arith.constant 0 : i32
    %c0_i32_0 = arith.constant 0 : i32
    %c0_i32_1 = arith.constant 0 : i32
    return %c0_i32, %c0_i32_0 : i32, i32
  }
  func.func @transform_6(%arg0: i32) -> (i32, i32) {
    %c0_i32 = arith.constant 0 : i32
    %c0_i32_0 = arith.constant 0 : i32
    %c0_i32_1 = arith.constant 0 : i32
    return %c0_i32, %c0_i32_0 : i32, i32
  }
  func.func @transform_7(%arg0: i32) -> (i32, i32) {
    %c0_i32 = arith.constant 0 : i32
    %c0_i32_0 = arith.constant 0 : i32
    %c0_i32_1 = arith.constant 0 : i32
    return %c0_i32, %c0_i32_0 : i32, i32
  }
  func.func @transform_8(%arg0: i32) -> (i32, i32) {
    %c0_i32 = arith.constant 0 : i32
    %c0_i32_0 = arith.constant 0 : i32
    %c0_i32_1 = arith.constant 0 : i32
    return %c0_i32, %c0_i32_0 : i32, i32
  }
  func.func @transform_9(%arg0: i32) -> (i32, i32) {
    %c0_i32 = arith.constant 0 : i32
    %c0_i32_0 = arith.constant 0 : i32
    %c0_i32_1 = arith.constant 0 : i32
    return %c0_i32, %c0_i32_0 : i32, i32
  }
  func.func @transform_10(%arg0: i32) -> (i32, i32) {
    %c0_i32 = arith.constant 0 : i32
    %c0_i32_0 = arith.constant 0 : i32
    return %arg0, %c0_i32 : i32, i32
  }
}

</mosaic_0001>

<bundles_post_ra>
// kernel: _decoder_forward_impl.1
= control target key start
LH: loop header
LB: loop body
LE: loop exit
PB: predicated region body
PF: predicated region fallthrough
CT: control target
= control target key end

     0   :  { %vm47_vm0 = vcmask 261120   ;;  %v42_v23 = vlaneseq  ;;  %v8289_v39 = vmov 0.0   ;;  %vm8290_vm1 = vmmov 0   ;;  %s8291_s28 = smov 96   ;;  %s8292_s29 = smov 88   ;;  %s9580_s0 = inlined_call_operand.vmem [shape: f32[16,32], index: 0, kind: input, shape index: {}]   ;;  %s9581_s2 = inlined_call_operand.vmem [shape: f32[4,32,96], index: 2, kind: input, shape index: {}]   ;;  %s9582_s8 = inlined_call_operand.vmem [shape: f32[16,32], index: 8, kind: input, shape index: {}]   ;;  %s9583_s3 = inlined_call_operand.vmem [shape: f32[4,96], index: 3, kind: input, shape index: {}]   ;;  %s9584_s4 = inlined_call_operand.vmem [shape: f32[4,32,32], index: 4, kind: input, shape index: {}]   ;;  %s9585_s1 = inlined_call_operand.vmem [shape: f32[16,32], index: 1, kind: input, shape index: {}]   ;;  %s9586_s5 = inlined_call_operand.vmem [shape: f32[32,256], index: 5, kind: input, shape index: {}]   ;;  %s9587_s6 = inlined_call_operand.vmem [shape: f32[256,32], index: 6, kind: input, shape index: {}]   ;;  %s9588_s7 = inlined_call_operand.vmem [shape: f32[2,128], index: 7, kind: input, shape index: {}]   ;;  %s9589_s9 = inlined_call_operand.vmem [shape: f32[32,128], index: 9, kind: input, shape index: {}]   ;;  %s9590_s10 = inlined_call_operand.vmem [shape: f32[16,128], index: 10, kind: output, shape index: {}]  }
   0x1   :  { %v8363_v0 = vld [vmem:[%s9580_s0] sm:$0xff]  ;;  %v8368_v1 = vld [vmem:[%s9580_s0 + $0x8] sm:$0xff]  ;;  %v90_v14 = vld [vmem:[%s9581_s2 + $0x18] sm:$0xff]  ;;  %7602 = vmatprep.subr.mxu0 %v8289_v39  ;;  %7604 = vmatprep.mubr.msk.f32.mxu0 %vm8290_vm1, %v8289_v39  ;;  %s8293_s30 = smov 80   ;;  %s8294_s11 = smov 72   ;;  %vm184_vm2 = vcmask 64512  }
   0x2   :  { %v48_v2 = vsel %vm47_vm0, %v8363_v0, 0.0  ;;  %v51_v3 = vsel %vm47_vm0, %v8368_v1, 0.0  ;;  %v89_v15 = vld [vmem:[%s9581_s2 + $0x10] sm:$0xff]  ;;  %7571 = vmatprep.subr.mxu1 %v90_v14  ;;  %v88_v16 = vld [vmem:[%s9581_s2 + $0x8] sm:$0xff]  ;;  %v87_v17 = vld [vmem:[%s9581_s2] sm:$0xff]  ;;  %v8390_v25 = vshrl.u32 %v42_v23, 7 }
   0x3   :  { %49 = vadd.xlane.f32.xlu0 %v48_v2  ;;  %7572 = vmatpush3.msra.mxu1 %v90_v14  ;;  %v8398_v27 = vld [vmem:[%s9582_s8] sm:$0xff]  ;;  %s8295_s12 = smov 120   ;;  %s8296_s13 = smov 112   ;;  %v45_v48 = vand.u32 127, %v42_v23  ;;  %vm862_vm4 = vcmask 130048   ;;  %vm864_vm5 = vcmask 195584  }
   0x4   :  { %7573 = vmatprep.subr.mxu1 %v89_v15  ;;  %v8393_v26 = vsub.s32 0, %v8390_v25  ;;  %v8401_v28 = vsub.s32 1, %v8390_v25  ;;  %v7179_v41 = vld [vmem:[%s9583_s3] ss:$0 sm:$0xff]  ;;  %s8297_s14 = smov 104   ;;  %s8298_s15 = smov 64  }
   0x5   :  { %7574 = vmatpush3.msra.mxu1 %v89_v15  ;;  %vm8455_vm3 = vcmp.ge.s32.totalorder %v8390_v25, %v45_v48  ;;  %s8299_s16 = smov 56   ;;  %s9591_s0 = smov 40  }
   0x6   :  { %7575 = vmatprep.subr.mxu1 %v88_v16  ;;  %v8405_v29 = vrot.slane %v8398_v27, %v8393_v26  ;;  %v8409_v32 = vrot.slane %v8398_v27, %v8401_v28  ;;  %s8301_s17 = smov 48   ;;  %s8302_s18 = smov 8  }
   0x7   :  { %52 = vadd.xlane.f32.xlu0 %v51_v3  ;;  %7576 = vmatpush3.msra.mxu1 %v88_v16  ;;  %s8303_s19 = smov 16   ;;  %s8304_s26 = smov 24  }
   0x8   :  { %7577 = vmatprep.subr.mxu1 %v87_v17 }
   0x9   :  { %7578 = vmatpush3.msra.mxu1 %v87_v17 }
   0xa   :  { %7582 = vmatprep.subr.mxu1 %v8289_v39 }
  0x8c   :  { %v50_v4 = vpop.xlane.xlu0 %49 }
  0x8d   :  { %v55_v5 = vmul.f32 0.03125, %v50_v4 }
  0x8f   :  { %v57_v6 = vsub.f32 %v8363_v0, %v55_v5 }
  0x90   :  { %v53_v7 = vpop.xlane.xlu0 %52 }
  0x91   :  { %v56_v8 = vmul.f32 0.03125, %v53_v7  ;;  %v59_v9 = vmul.f32 %v57_v6, %v57_v6 }
  0x93   :  { %v58_v10 = vsub.f32 %v8368_v1, %v56_v8  ;;  %v61_v11 = vsel %vm47_vm0, %v59_v9, 0.0 }
  0x94   :  { %62 = vadd.xlane.f32.xlu1 %v61_v11 }
  0x95   :  { %v60_v12 = vmul.f32 %v58_v10, %v58_v10 }
  0x97   :  { %v64_v13 = vsel %vm47_vm0, %v60_v12, 0.0 }
  0x98   :  { %65 = vadd.xlane.f32.xlu1 %v64_v13 }
 0x11d   :  { %v63_v18 = vpop.xlane.xlu1 %62 }
 0x11e   :  { %v67_v19 = vmul.f32 0.03125, %v63_v18 }
 0x120   :  { %v69_v20 = vadd.f32 1e-05, %v67_v19 }
 0x121   :  { %v66_v21 = vpop.xlane.xlu1 %65 }
 0x122   :  { %8120 = vrsqrt.f32 %v69_v20  ;;  %v68_v22 = vmul.f32 0.03125, %v66_v21 }
 0x124   :  { %v70_v24 = vadd.f32 1e-05, %v68_v22 }
 0x126   :  { %8122 = vrsqrt.f32 %v70_v24 }
 0x12f   :  { %v8121_v30 = vpop.eup %8120 }
 0x130   :  { %v73_v31 = vmul.f32 %v8121_v30, %v57_v6 }
 0x132   :  { %v79_v33 = vmul.f32 %v8405_v29, %v73_v31 }
 0x133   :  { %v8123_v34 = vpop.eup %8122 }
 0x134   :  { %v85_v35 = vadd.f32 %v8409_v32, %v79_v33  ;;  %v74_v36 = vmul.f32 %v8123_v34, %v58_v10 }
 0x136   :  { %7579 = vmatprep.mubr.msk.f32.mxu1 %vm47_vm0, %v85_v35  ;;  %v80_v37 = vmul.f32 %v8405_v29, %v74_v36 }
 0x138   :  { %v86_v38 = vadd.f32 %v8409_v32, %v80_v37 }
 0x13a   :  { %7580 = vmatmul.mubr.msk.f32.vlgmr.msra.gmra.mxu1 %vm47_vm0, %v86_v38 }
 0x13b   :  { %7584 = vmatprep.mubr.msk.f32.mxu1 %vm8290_vm1, %v8289_v39 }
 0x1fa   :  { %v7581_v40 = vpop.f32.mrf.mxu1 }
 0x1fb   :  { %v8436_v44 = vadd.f32 %v7581_v40, %v7179_v41 }
 0x1fc   :  { %v172_v42 = vpop.f32.mrf.mxu1 }
 0x1fd   :  { %v8426_v43 = vadd.f32 %v7179_v41, %v172_v42 }
 0x1ff   :  { %182 = vrot.lane.b32.xlu0 %v8426_v43, %s8291_s28 }
 0x203   :  { %350 = vrot.lane.b32.xlu0 %v8426_v43, %s8292_s29 }
 0x207   :  { %517 = vrot.lane.b32.xlu0 %v8426_v43, %s8293_s30 }
 0x20b   :  { %684 = vrot.lane.b32.xlu0 %v8426_v43, %s8294_s11 }
 0x20f   :  { %867 = vrot.lane.b32.xlu0 %v8436_v44, %s8291_s28 }
 0x213   :  { %1032 = vrot.lane.b32.xlu0 %v8436_v44, %s8295_s12 }
 0x217   :  { %1199 = vrot.lane.b32.xlu0 %v8436_v44, %s8296_s13 }
 0x21b   :  { %1366 = vrot.lane.b32.xlu0 %v8436_v44, %s8297_s14 }
 0x271   :  { %v183_v45 = vpop.permute.xlu0 %182 }
 0x272   :  { %7583 = vmatpush3.xpose.msk.msra.mxu1 %vm184_vm2, %v183_v45 }
 0x273   :  { %7587 = vmatprep.subr.mxu1 %v8289_v39 }
 0x275   :  { %7585 = vmatmul.mubr.msk.f32.vlgmr.msra.gmra.mxu1 %vm184_vm2, %v8426_v43  ;;  %v351_v46 = vpop.permute.xlu0 %350 }
 0x276   :  { %7589 = vmatprep.mubr.msk.f32.mxu1 %vm8290_vm1, %v8289_v39 }
 0x279   :  { %v518_v47 = vpop.permute.xlu0 %517 }
 0x27a   :  { %7603 = vmatpush3.xpose.msk.msra.mxu0 %vm184_vm2, %v518_v47 }
 0x27b   :  { %7612 = vmatprep.subr.mxu0 %v8289_v39 }
 0x27d   :  { %v685_v62 = vpop.permute.xlu0 %684 }
 0x281   :  { %v868_v3 = vpop.permute.xlu0 %867 }
 0x285   :  { %v1033_v5 = vpop.permute.xlu0 %1032 }
 0x289   :  { %v1200_v10 = vpop.permute.xlu0 %1199 }
 0x28d   :  { %v1367_v12 = vpop.permute.xlu0 %1366 }
 0x335   :  { %v255_v50 = vpop.f32.mrf.mxu1 }
 0x336   :  { %v259_v51 = vmul.f32 0.35355338, %v255_v50 }
 0x337   :  { %v7586_v52 = vpop.f32.mrf.mxu1 }
 0x338   :  { %v260_v53 = vsel %vm8455_vm3, %v259_v51, -1e+30 }
 0x339   :  { %v261_v54 = vsel %vm184_vm2, %v260_v53, -inf }
 0x33a   :  { %262 = vmax.xlane.f32.xlu1 %v261_v54 }
 0x34b   :  { %272 = vrot.lane.b32.xlu1 %v8426_v43, %s8298_s15 }
 0x34f   :  { %348 = vrot.lane.b32.xlu1 %v8426_v43, %s8295_s12 }
 0x3c3   :  { %v263_v55 = vpop.xlane.xlu1 %262 }
 0x3c4   :  { %v264_v56 = vsub.f32 %v260_v53, %v263_v55 }
 0x3c6   :  { %v265_v57 = vmul.f32 1.442695, %v264_v56 }
 0x3c7   :  { %v273_v58 = vpop.permute.xlu1 %272 }
 0x3c8   :  { %8124 = vpow2.f32 %v265_v57  ;;  %7588 = vmatpush3.msra.mxu1 %v273_v58 }
 0x3c9   :  { %7592 = vmatprep.subr.mxu1 %v8289_v39 }
 0x3cb   :  { %v349_v61 = vpop.permute.xlu1 %348 }
 0x3d5   :  { %v8125_v59 = vpop.eup %8124 }
 0x3d6   :  { %v267_v60 = vsel %vm184_vm2, %v8125_v59, 0.0 }
 0x3d7   :  { %268 = vadd.xlane.f32.xlu1 %v267_v60 }
 0x3e8   :  { %515 = vrot.lane.b32.xlu1 %v8426_v43, %s8296_s13 }
 0x3ec   :  { %682 = vrot.lane.b32.xlu1 %v8426_v43, %s8297_s14 }
 0x3f0   :  { %1034 = vrot.lane.b32.xlu1 %v8436_v44, %s8292_s29 }
 0x3f4   :  { %1201 = vrot.lane.b32.xlu1 %v8436_v44, %s8293_s30 }
 0x3f8   :  { %1368 = vrot.lane.b32.xlu1 %v8436_v44, %s8294_s11 }
 0x460   :  { %v269_v63 = vpop.xlane.xlu1 %268 }
 0x461   :  { %8126 = vrcp.f32 %v269_v63 }
 0x464   :  { %v516_v2 = vpop.permute.xlu1 %515 }
 0x465   :  { %7605 = vmatmul.mubr.msk.f32.vlgmr.msra.gmra.mxu0 %vm184_vm2, %v516_v2 }
 0x466   :  { %7613 = vmatpush3.xpose.msk.msra.mxu0 %vm184_vm2, %v685_v62  ;;  %7614 = vmatprep.mubr.msk.f32.mxu0 %vm8290_vm1, %v8289_v39 }
 0x467   :  { %7622 = vmatprep.subr.mxu0 %v8289_v39 }
 0x468   :  { %v683_v4 = vpop.permute.xlu1 %682 }
 0x469   :  { %7615 = vmatmul.mubr.msk.f32.vlgmr.msra.gmra.mxu0 %vm184_vm2, %v683_v4 }
 0x46a   :  { %7623 = vmatpush3.xpose.msk.msra.mxu0 %vm184_vm2, %v868_v3  ;;  %7624 = vmatprep.mubr.msk.f32.mxu0 %vm8290_vm1, %v8289_v39 }
 0x46b   :  { %7632 = vmatprep.subr.mxu0 %v8289_v39 }
 0x46c   :  { %v1035_v6 = vpop.permute.xlu1 %1034 }
 0x46d   :  { %7625 = vmatmul.mubr.msk.f32.vlgmr.msra.gmra.mxu0 %vm184_vm2, %v8436_v44 }
 0x46e   :  { %v8127_v7 = vpop.eup %8126  ;;  %7633 = vmatpush3.xpose.msk.msra.mxu0 %vm184_vm2, %v1035_v6  ;;  %7634 = vmatprep.mubr.msk.f32.mxu0 %vm8290_vm1, %v8289_v39 }
 0x46f   :  { %7642 = vmatprep.subr.mxu0 %v8289_v39  ;;  %v271_v8 = vmul.f32 %v8127_v7, %v8125_v59 }
 0x470   :  { %v1202_v9 = vpop.permute.xlu1 %1201 }
 0x471   :  { %7590 = vmatmul.mubr.msk.f32.vlgmr.msra.gmra.mxu1 %vm184_vm2, %v271_v8  ;;  %7635 = vmatmul.mubr.msk.f32.vlgmr.msra.gmra.mxu0 %vm184_vm2, %v1033_v5 }
 0x472   :  { %7593 = vmatpush3.xpose.msk.msra.mxu1 %vm184_vm2, %v351_v46  ;;  %7643 = vmatpush3.xpose.msk.msra.mxu0 %vm184_vm2, %v1202_v9 }
 0x473   :  { %7594 = vmatprep.mubr.msk.f32.mxu1 %vm8290_vm1, %v8289_v39  ;;  %7644 = vmatprep.mubr.msk.f32.mxu0 %vm8290_vm1, %v8289_v39 }
 0x474   :  { %v1369_v11 = vpop.permute.xlu1 %1368  ;;  %7652 = vmatprep.subr.mxu0 %v8289_v39  ;;  %7597 = vmatprep.subr.mxu1 %v8289_v39 }
 0x475   :  { %7595 = vmatmul.mubr.msk.f32.vlgmr.msra.gmra.mxu1 %vm184_vm2, %v349_v61  ;;  %7645 = vmatmul.mubr.msk.f32.vlgmr.msra.gmra.mxu0 %vm184_vm2, %v1200_v10 }
 0x476   :  { %7653 = vmatpush3.xpose.msk.msra.mxu0 %vm184_vm2, %v1369_v11  ;;  %7654 = vmatprep.mubr.msk.f32.mxu0 %vm8290_vm1, %v8289_v39 }
 0x477   :  { %7599 = vmatprep.mubr.msk.f32.mxu1 %vm8290_vm1, %v8289_v39 }
 0x479   :  { %7655 = vmatmul.mubr.msk.f32.vlgmr.msra.gmra.mxu0 %vm184_vm2, %v1367_v12 }
 0x525   :  { %v589_v13 = vpop.f32.mrf.mxu0 }
 0x526   :  { %v593_v14 = vmul.f32 0.35355338, %v589_v13 }
 0x527   :  { %v7606_v15 = vpop.f32.mrf.mxu0 }
 0x528   :  { %v594_v16 = vsel %vm8455_vm3, %v593_v14, -1e+30 }
 0x529   :  { %v756_v17 = vpop.f32.mrf.mxu0  ;;  %v595_v18 = vsel %vm184_vm2, %v594_v16, -inf }
 0x52a   :  { %v760_v19 = vmul.f32 0.35355338, %v756_v17  ;;  %596 = vmax.xlane.f32.xlu0 %v595_v18 }
 0x52b   :  { %v7616_v20 = vpop.f32.mrf.mxu0 }
 0x52c   :  { %v761_v21 = vsel %vm8455_vm3, %v760_v19, -1e+30 }
 0x52d   :  { %v939_v22 = vpop.f32.mrf.mxu0  ;;  %v762_v23 = vsel %vm184_vm2, %v761_v21, -inf }
 0x52e   :  { %v943_v24 = vmul.f32 0.35355338, %v939_v22  ;;  %763 = vmax.xlane.f32.xlu0 %v762_v23 }
 0x52f   :  { %v7626_v30 = vpop.f32.mrf.mxu0 }
 0x530   :  { %v944_v31 = vsel %vm8455_vm3, %v943_v24, -1e+30 }
 0x531   :  { %v8520_v33 = vpop.f32.mrf.mxu1  ;;  %v1106_v34 = vpop.f32.mrf.mxu0  ;;  %v945_v35 = vsel %vm184_vm2, %v944_v31, -inf }
 0x532   :  { %946 = vmax.xlane.f32.xlu0 %v945_v35  ;;  %v1110_v41 = vmul.f32 0.35355338, %v1106_v34 }
 0x533   :  { %v7591_v36 = vpop.f32.mrf.mxu1  ;;  %v7636_v37 = vpop.f32.mrf.mxu0 }
 0x534   :  { %v1111_v55 = vsel %vm8455_vm3, %v1110_v41, -1e+30 }
 0x535   :  { %v422_v38 = vpop.f32.mrf.mxu1  ;;  %v1273_v40 = vpop.f32.mrf.mxu0  ;;  %v1112_v57 = vsel %vm184_vm2, %v1111_v55, -inf }
 0x536   :  { %v426_v42 = vmul.f32 0.35355338, %v422_v38  ;;  %v1277_v45 = vmul.f32 0.35355338, %v1273_v40 }
 0x537   :  { %v7596_v46 = vpop.f32.mrf.mxu1  ;;  %v7646_v47 = vpop.f32.mrf.mxu0 }
 0x538   :  { %v427_v48 = vsel %vm8455_vm3, %v426_v42, -1e+30  ;;  %v1278_v50 = vsel %vm8455_vm3, %v1277_v45, -1e+30 }
 0x539   :  { %v1440_v51 = vpop.f32.mrf.mxu0  ;;  %v428_v52 = vsel %vm184_vm2, %v427_v48, -inf  ;;  %v1279_v53 = vsel %vm184_vm2, %v1278_v50, -inf }
 0x53a   :  { %v1444_v54 = vmul.f32 0.35355338, %v1440_v51  ;;  %429 = vmax.xlane.f32.xlu1 %v428_v52  ;;  %1280 = vmax.xlane.f32.xlu0 %v1279_v53 }
 0x53b   :  { %v7656_v56 = vpop.f32.mrf.mxu0 }
 0x53c   :  { %v1445_v58 = vsel %vm8455_vm3, %v1444_v54, -1e+30 }
 0x53d   :  { %v1446_v59 = vsel %vm184_vm2, %v1445_v58, -inf }
 0x53e   :  { %1113 = vmax.xlane.f32.xlu1 %v1112_v57 }
 0x542   :  { %1447 = vmax.xlane.f32.xlu1 %v1446_v59 }
 0x5b3   :  { %v597_v60 = vpop.xlane.xlu0 %596 }
 0x5b4   :  { %v598_v61 = vsub.f32 %v594_v16, %v597_v60 }
 0x5b6   :  { %v599_v62 = vmul.f32 1.442695, %v598_v61 }
 0x5b7   :  { %v764_v63 = vpop.xlane.xlu0 %763 }
 0x5b8   :  { %8128 = vpow2.f32 %v599_v62  ;;  %v765_v2 = vsub.f32 %v761_v21, %v764_v63 }
 0x5ba   :  { %v766_v3 = vmul.f32 1.442695, %v765_v2 }
 0x5bb   :  { %v947_v4 = vpop.xlane.xlu0 %946 }
 0x5bc   :  { %8130 = vpow2.f32 %v766_v3  ;;  %v948_v5 = vsub.f32 %v944_v31, %v947_v4 }
 0x5be   :  { %v949_v6 = vmul.f32 1.442695, %v948_v5 }
 0x5c0   :  { %8132 = vpow2.f32 %v949_v6 }
 0x5c3   :  { %v430_v7 = vpop.xlane.xlu1 %429  ;;  %v1281_v8 = vpop.xlane.xlu0 %1280 }
 0x5c4   :  { %v1282_v9 = vsub.f32 %v1278_v50, %v1281_v8  ;;  %v431_v16 = vsub.f32 %v427_v48, %v430_v7 }
 0x5c5   :  { %v8535_v10 = vpop.eup %8128 }
 0x5c6   :  { %v1283_v11 = vmul.f32 1.442695, %v1282_v9  ;;  %v601_v12 = vsel %vm184_vm2, %v8535_v10, 0.0  ;;  %v432_v22 = vmul.f32 1.442695, %v431_v16  ;;  %v92_v16 = vld [vmem:[%s9584_s4] sm:$0xff] }
 0x5c7   :  { %v1114_v13 = vpop.xlane.xlu1 %1113  ;;  %602 = vadd.xlane.f32.xlu1 %v601_v12  ;;  %v94_v12 = vld [vmem:[%s9584_s4 + $0x10] sm:$0xff] }
 0x5c8   :  { %v1115_v14 = vsub.f32 %v1111_v55, %v1114_v13  ;;  %8134 = vpow2.f32 %v1283_v11  ;;  %v95_v11 = vld [vmem:[%s9584_s4 + $0x18] sm:$0xff] }
 0x5c9   :  { %v8539_v15 = vpop.eup %8130  ;;  %7662 = vmatprep.subr.mxu0 %v95_v11 }
 0x5ca   :  { %v1116_v17 = vmul.f32 1.442695, %v1115_v14  ;;  %v768_v18 = vsel %vm184_vm2, %v8539_v15, 0.0  ;;  %7663 = vmatpush3.msra.mxu0 %v95_v11 }
 0x5cb   :  { %v1448_v19 = vpop.xlane.xlu1 %1447  ;;  %769 = vadd.xlane.f32.xlu0 %v768_v18  ;;  %7664 = vmatprep.subr.mxu0 %v94_v12 }
 0x5cc   :  { %8136 = vpow2.f32 %v1116_v17  ;;  %v1449_v20 = vsub.f32 %v1445_v58, %v1448_v19  ;;  %7665 = vmatpush3.msra.mxu0 %v94_v12 }
 0x5cd   :  { %v8543_v21 = vpop.eup %8132 }
 0x5ce   :  { %v1450_v23 = vmul.f32 1.442695, %v1449_v20  ;;  %v951_v24 = vsel %vm184_vm2, %v8543_v21, 0.0 }
 0x5cf   :  { %952 = vadd.xlane.f32.xlu1 %v951_v24 }
 0x5d0   :  { %8138 = vpow2.f32 %v1450_v23 }
 0x5d1   :  { %8140 = vpow2.f32 %v432_v22 }
 0x5d5   :  { %v8547_v30 = vpop.eup %8134 }
 0x5d6   :  { %v1285_v31 = vsel %vm184_vm2, %v8547_v30, 0.0 }
 0x5d7   :  { %1286 = vadd.xlane.f32.xlu1 %v1285_v31 }
 0x5d9   :  { %v8551_v34 = vpop.eup %8136 }
 0x5da   :  { %v1118_v35 = vsel %vm184_vm2, %v8551_v34, 0.0 }
 0x5db   :  { %1119 = vadd.xlane.f32.xlu0 %v1118_v35 }
 0x5dd   :  { %v8555_v36 = vpop.eup %8138 }
 0x5de   :  { %v1452_v37 = vsel %vm184_vm2, %v8555_v36, 0.0  ;;  %v8141_v38 = vpop.eup %8140 }
 0x5df   :  { %1453 = vadd.xlane.f32.xlu0 %v1452_v37  ;;  %v434_v40 = vsel %vm184_vm2, %v8141_v38, 0.0 }
 0x5e3   :  { %435 = vadd.xlane.f32.xlu0 %v434_v40 }
 0x5e8   :  { %439 = vrot.lane.b32.xlu1 %v8426_v43, %s8299_s16 }
 0x5ec   :  { %773 = vrot.lane.b32.xlu1 %v8426_v43, %s9591_s0 }
 0x5f0   :  { %956 = vrot.lane.b32.xlu1 %v8436_v44, %s8298_s15 }
 0x5f4   :  { %1123 = vrot.lane.b32.xlu1 %v8436_v44, %s8299_s16 }
 0x5f8   :  { %1457 = vrot.lane.b32.xlu1 %v8436_v44, %s9591_s0  ;;  %s9595_s0 = smov 40  }
 0x5f9   :  { %606 = vrot.lane.b32.xlu0 %v8426_v43, %s8301_s17 }
 0x5fd   :  { %1290 = vrot.lane.b32.xlu0 %v8436_v44, %s8301_s17 }
 0x650   :  { %v603_v41 = vpop.xlane.xlu1 %602 }
 0x654   :  { %v770_v45 = vpop.xlane.xlu0 %769 }
 0x658   :  { %v953_v42 = vpop.xlane.xlu1 %952 }
 0x660   :  { %v1287_v46 = vpop.xlane.xlu1 %1286 }
 0x664   :  { %v1120_v47 = vpop.xlane.xlu0 %1119  ;;  %v440_v48 = vpop.permute.xlu1 %439 }
 0x665   :  { %7598 = vmatpush3.msra.mxu1 %v440_v48 }
 0x666   :  { %7607 = vmatprep.subr.mxu1 %v8289_v39 }
 0x668   :  { %v1454_v50 = vpop.xlane.xlu0 %1453  ;;  %v774_v44 = vpop.permute.xlu1 %773 }
 0x66c   :  { %v436_v51 = vpop.xlane.xlu0 %435  ;;  %v957_v57 = vpop.permute.xlu1 %956 }
 0x66d   :  { %8142 = vrcp.f32 %v436_v51 }
 0x66e   :  { %8144 = vrcp.f32 %v603_v41 }
 0x66f   :  { %8146 = vrcp.f32 %v770_v45 }
 0x670   :  { %8148 = vrcp.f32 %v953_v42  ;;  %v607_v54 = vpop.permute.xlu0 %606  ;;  %v1124_v62 = vpop.permute.xlu1 %1123 }
 0x671   :  { %8150 = vrcp.f32 %v1120_v47 }
 0x672   :  { %8152 = vrcp.f32 %v1287_v46 }
 0x673   :  { %8154 = vrcp.f32 %v1454_v50 }
 0x674   :  { %v1291_v3 = vpop.permute.xlu0 %1290  ;;  %v1458_v6 = vpop.permute.xlu1 %1457 }
 0x67a   :  { %v8143_v52 = vpop.eup %8142 }
 0x67b   :  { %v438_v43 = vmul.f32 %v8143_v52, %v8141_v38  ;;  %v8145_v53 = vpop.eup %8144 }
 0x67c   :  { %v605_v55 = vmul.f32 %v8145_v53, %v8535_v10  ;;  %v8147_v56 = vpop.eup %8146 }
 0x67d   :  { %7600 = vmatmul.mubr.msk.f32.vlgmr.msra.gmra.mxu1 %vm184_vm2, %v438_v43  ;;  %v772_v58 = vmul.f32 %v8147_v56, %v8539_v15  ;;  %v8149_v59 = vpop.eup %8148  ;;  %v93_v15 = vld [vmem:[%s9584_s4 + $0x8] sm:$0xff]  ;;  %v7208_v56 = vld [vmem:[%s9581_s2 + $0x20] sm:$0xff] }
 0x67e   :  { %7608 = vmatpush3.msra.mxu1 %v607_v54  ;;  %7609 = vmatprep.mubr.msk.f32.mxu1 %vm8290_vm1, %v8289_v39  ;;  %v955_v60 = vmul.f32 %v8149_v59, %v8543_v21  ;;  %v8151_v61 = vpop.eup %8150 }
 0x67f   :  { %7617 = vmatprep.subr.mxu1 %v8289_v39  ;;  %v1122_v63 = vmul.f32 %v8151_v61, %v8551_v34  ;;  %v8153_v2 = vpop.eup %8152  ;;  %7666 = vmatprep.subr.mxu0 %v93_v15 }
 0x680   :  { %v1289_v4 = vmul.f32 %v8153_v2, %v8547_v30  ;;  %v8155_v5 = vpop.eup %8154  ;;  %7667 = vmatpush3.msra.mxu0 %v93_v15 }
 0x681   :  { %7610 = vmatmul.mubr.msk.f32.vlgmr.msra.gmra.mxu1 %vm184_vm2, %v605_v55  ;;  %v1456_v7 = vmul.f32 %v8155_v5, %v8555_v36  ;;  %7668 = vmatprep.subr.mxu0 %v92_v16  ;;  %v37_v5 = vld [vmem:[%s9585_s1] sm:$0xff] }
 0x682   :  { %7618 = vmatpush3.msra.mxu1 %v774_v44  ;;  %7619 = vmatprep.mubr.msk.f32.mxu1 %vm8290_vm1, %v8289_v39 }
 0x683   :  { %7627 = vmatprep.subr.mxu1 %v8289_v39  ;;  %7669 = vmatpush3.msra.mxu0 %v92_v16 }
 0x685   :  { %7620 = vmatmul.mubr.msk.f32.vlgmr.msra.gmra.mxu1 %vm184_vm2, %v772_v58 }
 0x686   :  { %7628 = vmatpush3.msra.mxu1 %v957_v57  ;;  %7629 = vmatprep.mubr.msk.f32.mxu1 %vm8290_vm1, %v8289_v39 }
 0x687   :  { %7637 = vmatprep.subr.mxu1 %v8289_v39 }
 0x689   :  { %7630 = vmatmul.mubr.msk.f32.vlgmr.msra.gmra.mxu1 %vm184_vm2, %v955_v60 }
 0x68a   :  { %7638 = vmatpush3.msra.mxu1 %v1124_v62  ;;  %7639 = vmatprep.mubr.msk.f32.mxu1 %vm8290_vm1, %v8289_v39 }
 0x68b   :  { %7647 = vmatprep.subr.mxu1 %v8289_v39 }
 0x68d   :  { %7640 = vmatmul.mubr.msk.f32.vlgmr.msra.gmra.mxu1 %vm184_vm2, %v1122_v63 }
 0x68e   :  { %7648 = vmatpush3.msra.mxu1 %v1291_v3  ;;  %7649 = vmatprep.mubr.msk.f32.mxu1 %vm8290_vm1, %v8289_v39 }
 0x68f   :  { %7657 = vmatprep.subr.mxu1 %v8289_v39 }
 0x691   :  { %7650 = vmatmul.mubr.msk.f32.vlgmr.msra.gmra.mxu1 %vm184_vm2, %v1289_v4 }
 0x692   :  { %7658 = vmatpush3.msra.mxu1 %v1458_v6  ;;  %7659 = vmatprep.mubr.msk.f32.mxu1 %vm8290_vm1, %v8289_v39  ;;  %v7216_v6 = vld [vmem:[%s9583_s3 + $0x1] ss:$0 sm:$0xff] }
 0x695   :  { %7660 = vmatmul.mubr.msk.f32.vlgmr.msra.gmra.mxu1 %vm184_vm2, %v1456_v7 }
 0x73d   :  { %v511_v8 = vpop.f32.mrf.mxu1 }
 0x73e   :  { %850 = vrot.lane.b32.xlu0 %v511_v8, %s8302_s18 }
 0x73f   :  { %v7601_v9 = vpop.f32.mrf.mxu1 }
 0x741   :  { %v678_v10 = vpop.f32.mrf.mxu1 }
 0x742   :  { %854 = vrot.lane.b32.xlu1 %v678_v10, %s8303_s19 }
 0x743   :  { %v7611_v13 = vpop.f32.mrf.mxu1 }
 0x745   :  { %v845_v14 = vpop.f32.mrf.mxu1 }
 0x746   :  { %858 = vrot.lane.b32.xlu1 %v845_v14, %s8304_s26 }
 0x747   :  { %v7621_v17 = vpop.f32.mrf.mxu1 }
 0x748   :  { %v38_v17 = vld [vmem:[%s9585_s1 + $0x8] sm:$0xff] }
 0x749   :  { %v1028_v18 = vpop.f32.mrf.mxu1 }
 0x74b   :  { %v7631_v19 = vpop.f32.mrf.mxu1 }
 0x74d   :  { %v1195_v20 = vpop.f32.mrf.mxu1 }
 0x74e   :  { %1534 = vrot.lane.b32.xlu0 %v1195_v20, %s8302_s18 }
 0x74f   :  { %v7641_v21 = vpop.f32.mrf.mxu1 }
 0x751   :  { %v1362_v22 = vpop.f32.mrf.mxu1 }
 0x752   :  { %1538 = vrot.lane.b32.xlu0 %v1362_v22, %s8303_s19 }
 0x753   :  { %v7651_v23 = vpop.f32.mrf.mxu1 }
 0x755   :  { %v1529_v24 = vpop.f32.mrf.mxu1 }
 0x756   :  { %1542 = vrot.lane.b32.xlu1 %v1529_v24, %s8304_s26 }
 0x757   :  { %v7661_v30 = vpop.f32.mrf.mxu1 }
 0x7b0   :  { %v851_v31 = vpop.permute.xlu0 %850 }
 0x7b1   :  { %v861_v35 = vsel %vm184_vm2, %v8520_v33, %v851_v31  ;;  %v1550_v33 = vsub.s32 4, %v8390_v25 }
 0x7b3   :  { %v1551_v48 = vrot.slane %v8398_v27, %v1550_v33  ;;  %v7210_v27 = vld [vmem:[%s9581_s2 + $0x30] sm:$0xff] }
 0x7b4   :  { %v855_v34 = vpop.permute.xlu1 %854 }
 0x7b5   :  { %v863_v36 = vsel %vm862_vm4, %v861_v35, %v855_v34 }
 0x7b8   :  { %v859_v37 = vpop.permute.xlu1 %858 }
 0x7b9   :  { %v865_v38 = vsel %vm864_vm5, %v863_v36, %v859_v37 }
 0x7ba   :  { %7670 = vmatprep.mubr.msk.f32.mxu0 %vm47_vm0, %v865_v38 }
 0x7c0   :  { %v1535_v40 = vpop.permute.xlu0 %1534 }
 0x7c1   :  { %v1545_v42 = vsel %vm184_vm2, %v1028_v18, %v1535_v40 }
 0x7c4   :  { %v1539_v41 = vpop.permute.xlu0 %1538 }
 0x7c5   :  { %v1546_v45 = vsel %vm862_vm4, %v1545_v42, %v1539_v41 }
 0x7c8   :  { %v1543_v46 = vpop.permute.xlu1 %1542 }
 0x7c9   :  { %v1547_v47 = vsel %vm864_vm5, %v1546_v45, %v1543_v46 }
 0x7ca   :  { %7671 = vmatmul.mubr.msk.f32.vlgmr.msra.gmra.mxu0 %vm47_vm0, %v1547_v47 }
 0x7cb   :  { %7692 = vmatprep.mubr.msk.f32.mxu0 %vm47_vm0, %v37_v5 }
 0x88a   :  { %v7672_v50 = vpop.f32.mrf.mxu0 }
 0x88b   :  { %v1630_v51 = vadd.f32 %v7672_v50, %v1551_v48 }
 0x88c   :  { %v1624_v52 = vpop.f32.mrf.mxu0 }
 0x88d   :  { %v8637_v43 = vadd.f32 %v1630_v51, %v8368_v1  ;;  %v1625_v53 = vadd.f32 %v1624_v52, %v1551_v48  ;;  %v7211_v1 = vld [vmem:[%s9581_s2 + $0x38] sm:$0xff] }
 0x88e   :  { %7673 = vmatprep.subr.mxu1 %v7211_v1 }
 0x88f   :  { %v8640_v44 = vadd.f32 %v1625_v53, %v8363_v0  ;;  %v1638_v54 = vsel %vm47_vm0, %v8637_v43, 0.0  ;;  %7674 = vmatpush3.msra.mxu1 %v7211_v1  ;;  %v7209_v0 = vld [vmem:[%s9581_s2 + $0x28] sm:$0xff] }
 0x890   :  { %1639 = vadd.xlane.f32.xlu1 %v1638_v54  ;;  %7675 = vmatprep.subr.mxu1 %v7210_v27 }
 0x891   :  { %v1635_v55 = vsel %vm47_vm0, %v8640_v44, 0.0  ;;  %7676 = vmatpush3.msra.mxu1 %v7210_v27 }
 0x892   :  { %1636 = vadd.xlane.f32.xlu0 %v1635_v55  ;;  %7677 = vmatprep.subr.mxu1 %v7209_v0 }
 0x893   :  { %7678 = vmatpush3.msra.mxu1 %v7209_v0 }
 0x894   :  { %7679 = vmatprep.subr.mxu1 %v7208_v56 }
 0x895   :  { %7680 = vmatpush3.msra.mxu1 %v7208_v56 }
 0x896   :  { %7695 = vmatprep.subr.mxu1 %v8289_v39 }
 0x8a1   :  { %1769 = vrot.lane.b32.xlu1 %v7210_v27, %s8291_s28 }
 0x8a5   :  { %1767 = vrot.lane.b32.xlu1 %v7209_v0, %s8291_s28 }
 0x8a9   :  { %1765 = vrot.lane.b32.xlu1 %v7208_v56, %s8291_s28 }
 0x919   :  { %v1640_v57 = vpop.xlane.xlu1 %1639 }
 0x91a   :  { %v1642_v58 = vmul.f32 0.03125, %v1640_v57 }
 0x91b   :  { %v1637_v59 = vpop.xlane.xlu0 %1636 }
 0x91c   :  { %v1644_v60 = vsub.f32 %v8637_v43, %v1642_v58  ;;  %v1641_v61 = vmul.f32 0.03125, %v1637_v59 }
 0x91d   :  { %v1770_v8 = vpop.permute.xlu1 %1769 }
 0x91e   :  { %v1643_v62 = vsub.f32 %v8640_v44, %v1641_v61  ;;  %v1646_v63 = vmul.f32 %v1644_v60, %v1644_v60 }
 0x920   :  { %v1650_v2 = vsel %vm47_vm0, %v1646_v63, 0.0  ;;  %v1645_v3 = vmul.f32 %v1643_v62, %v1643_v62 }
 0x921   :  { %1651 = vadd.xlane.f32.xlu0 %v1650_v2  ;;  %v1768_v13 = vpop.permute.xlu1 %1767 }
 0x922   :  { %v1647_v4 = vsel %vm47_vm0, %v1645_v3, 0.0 }
 0x925   :  { %1648 = vadd.xlane.f32.xlu0 %v1647_v4  ;;  %v1766_v16 = vpop.permute.xlu1 %1765 }
 0x93b   :  { %1771 = vrot.lane.b32.xlu0 %v7211_v1, %s8291_s28 }
 0x93f   :  { %1778 = vrot.lane.b32.xlu0 %v7216_v6, %s8291_s28 }
 0x9aa   :  { %v1652_v7 = vpop.xlane.xlu0 %1651 }
 0x9ab   :  { %v1654_v9 = vmul.f32 0.03125, %v1652_v7 }
 0x9ad   :  { %v1656_v10 = vadd.f32 1e-05, %v1654_v9 }
 0x9ae   :  { %v1649_v11 = vpop.xlane.xlu0 %1648 }
 0x9af   :  { %8156 = vrsqrt.f32 %v1656_v10  ;;  %v1653_v12 = vmul.f32 0.03125, %v1649_v11 }
 0x9b1   :  { %v1655_v14 = vadd.f32 1e-05, %v1653_v12 }
 0x9b2   :  { %v1772_v15 = vpop.permute.xlu0 %1771 }
 0x9b3   :  { %8158 = vrsqrt.f32 %v1655_v14  ;;  %7684 = vmatprep.subr.mxu0 %v1772_v15 }
 0x9b4   :  { %7685 = vmatpush3.msra.mxu0 %v1772_v15 }
 0x9b5   :  { %7686 = vmatprep.subr.mxu0 %v1770_v8 }
 0x9b6   :  { %7687 = vmatpush3.msra.mxu0 %v1770_v8  ;;  %v1779_v34 = vpop.permute.xlu0 %1778 }
 0x9b7   :  { %7688 = vmatprep.subr.mxu0 %v1768_v13 }
 0x9b8   :  { %7689 = vmatpush3.msra.mxu0 %v1768_v13 }
 0x9b9   :  { %7690 = vmatprep.subr.mxu0 %v1766_v16 }
 0x9ba   :  { %7691 = vmatpush3.msra.mxu0 %v1766_v16 }
 0x9bb   :  { %7693 = vmatmul.mubr.msk.f32.vlgmr.msra.gmra.mxu0 %vm47_vm0, %v38_v17  ;;  %7705 = vmatprep.subr.mxu0 %v8289_v39 }
 0x9bc   :  { %v8157_v18 = vpop.eup %8156  ;;  %7707 = vmatprep.mubr.msk.f32.mxu0 %vm8290_vm1, %v8289_v39 }
 0x9bd   :  { %v1660_v19 = vmul.f32 %v8157_v18, %v1644_v60 }
 0x9bf   :  { %v1662_v22 = vmul.f32 %v1660_v19, %v8405_v29 }
 0x9c0   :  { %v8159_v20 = vpop.eup %8158 }
 0x9c1   :  { %v1659_v21 = vmul.f32 %v8159_v20, %v1643_v62  ;;  %v1664_v30 = vadd.f32 %v1662_v22, %v8409_v32 }
 0x9c3   :  { %v1661_v23 = vmul.f32 %v1659_v21, %v8405_v29 }
 0x9c5   :  { %v1663_v24 = vadd.f32 %v1661_v23, %v8409_v32 }
 0x9c7   :  { %7681 = vmatprep.mubr.msk.f32.mxu1 %vm47_vm0, %v1663_v24 }
 0x9c8   :  { %7682 = vmatmul.mubr.msk.f32.vlgmr.msra.gmra.mxu1 %vm47_vm0, %v1664_v30 }
 0x9c9   :  { %7697 = vmatprep.mubr.msk.f32.mxu1 %vm8290_vm1, %v8289_v39 }
 0xa7b   :  { %v7694_v31 = vpop.f32.mrf.mxu0 }
 0xa7c   :  { %v8701_v32 = vadd.f32 %v7694_v31, %v1779_v34 }
 0xa7d   :  { %v1853_v35 = vpop.f32.mrf.mxu0 }
 0xa7e   :  { %v8690_v36 = vadd.f32 %v1853_v35, %v1779_v34 }
 0xa80   :  { %2029 = vrot.lane.b32.xlu1 %v8690_v36, %s8295_s12  ;;  %7696 = vmatpush3.xpose.msk.msra.mxu1 %vm184_vm2, %v8690_v36 }
 0xa81   :  { %7700 = vmatprep.subr.mxu1 %v8289_v39 }
 0xa84   :  { %2196 = vrot.lane.b32.xlu1 %v8690_v36, %s8296_s13 }
 0xa88   :  { %v7683_v29 = vpop.f32.mrf.mxu1  ;;  %2363 = vrot.lane.b32.xlu1 %v8690_v36, %s8297_s14 }
 0xa89   :  { %v1758_v40 = vadd.f32 %v7683_v29, %v7216_v6 }
 0xa8a   :  { %v1752_v37 = vpop.f32.mrf.mxu1 }
 0xa8b   :  { %v1753_v38 = vadd.f32 %v7216_v6, %v1752_v37 }
 0xa8c   :  { %2710 = vrot.lane.b32.xlu1 %v8701_v32, %s8295_s12 }
 0xa8d   :  { %2027 = vrot.lane.b32.xlu0 %v1753_v38, %s8295_s12  ;;  %7698 = vmatmul.mubr.msk.f32.vlgmr.msra.gmra.mxu1 %vm184_vm2, %v1753_v38 }
 0xa8e   :  { %7702 = vmatprep.mubr.msk.f32.mxu1 %vm8290_vm1, %v8289_v39 }
 0xa90   :  { %2877 = vrot.lane.b32.xlu1 %v8701_v32, %s8296_s13 }
 0xa91   :  { %2194 = vrot.lane.b32.xlu0 %v1753_v38, %s8296_s13 }
 0xa94   :  { %3044 = vrot.lane.b32.xlu1 %v8701_v32, %s8297_s14 }
 0xa95   :  { %2361 = vrot.lane.b32.xlu0 %v1753_v38, %s8297_s14 }
 0xa99   :  { %2708 = vrot.lane.b32.xlu0 %v1758_v40, %s8295_s12 }
 0xa9d   :  { %2875 = vrot.lane.b32.xlu0 %v1758_v40, %s8296_s13 }
 0xaa1   :  { %3042 = vrot.lane.b32.xlu0 %v1758_v40, %s8297_s14 }
 0xaf2   :  { %v2030_v41 = vpop.permute.xlu1 %2029 }
 0xaf3   :  { %7706 = vmatpush3.xpose.msk.msra.mxu0 %vm184_vm2, %v2030_v41 }
 0xaf4   :  { %7715 = vmatprep.subr.mxu0 %v8289_v39 }
 0xaf6   :  { %v2197_v42 = vpop.permute.xlu1 %2196 }
 0xafa   :  { %v2364_v46 = vpop.permute.xlu1 %2363 }
 0xafe   :  { %v2711_v50 = vpop.permute.xlu1 %2710 }
 0xaff   :  { %v2028_v45 = vpop.permute.xlu0 %2027 }
 0xb00   :  { %7708 = vmatmul.mubr.msk.f32.vlgmr.msra.gmra.mxu0 %vm184_vm2, %v2028_v45 }
 0xb01   :  { %7716 = vmatpush3.xpose.msk.msra.mxu0 %vm184_vm2, %v2197_v42  ;;  %7717 = vmatprep.mubr.msk.f32.mxu0 %vm8290_vm1, %v8289_v39 }
 0xb02   :  { %7725 = vmatprep.subr.mxu0 %v8289_v39  ;;  %v2878_v52 = vpop.permute.xlu1 %2877 }
 0xb03   :  { %v2195_v47 = vpop.permute.xlu0 %2194 }
 0xb04   :  { %7718 = vmatmul.mubr.msk.f32.vlgmr.msra.gmra.mxu0 %vm184_vm2, %v2195_v47 }
 0xb05   :  { %7726 = vmatpush3.xpose.msk.msra.mxu0 %vm184_vm2, %v2364_v46  ;;  %7727 = vmatprep.mubr.msk.f32.mxu0 %vm8290_vm1, %v8289_v39 }
 0xb06   :  { %7735 = vmatprep.subr.mxu0 %v8289_v39  ;;  %v3045_v54 = vpop.permute.xlu1 %3044 }
 0xb07   :  { %v2362_v48 = vpop.permute.xlu0 %2361 }
 0xb08   :  { %7728 = vmatmul.mubr.msk.f32.vlgmr.msra.gmra.mxu0 %vm184_vm2, %v2362_v48 }
 0xb09   :  { %7736 = vmatpush3.xpose.msk.msra.mxu0 %vm184_vm2, %v8701_v32  ;;  %7737 = vmatprep.mubr.msk.f32.mxu0 %vm8290_vm1, %v8289_v39 }
 0xb0a   :  { %7745 = vmatprep.subr.mxu0 %v8289_v39 }
 0xb0b   :  { %v2709_v51 = vpop.permute.xlu0 %2708 }
 0xb0c   :  { %7738 = vmatmul.mubr.msk.f32.vlgmr.msra.gmra.mxu0 %vm184_vm2, %v1758_v40 }
 0xb0d   :  { %7746 = vmatpush3.xpose.msk.msra.mxu0 %vm184_vm2, %v2711_v50  ;;  %7747 = vmatprep.mubr.msk.f32.mxu0 %vm8290_vm1, %v8289_v39 }
 0xb0e   :  { %7755 = vmatprep.subr.mxu0 %v8289_v39 }
 0xb0f   :  { %v2876_v53 = vpop.permute.xlu0 %2875 }
 0xb10   :  { %7748 = vmatmul.mubr.msk.f32.vlgmr.msra.gmra.mxu0 %vm184_vm2, %v2709_v51 }
 0xb11   :  { %7756 = vmatpush3.xpose.msk.msra.mxu0 %vm184_vm2, %v2878_v52  ;;  %7757 = vmatprep.mubr.msk.f32.mxu0 %vm8290_vm1, %v8289_v39 }
 0xb12   :  { %7765 = vmatprep.subr.mxu0 %v8289_v39 }
 0xb13   :  { %v3043_v55 = vpop.permute.xlu0 %3042 }
 0xb14   :  { %7758 = vmatmul.mubr.msk.f32.vlgmr.msra.gmra.mxu0 %vm184_vm2, %v2876_v53 }
 0xb15   :  { %7766 = vmatpush3.xpose.msk.msra.mxu0 %vm184_vm2, %v3045_v54  ;;  %7767 = vmatprep.mubr.msk.f32.mxu0 %vm8290_vm1, %v8289_v39 }
 0xb18   :  { %7768 = vmatmul.mubr.msk.f32.vlgmr.msra.gmra.mxu0 %vm184_vm2, %v3043_v55 }
 0xb4d   :  { %v1934_v27 = vpop.f32.mrf.mxu1 }
 0xb4e   :  { %v1938_v1 = vmul.f32 0.35355338, %v1934_v27 }
 0xb4f   :  { %v7699_v0 = vpop.f32.mrf.mxu1 }
 0xb50   :  { %v1939_v56 = vsel %vm8455_vm3, %v1938_v1, -1e+30 }
 0xb51   :  { %v1940_v57 = vsel %vm184_vm2, %v1939_v56, -inf }
 0xb52   :  { %1941 = vmax.xlane.f32.xlu1 %v1940_v57 }
 0xbc0   :  { %v2101_v58 = vpop.f32.mrf.mxu0 }
 0xbc1   :  { %v2105_v59 = vmul.f32 0.35355338, %v2101_v58 }
 0xbc2   :  { %v7709_v60 = vpop.f32.mrf.mxu0 }
 0xbc3   :  { %v2106_v61 = vsel %vm8455_vm3, %v2105_v59, -1e+30 }
 0xbc4   :  { %v2268_v62 = vpop.f32.mrf.mxu0  ;;  %v2107_v63 = vsel %vm184_vm2, %v2106_v61, -inf }
 0xbc5   :  { %v2272_v2 = vmul.f32 0.35355338, %v2268_v62  ;;  %2108 = vmax.xlane.f32.xlu0 %v2107_v63 }
 0xbc6   :  { %v7719_v3 = vpop.f32.mrf.mxu0 }
 0xbc7   :  { %v2273_v4 = vsel %vm8455_vm3, %v2272_v2, -1e+30 }
 0xbc8   :  { %v2435_v5 = vpop.f32.mrf.mxu0  ;;  %v2274_v6 = vsel %vm184_vm2, %v2273_v4, -inf }
 0xbc9   :  { %v2439_v7 = vmul.f32 0.35355338, %v2435_v5  ;;  %2275 = vmax.xlane.f32.xlu0 %v2274_v6 }
 0xbca   :  { %v7729_v8 = vpop.f32.mrf.mxu0 }
 0xbcb   :  { %v8762_v9 = vsel %vm8455_vm3, %v2439_v7, -1e+30 }
 0xbcc   :  { %v2615_v10 = vpop.f32.mrf.mxu0  ;;  %v2441_v11 = vsel %vm184_vm2, %v8762_v9, -inf }
 0xbcd   :  { %v2619_v12 = vmul.f32 0.35355338, %v2615_v10  ;;  %2442 = vmax.xlane.f32.xlu0 %v2441_v11 }
 0xbce   :  { %v7739_v13 = vpop.f32.mrf.mxu0 }
 0xbcf   :  { %v2620_v14 = vsel %vm8455_vm3, %v2619_v12, -1e+30 }
 0xbd0   :  { %v2782_v15 = vpop.f32.mrf.mxu0  ;;  %v2621_v16 = vsel %vm184_vm2, %v2620_v14, -inf }
 0xbd1   :  { %v2786_v17 = vmul.f32 0.35355338, %v2782_v15  ;;  %2622 = vmax.xlane.f32.xlu1 %v2621_v16 }
 0xbd2   :  { %v7749_v18 = vpop.f32.mrf.mxu0 }
 0xbd3   :  { %v8771_v19 = vsel %vm8455_vm3, %v2786_v17, -1e+30 }
 0xbd4   :  { %v2949_v20 = vpop.f32.mrf.mxu0  ;;  %v2788_v21 = vsel %vm184_vm2, %v8771_v19, -inf }
 0xbd5   :  { %v2953_v22 = vmul.f32 0.35355338, %v2949_v20  ;;  %2789 = vmax.xlane.f32.xlu0 %v2788_v21 }
 0xbd6   :  { %v7759_v23 = vpop.f32.mrf.mxu0 }
 0xbd7   :  { %v2954_v24 = vsel %vm8455_vm3, %v2953_v22, -1e+30 }
 0xbd8   :  { %v3116_v30 = vpop.f32.mrf.mxu0  ;;  %v2955_v31 = vsel %vm184_vm2, %v2954_v24, -inf }
 0xbd9   :  { %v3120_v34 = vmul.f32 0.35355338, %v3116_v30  ;;  %2956 = vmax.xlane.f32.xlu1 %v2955_v31 }
 0xbda   :  { %v7769_v35 = vpop.f32.mrf.mxu0 }
 0xbdb   :  { %v3121_v29 = vsel %vm8455_vm3, %v3120_v34, -1e+30  ;;  %v1942_v38 = vpop.xlane.xlu1 %1941 }
 0xbdc   :  { %v3122_v37 = vsel %vm184_vm2, %v3121_v29, -inf  ;;  %v1943_v40 = vsub.f32 %v1939_v56, %v1942_v38 }
 0xbdd   :  { %3123 = vmax.xlane.f32.xlu0 %v3122_v37 }
 0xbde   :  { %v1944_v41 = vmul.f32 1.442695, %v1943_v40 }
 0xbe0   :  { %8160 = vpow2.f32 %v1944_v41 }
 0xbea   :  { %2118 = vrot.lane.b32.xlu1 %v8690_v36, %s8292_s29 }
 0xbed   :  { %v8787_v42 = vpop.eup %8160 }
 0xbee   :  { %2285 = vrot.lane.b32.xlu1 %v8690_v36, %s8293_s30  ;;  %v1946_v45 = vsel %vm184_vm2, %v8787_v42, 0.0 }
 0xbf3   :  { %1951 = vrot.lane.b32.xlu0 %v8690_v36, %s8291_s28 }
 0xc12   :  { %1947 = vadd.xlane.f32.xlu1 %v1946_v45 }
 0xc23   :  { %2632 = vrot.lane.b32.xlu1 %v8701_v32, %s8291_s28 }
 0xc4e   :  { %v2109_v46 = vpop.xlane.xlu0 %2108 }
 0xc4f   :  { %v2110_v47 = vsub.f32 %v2106_v61, %v2109_v46 }
 0xc51   :  { %v2111_v48 = vmul.f32 1.442695, %v2110_v47 }
 0xc52   :  { %v2276_v50 = vpop.xlane.xlu0 %2275 }
 0xc53   :  { %8162 = vpow2.f32 %v2111_v48  ;;  %v2277_v51 = vsub.f32 %v2273_v4, %v2276_v50 }
 0xc55   :  { %v2278_v52 = vmul.f32 1.442695, %v2277_v51 }
 0xc56   :  { %v2443_v27 = vpop.xlane.xlu0 %2442 }
 0xc57   :  { %8164 = vpow2.f32 %v2278_v52  ;;  %v2444_v11 = vsub.f32 %v8762_v9, %v2443_v27 }
 0xc59   :  { %v2445_v12 = vmul.f32 1.442695, %v2444_v11 }
 0xc5a   :  { %v2623_v53 = vpop.xlane.xlu1 %2622 }
 0xc5b   :  { %v2624_v54 = vsub.f32 %v2620_v14, %v2623_v53 }
 0xc5d   :  { %v2625_v55 = vmul.f32 1.442695, %v2624_v54 }
 0xc5e   :  { %v2790_v56 = vpop.xlane.xlu0 %2789 }
 0xc5f   :  { %8166 = vpow2.f32 %v2625_v55  ;;  %v2791_v13 = vsub.f32 %v8771_v19, %v2790_v56 }
 0xc60   :  { %v8163_v1 = vpop.eup %8162 }
 0xc61   :  { %v2113_v0 = vsel %vm184_vm2, %v8163_v1, 0.0  ;;  %v2792_v14 = vmul.f32 1.442695, %v2791_v13 }
 0xc62   :  { %v2957_v57 = vpop.xlane.xlu1 %2956  ;;  %2114 = vadd.xlane.f32.xlu0 %v2113_v0 }
 0xc63   :  { %v2958_v58 = vsub.f32 %v2954_v24, %v2957_v57 }
 0xc64   :  { %v8165_v59 = vpop.eup %8164 }
 0xc65   :  { %v2959_v60 = vmul.f32 1.442695, %v2958_v58  ;;  %v2280_v61 = vsel %vm184_vm2, %v8165_v59, 0.0 }
 0xc66   :  { %2281 = vadd.xlane.f32.xlu1 %v2280_v61  ;;  %v3124_v62 = vpop.xlane.xlu0 %3123  ;;  %v2119_v15 = vpop.permute.xlu1 %2118  ;;  %v7215_v61 = vld [vmem:[%s9584_s4 + $0x38] sm:$0xff] }
 0xc67   :  { %8168 = vpow2.f32 %v2959_v60  ;;  %v3125_v63 = vsub.f32 %v3121_v29, %v3124_v62  ;;  %v7214_v62 = vld [vmem:[%s9584_s4 + $0x30] sm:$0xff]  ;;  %7775 = vmatprep.subr.mxu0 %v7215_v61 }
 0xc68   :  { %7776 = vmatpush3.msra.mxu0 %v7215_v61  ;;  %v3345_v61 = vsub.s32 3, %v8390_v25 }
 0xc69   :  { %v3126_v2 = vmul.f32 1.442695, %v3125_v63  ;;  %7777 = vmatprep.subr.mxu0 %v7214_v62 }
 0xc6a   :  { %v1952_v3 = vpop.permute.xlu0 %1951  ;;  %v2286_v18 = vpop.permute.xlu1 %2285  ;;  %7778 = vmatpush3.msra.mxu0 %v7214_v62 }
 0xc6b   :  { %8170 = vpow2.f32 %v3126_v2  ;;  %7701 = vmatpush3.msra.mxu1 %v1952_v3  ;;  %v7213_v2 = vld [vmem:[%s9584_s4 + $0x28] sm:$0xff]  ;;  %v7212_v3 = vld [vmem:[%s9584_s4 + $0x20] sm:$0xff] }
 0xc6c   :  { %v8795_v4 = vpop.eup %8166  ;;  %7710 = vmatprep.subr.mxu1 %v8289_v39  ;;  %8172 = vpow2.f32 %v2445_v12  ;;  %7779 = vmatprep.subr.mxu0 %v7213_v2 }
 0xc6d   :  { %v2627_v5 = vsel %vm184_vm2, %v8795_v4, 0.0  ;;  %8174 = vpow2.f32 %v2792_v14  ;;  %7780 = vmatpush3.msra.mxu0 %v7213_v2 }
 0xc6e   :  { %2628 = vadd.xlane.f32.xlu1 %v2627_v5  ;;  %7781 = vmatprep.subr.mxu0 %v7212_v3 }
 0xc6f   :  { %7782 = vmatpush3.msra.mxu0 %v7212_v3 }
 0xc74   :  { %v8800_v6 = vpop.eup %8168 }
 0xc75   :  { %v2961_v7 = vsel %vm184_vm2, %v8800_v6, 0.0 }
 0xc76   :  { %2962 = vadd.xlane.f32.xlu1 %v2961_v7 }
 0xc78   :  { %v8804_v8 = vpop.eup %8170  ;;  %2452 = vrot.lane.b32.xlu0 %v8690_v36, %s8294_s11 }
 0xc79   :  { %v3128_v10 = vsel %vm184_vm2, %v8804_v8, 0.0  ;;  %v8173_v16 = vpop.eup %8172 }
 0xc7a   :  { %3129 = vadd.xlane.f32.xlu1 %v3128_v10  ;;  %v2447_v17 = vsel %vm184_vm2, %v8173_v16, 0.0  ;;  %v8175_v36 = vpop.eup %8174 }
 0xc7b   :  { %v2794_v20 = vsel %vm184_vm2, %v8175_v36, 0.0 }
 0xc8b   :  { %2966 = vrot.lane.b32.xlu1 %v8701_v32, %s8293_s30 }
 0xc97   :  { %2448 = vadd.xlane.f32.xlu0 %v2447_v17 }
 0xc9b   :  { %v1948_v21 = vpop.xlane.xlu1 %1947  ;;  %2795 = vadd.xlane.f32.xlu0 %v2794_v20 }
 0xc9c   :  { %8176 = vrcp.f32 %v1948_v21 }
 0xc9f   :  { %v2633_v22 = vpop.permute.xlu1 %2632 }
 0xca9   :  { %v8177_v9 = vpop.eup %8176 }
 0xcaa   :  { %v1950_v19 = vmul.f32 %v8177_v9, %v8787_v42 }
 0xcac   :  { %7703 = vmatmul.mubr.msk.f32.vlgmr.msra.gmra.mxu1 %vm184_vm2, %v1950_v19 }
 0xcad   :  { %7711 = vmatpush3.msra.mxu1 %v2119_v15  ;;  %7712 = vmatprep.mubr.msk.f32.mxu1 %vm8290_vm1, %v8289_v39 }
 0xcae   :  { %7720 = vmatprep.subr.mxu1 %v8289_v39 }
 0xcb1   :  { %2799 = vrot.lane.b32.xlu0 %v8701_v32, %s8292_s29 }
 0xcb5   :  { %3133 = vrot.lane.b32.xlu0 %v8701_v32, %s8294_s11 }
 0xceb   :  { %v2115_v23 = vpop.xlane.xlu0 %2114 }
 0xcec   :  { %8178 = vrcp.f32 %v2115_v23 }
 0xcef   :  { %v2282_v24 = vpop.xlane.xlu1 %2281  ;;  %v2453_v29 = vpop.permute.xlu0 %2452 }
 0xcf0   :  { %8180 = vrcp.f32 %v2282_v24  ;;  %v3226_v24 = vsub.s32 5, %v8390_v25 }
 0xcf7   :  { %v2629_v32 = vpop.xlane.xlu1 %2628 }
 0xcf9   :  { %v8179_v30 = vpop.eup %8178 }
 0xcfa   :  { %v2117_v31 = vmul.f32 %v8179_v30, %v8163_v1  ;;  %v8882_v30 = vld [vmem:[%s9582_s8] sm:$0xff] }
 0xcfb   :  { %v3346_v3 = vrot.slane %v8882_v30, %v3345_v61 }
 0xcfc   :  { %7713 = vmatmul.mubr.msk.f32.vlgmr.msra.gmra.mxu1 %vm184_vm2, %v2117_v31  ;;  %v3227_v31 = vrot.slane %v8882_v30, %v3226_v24 }
 0xcfd   :  { %v8181_v34 = vpop.eup %8180  ;;  %7721 = vmatpush3.msra.mxu1 %v2286_v18  ;;  %7722 = vmatprep.mubr.msk.f32.mxu1 %vm8290_vm1, %v8289_v39 }
 0xcfe   :  { %7730 = vmatprep.subr.mxu1 %v8289_v39  ;;  %v2284_v35 = vmul.f32 %v8181_v34, %v8165_v59 }
 0xcff   :  { %v2963_v40 = vpop.xlane.xlu1 %2962 }
 0xd00   :  { %7723 = vmatmul.mubr.msk.f32.vlgmr.msra.gmra.mxu1 %vm184_vm2, %v2284_v35 }
 0xd01   :  { %7731 = vmatpush3.msra.mxu1 %v2453_v29  ;;  %7732 = vmatprep.mubr.msk.f32.mxu1 %vm8290_vm1, %v8289_v39 }
 0xd02   :  { %7740 = vmatprep.subr.mxu1 %v8289_v39 }
 0xd03   :  { %v3130_v41 = vpop.xlane.xlu1 %3129 }
 0xd07   :  { %v2967_v53 = vpop.permute.xlu1 %2966 }
 0xd20   :  { %v2449_v37 = vpop.xlane.xlu0 %2448 }
 0xd21   :  { %8182 = vrcp.f32 %v2449_v37 }
 0xd22   :  { %8184 = vrcp.f32 %v2629_v32 }
 0xd24   :  { %v2796_v38 = vpop.xlane.xlu0 %2795 }
 0xd25   :  { %8186 = vrcp.f32 %v2796_v38 }
 0xd26   :  { %8188 = vrcp.f32 %v2963_v40 }
 0xd27   :  { %8190 = vrcp.f32 %v3130_v41 }
 0xd28   :  { %v2800_v50 = vpop.permute.xlu0 %2799 }
 0xd2c   :  { %v3134_v27 = vpop.permute.xlu0 %3133 }
 0xd2e   :  { %v8183_v42 = vpop.eup %8182 }
 0xd2f   :  { %v2451_v45 = vmul.f32 %v8183_v42, %v8173_v16  ;;  %v8185_v46 = vpop.eup %8184 }
 0xd30   :  { %v2631_v47 = vmul.f32 %v8185_v46, %v8795_v4 }
 0xd31   :  { %7733 = vmatmul.mubr.msk.f32.vlgmr.msra.gmra.mxu1 %vm184_vm2, %v2451_v45 }
 0xd32   :  { %7741 = vmatpush3.msra.mxu1 %v2633_v22  ;;  %7742 = vmatprep.mubr.msk.f32.mxu1 %vm8290_vm1, %v8289_v39  ;;  %v8187_v48 = vpop.eup %8186 }
 0xd33   :  { %7750 = vmatprep.subr.mxu1 %v8289_v39  ;;  %v2798_v51 = vmul.f32 %v8187_v48, %v8175_v36  ;;  %v8189_v52 = vpop.eup %8188 }
 0xd34   :  { %v2965_v54 = vmul.f32 %v8189_v52, %v8800_v6  ;;  %v8191_v55 = vpop.eup %8190 }
 0xd35   :  { %7743 = vmatmul.mubr.msk.f32.vlgmr.msra.gmra.mxu1 %vm184_vm2, %v2631_v47  ;;  %v3132_v1 = vmul.f32 %v8191_v55, %v8804_v8  ;;  %v3350_v55 = vld [vmem:[%s9586_s5 + $0x10] sm:$0xff] }
 0xd36   :  { %7751 = vmatpush3.msra.mxu1 %v2800_v50  ;;  %7752 = vmatprep.mubr.msk.f32.mxu1 %vm8290_vm1, %v8289_v39 }
 0xd37   :  { %7760 = vmatprep.subr.mxu1 %v8289_v39 }
 0xd39   :  { %7753 = vmatmul.mubr.msk.f32.vlgmr.msra.gmra.mxu1 %vm184_vm2, %v2798_v51 }
 0xd3a   :  { %7761 = vmatpush3.msra.mxu1 %v2967_v53  ;;  %7762 = vmatprep.mubr.msk.f32.mxu1 %vm8290_vm1, %v8289_v39  ;;  %v3352_v53 = vld [vmem:[%s9586_s5 + $0x30] sm:$0xff] }
 0xd3b   :  { %7770 = vmatprep.subr.mxu1 %v8289_v39 }
 0xd3d   :  { %7763 = vmatmul.mubr.msk.f32.vlgmr.msra.gmra.mxu1 %vm184_vm2, %v2965_v54  ;;  %v3351_v54 = vld [vmem:[%s9586_s5 + $0x20] sm:$0xff] }
 0xd3e   :  { %7771 = vmatpush3.msra.mxu1 %v3134_v27  ;;  %7772 = vmatprep.mubr.msk.f32.mxu1 %vm8290_vm1, %v8289_v39  ;;  %v3349_v27 = vld [vmem:[%s9586_s5] sm:$0xff] }
 0xd3f   :  { %7786 = vmatprep.subr.mxu1 %v3352_v53 }
 0xd41   :  { %7773 = vmatmul.mubr.msk.f32.vlgmr.msra.gmra.mxu1 %vm184_vm2, %v3132_v1 }
 0xd42   :  { %7787 = vmatpush3.msra.mxu1 %v3352_v53 }
 0xd43   :  { %7788 = vmatprep.subr.mxu1 %v3351_v54 }
 0xd44   :  { %7789 = vmatpush3.msra.mxu1 %v3351_v54 }
 0xd45   :  { %7790 = vmatprep.subr.mxu1 %v3350_v55 }
 0xd46   :  { %7791 = vmatpush3.msra.mxu1 %v3350_v55 }
 0xd47   :  { %7792 = vmatprep.subr.mxu1 %v3349_v27 }
 0xd48   :  { %7793 = vmatpush3.msra.mxu1 %v3349_v27 }
 0xd6c   :  { %v2023_v0 = vpop.f32.mrf.mxu1 }
 0xd6e   :  { %v7704_v56 = vpop.f32.mrf.mxu1 }
 0xdbc   :  { %v2190_v57 = vpop.f32.mrf.mxu1 }
 0xdbd   :  { %2529 = vrot.lane.b32.xlu1 %v2190_v57, %s8302_s18 }
 0xdbe   :  { %v7714_v58 = vpop.f32.mrf.mxu1 }
 0xdc0   :  { %v2357_v59 = vpop.f32.mrf.mxu1 }
 0xdc1   :  { %2533 = vrot.lane.b32.xlu0 %v2357_v59, %s8303_s19 }
 0xdc2   :  { %v7724_v60 = vpop.f32.mrf.mxu1 }
 0xdc3   :  { %v3339_v60 = vsub.s32 2, %v8390_v25 }
 0xdc5   :  { %v3340_v62 = vrot.slane %v8882_v30, %v3339_v60 }
 0xdf1   :  { %v2524_v63 = vpop.f32.mrf.mxu1 }
 0xdf2   :  { %2537 = vrot.lane.b32.xlu0 %v2524_v63, %s8304_s26 }
 0xdf3   :  { %v7734_v4 = vpop.f32.mrf.mxu1 }
 0xdf5   :  { %v2704_v5 = vpop.f32.mrf.mxu1 }
 0xdf7   :  { %v7744_v6 = vpop.f32.mrf.mxu1 }
 0xdf9   :  { %v2871_v7 = vpop.f32.mrf.mxu1 }
 0xdfa   :  { %3210 = vrot.lane.b32.xlu1 %v2871_v7, %s8302_s18 }
 0xdfb   :  { %v7754_v8 = vpop.f32.mrf.mxu1 }
 0xdfd   :  { %v3038_v10 = vpop.f32.mrf.mxu1 }
 0xdfe   :  { %3214 = vrot.lane.b32.xlu1 %v3038_v10, %s8303_s19 }
 0xdff   :  { %v7764_v11 = vpop.f32.mrf.mxu1 }
 0xe00   :  { %v3368_v11 = vld [vmem:[%s9587_s6 + $0x78] sm:$0xff] }
 0xe01   :  { %v3205_v12 = vpop.f32.mrf.mxu1  ;;  %7797 = vmatprep.subr.mxu0 %v3368_v11 }
 0xe02   :  { %3218 = vrot.lane.b32.xlu0 %v3205_v12, %s8304_s26  ;;  %v3367_v12 = vld [vmem:[%s9587_s6 + $0x70] sm:$0xff] }
 0xe03   :  { %v7774_v13 = vpop.f32.mrf.mxu1 }
 0xe04   :  { %v3366_v13 = vld [vmem:[%s9587_s6 + $0x68] sm:$0xff] }
 0xe2f   :  { %v2530_v14 = vpop.permute.xlu1 %2529 }
 0xe30   :  { %v2540_v16 = vsel %vm184_vm2, %v2023_v0, %v2530_v14  ;;  %v3365_v14 = vld [vmem:[%s9587_s6 + $0x60] sm:$0xff] }
 0xe33   :  { %v2534_v15 = vpop.permute.xlu0 %2533 }
 0xe34   :  { %v2541_v17 = vsel %vm862_vm4, %v2540_v16, %v2534_v15  ;;  %v3364_v15 = vld [vmem:[%s9587_s6 + $0x58] sm:$0xff]  ;;  %v3363_v16 = vld [vmem:[%s9587_s6 + $0x50] sm:$0xff] }
 0xe64   :  { %v2538_v36 = vpop.permute.xlu0 %2537 }
 0xe65   :  { %v2542_v18 = vsel %vm864_vm5, %v2541_v17, %v2538_v36  ;;  %v3362_v17 = vld [vmem:[%s9587_s6 + $0x48] sm:$0xff]  ;;  %v3361_v36 = vld [vmem:[%s9587_s6 + $0x40] sm:$0xff] }
 0xe66   :  { %7783 = vmatprep.mubr.msk.f32.mxu0 %vm47_vm0, %v2542_v18  ;;  %v3360_v18 = vld [vmem:[%s9587_s6 + $0x38] sm:$0xff] }
 0xe6c   :  { %v3211_v20 = vpop.permute.xlu1 %3210 }
 0xe6d   :  { %v3221_v9 = vsel %vm184_vm2, %v2704_v5, %v3211_v20  ;;  %v3359_v20 = vld [vmem:[%s9587_s6 + $0x30] sm:$0xff] }
 0xe70   :  { %v3215_v21 = vpop.permute.xlu1 %3214 }
 0xe71   :  { %v3222_v19 = vsel %vm862_vm4, %v3221_v9, %v3215_v21  ;;  %v3358_v21 = vld [vmem:[%s9587_s6 + $0x28] sm:$0xff]  ;;  %v3357_v9 = vld [vmem:[%s9587_s6 + $0x20] sm:$0xff] }
 0xe74   :  { %v3219_v22 = vpop.permute.xlu0 %3218 }
 0xe75   :  { %v3223_v23 = vsel %vm864_vm5, %v3222_v19, %v3219_v22  ;;  %v3356_v19 = vld [vmem:[%s9587_s6 + $0x18] sm:$0xff]  ;;  %v3355_v22 = vld [vmem:[%s9587_s6 + $0x10] sm:$0xff] }
 0xe76   :  { %7784 = vmatmul.mubr.msk.f32.vlgmr.msra.gmra.mxu0 %vm47_vm0, %v3223_v23  ;;  %v3354_v23 = vld [vmem:[%s9587_s6 + $0x8] sm:$0xff] }
 0xe77   :  { %7798 = vmatpush3.msra.mxu0 %v3368_v11 }
 0xe78   :  { %7799 = vmatprep.subr.mxu0 %v3367_v12 }
 0xe79   :  { %7800 = vmatpush3.msra.mxu0 %v3367_v12 }
 0xe7a   :  { %7801 = vmatprep.subr.mxu0 %v3366_v13 }
 0xe7b   :  { %7802 = vmatpush3.msra.mxu0 %v3366_v13 }
 0xe7c   :  { %7803 = vmatprep.subr.mxu0 %v3365_v14 }
 0xe7d   :  { %7804 = vmatpush3.msra.mxu0 %v3365_v14 }
 0xe7e   :  { %7805 = vmatprep.subr.mxu0 %v3364_v15 }
 0xe7f   :  { %7806 = vmatpush3.msra.mxu0 %v3364_v15 }
 0xe80   :  { %7807 = vmatprep.subr.mxu0 %v3363_v16 }
 0xe81   :  { %7808 = vmatpush3.msra.mxu0 %v3363_v16 }
 0xe82   :  { %7809 = vmatprep.subr.mxu0 %v3362_v17 }
 0xe83   :  { %7810 = vmatpush3.msra.mxu0 %v3362_v17  ;;  %v7252_v17 = vld [vmem:[%s9581_s2 + $0x58] sm:$0xff] }
 0xe84   :  { %7811 = vmatprep.subr.mxu0 %v3361_v36  ;;  %7832 = vmatprep.subr.mxu1 %v7252_v17 }
 0xe85   :  { %7812 = vmatpush3.msra.mxu0 %v3361_v36  ;;  %v7251_v36 = vld [vmem:[%s9581_s2 + $0x50] sm:$0xff] }
 0xe86   :  { %7813 = vmatprep.subr.mxu0 %v3360_v18 }
 0xe87   :  { %7814 = vmatpush3.msra.mxu0 %v3360_v18  ;;  %v7250_v18 = vld [vmem:[%s9581_s2 + $0x48] sm:$0xff] }
 0xe88   :  { %7815 = vmatprep.subr.mxu0 %v3359_v20 }
 0xe89   :  { %7816 = vmatpush3.msra.mxu0 %v3359_v20  ;;  %v7249_v20 = vld [vmem:[%s9581_s2 + $0x40] sm:$0xff] }
 0xe8a   :  { %7817 = vmatprep.subr.mxu0 %v3358_v21 }
 0xe8b   :  { %7818 = vmatpush3.msra.mxu0 %v3358_v21 }
 0xe8c   :  { %7819 = vmatprep.subr.mxu0 %v3357_v9 }
 0xe8d   :  { %7820 = vmatpush3.msra.mxu0 %v3357_v9 }
 0xe8e   :  { %7821 = vmatprep.subr.mxu0 %v3356_v19 }
 0xe8f   :  { %7822 = vmatpush3.msra.mxu0 %v3356_v19 }
 0xe90   :  { %7823 = vmatprep.subr.mxu0 %v3355_v22 }
 0xe91   :  { %7824 = vmatpush3.msra.mxu0 %v3355_v22 }
 0xe92   :  { %7825 = vmatprep.subr.mxu0 %v3354_v23 }
 0xe93   :  { %7826 = vmatpush3.msra.mxu0 %v3354_v23 }
 0xf36   :  { %v7785_v34 = vpop.f32.mrf.mxu0 }
 0xf37   :  { %v3306_v35 = vadd.f32 %v7785_v34, %v3227_v31  ;;  %v41_v34 = vld [vmem:[%s9588_s7] sm:$0x3] }
 0xf38   :  { %v3300_v29 = vpop.f32.mrf.mxu0 }
 0xf39   :  { %v8888_v32 = vadd.f32 %v3306_v35, %v8637_v43  ;;  %v3301_v37 = vadd.f32 %v3300_v29, %v3227_v31  ;;  %v3353_v31 = vld [vmem:[%s9587_s6] sm:$0xff]  ;;  %v3372_v35 = vrot.slane %v41_v34, %v8393_v26  ;;  %v3581_v34 = vsub.s32 7, %v8390_v25 }
 0xf3a   :  { %7827 = vmatprep.subr.mxu0 %v3353_v31 }
 0xf3b   :  { %v8891_v38 = vadd.f32 %v3301_v37, %v8640_v44  ;;  %v3314_v40 = vsel %vm47_vm0, %v8888_v32, 0.0  ;;  %7828 = vmatpush3.msra.mxu0 %v3353_v31 }
 0xf3c   :  { %3315 = vadd.xlane.f32.xlu0 %v3314_v40  ;;  %7873 = vmatprep.subr.mxu0 %v8289_v39 }
 0xf3d   :  { %v3311_v41 = vsel %vm47_vm0, %v8891_v38, 0.0 }
 0xf3e   :  { %3312 = vadd.xlane.f32.xlu1 %v3311_v41 }
 0xfc5   :  { %v3316_v42 = vpop.xlane.xlu0 %3315 }
 0xfc6   :  { %v3318_v45 = vmul.f32 0.03125, %v3316_v42 }
 0xfc7   :  { %v3313_v46 = vpop.xlane.xlu1 %3312 }
 0xfc8   :  { %v3317_v47 = vmul.f32 0.03125, %v3313_v46  ;;  %v3320_v48 = vsub.f32 %v8888_v32, %v3318_v45 }
 0xfca   :  { %v3319_v43 = vsub.f32 %v8891_v38, %v3317_v47  ;;  %v3322_v51 = vmul.f32 %v3320_v48, %v3320_v48 }
 0xfcc   :  { %v3321_v50 = vmul.f32 %v3319_v43, %v3319_v43  ;;  %v3326_v52 = vsel %vm47_vm0, %v3322_v51, 0.0 }
 0xfce   :  { %v3323_v44 = vsel %vm47_vm0, %v3321_v50, 0.0 }
 0xfcf   :  { %3324 = vadd.xlane.f32.xlu0 %v3323_v44 }
 0xfd3   :  { %3327 = vadd.xlane.f32.xlu0 %v3326_v52 }
0x1058   :  { %v3325_v1 = vpop.xlane.xlu0 %3324 }
0x1059   :  { %v3329_v0 = vmul.f32 0.03125, %v3325_v1 }
0x105b   :  { %v3331_v56 = vadd.f32 1e-05, %v3329_v0 }
0x105c   :  { %v3328_v57 = vpop.xlane.xlu0 %3327 }
0x105d   :  { %8192 = vrsqrt.f32 %v3331_v56  ;;  %v3330_v58 = vmul.f32 0.03125, %v3328_v57 }
0x105f   :  { %v3332_v59 = vadd.f32 1e-05, %v3330_v58  ;;  %v3474_v58 = vsub.s32 6, %v8390_v25 }
0x1061   :  { %8194 = vrsqrt.f32 %v3332_v59  ;;  %v3475_v59 = vrot.slane %v8882_v30, %v3474_v58 }
0x106a   :  { %v8193_v63 = vpop.eup %8192 }
0x106b   :  { %v3335_v2 = vmul.f32 %v8193_v63, %v3319_v43 }
0x106d   :  { %v3341_v4 = vmul.f32 %v3340_v62, %v3335_v2 }
0x106e   :  { %v8195_v5 = vpop.eup %8194 }
0x106f   :  { %v3336_v6 = vmul.f32 %v8195_v5, %v3320_v48  ;;  %v3347_v7 = vadd.f32 %v3346_v3, %v3341_v4 }
0x1071   :  { %v3342_v8 = vmul.f32 %v3340_v62, %v3336_v6  ;;  %7794 = vmatprep.mubr.msk.f32.mxu1 %vm47_vm0, %v3347_v7 }
0x1073   :  { %v3348_v10 = vadd.f32 %v3346_v3, %v3342_v8 }
0x1075   :  { %7795 = vmatmul.mubr.msk.f32.vlgmr.msra.gmra.mxu1 %vm47_vm0, %v3348_v10 }
0x1076   :  { %7833 = vmatpush3.msra.mxu1 %v7252_v17 }
0x1077   :  { %7834 = vmatprep.subr.mxu1 %v7251_v36 }
0x1078   :  { %7835 = vmatpush3.msra.mxu1 %v7251_v36 }
0x1079   :  { %7836 = vmatprep.subr.mxu1 %v7250_v18 }
0x107a   :  { %7837 = vmatpush3.msra.mxu1 %v7250_v18 }
0x107b   :  { %7838 = vmatprep.subr.mxu1 %v7249_v20 }
0x107c   :  { %7839 = vmatpush3.msra.mxu1 %v7249_v20 }
0x107d   :  { %7843 = vmatprep.subr.mxu1 %v8289_v39 }
0x1135   :  { %v7796_v29 = vpop.f32.mrf.mxu1 }
0x1136   :  { %v3451_v37 = vadd.f32 %v7796_v29, %v3372_v35  ;;  %v9013_v29 = vrot.slane %v8882_v30, %v3581_v34 }
0x1137   :  { %v3445_v40 = vpop.f32.mrf.mxu1 }
0x1138   :  { %v3457_v41 = vmul.f32 0.044715, %v3451_v37  ;;  %v3446_v42 = vadd.f32 %v3445_v40, %v3372_v35  ;;  %v3455_v0 = vmul.f32 0.5, %v3451_v37 }
0x113a   :  { %v3459_v45 = vmul.f32 %v3457_v41, %v3451_v37  ;;  %v3456_v46 = vmul.f32 0.044715, %v3446_v42  ;;  %v3454_v27 = vmul.f32 0.5, %v3446_v42 }
0x113c   :  { %v3461_v47 = vmul.f32 %v3459_v45, %v3451_v37  ;;  %v3458_v48 = vmul.f32 %v3456_v46, %v3446_v42 }
0x113e   :  { %v3463_v43 = vadd.f32 %v3461_v47, %v3451_v37  ;;  %v3460_v50 = vmul.f32 %v3458_v48, %v3446_v42  ;;  %v9018_v37 = vld [vmem:[%s9582_s8 + $0x8] sm:$0xff] }
0x113f   :  { %v9022_v45 = vrot.slane %v9018_v37, %v8393_v26  ;;  %v7257_v26 = vld [vmem:[%s9583_s3 + $0x2] ss:$0 sm:$0xff] }
0x1140   :  { %v3462_v44 = vadd.f32 %v3460_v50, %v3446_v42  ;;  %v3465_v51 = vmul.f32 0.7978846, %v3463_v43 }
0x1142   :  { %v3464_v52 = vmul.f32 0.7978846, %v3462_v44  ;;  %8196 = vtanh.f32 %v3465_v51 }
0x1144   :  { %8198 = vtanh.f32 %v3464_v52 }
0x114f   :  { %v8197_v53 = vpop.eup %8196 }
0x1150   :  { %v3469_v55 = vadd.f32 1.0, %v8197_v53 }
0x1151   :  { %v8199_v54 = vpop.eup %8198 }
0x1152   :  { %v3468_v1 = vadd.f32 1.0, %v8199_v54  ;;  %v3471_v57 = vmul.f32 %v3469_v55, %v3455_v0 }
0x1154   :  { %v3470_v56 = vmul.f32 %v3468_v1, %v3454_v27 }
0x1156   :  { %7829 = vmatprep.mubr.f32.mxu0 %v3470_v56 }
0x1157   :  { %7830 = vmatmul.mubr.f32.vlgmr.msra.gmra.mxu0 %v3471_v57 }
0x1158   :  { %7875 = vmatprep.mubr.msk.f32.mxu0 %vm8290_vm1, %v8289_v39 }
0x1217   :  { %v7831_v62 = vpop.f32.mrf.mxu0 }
0x1218   :  { %v3548_v63 = vadd.f32 %v7831_v62, %v3475_v59 }
0x1219   :  { %v3542_v2 = vpop.f32.mrf.mxu0 }
0x121a   :  { %v8983_v3 = vadd.f32 %v3548_v63, %v8888_v32  ;;  %v3543_v4 = vadd.f32 %v3542_v2, %v3475_v59 }
0x121c   :  { %v8986_v5 = vadd.f32 %v3543_v4, %v8891_v38  ;;  %v3556_v6 = vsel %vm47_vm0, %v8983_v3, 0.0 }
0x121d   :  { %3557 = vadd.xlane.f32.xlu0 %v3556_v6 }
0x121e   :  { %v3553_v7 = vsel %vm47_vm0, %v8986_v5, 0.0 }
0x121f   :  { %3554 = vadd.xlane.f32.xlu1 %v3553_v7 }
0x12a6   :  { %v3558_v8 = vpop.xlane.xlu0 %3557 }
0x12a7   :  { %v3560_v10 = vmul.f32 0.03125, %v3558_v8 }
0x12a8   :  { %v3555_v11 = vpop.xlane.xlu1 %3554 }
0x12a9   :  { %v3562_v12 = vsub.f32 %v8983_v3, %v3560_v10  ;;  %v3559_v13 = vmul.f32 0.03125, %v3555_v11 }
0x12ab   :  { %v3561_v32 = vsub.f32 %v8986_v5, %v3559_v13  ;;  %v3564_v14 = vmul.f32 %v3562_v12, %v3562_v12 }
0x12ad   :  { %v3568_v38 = vsel %vm47_vm0, %v3564_v14, 0.0  ;;  %v3563_v15 = vmul.f32 %v3561_v32, %v3561_v32 }
0x12ae   :  { %3569 = vadd.xlane.f32.xlu0 %v3568_v38 }
0x12af   :  { %v3565_v16 = vsel %vm47_vm0, %v3563_v15, 0.0 }
0x12b0   :  { %3566 = vadd.xlane.f32.xlu1 %v3565_v16 }
0x1337   :  { %v3570_v21 = vpop.xlane.xlu0 %3569 }
0x1338   :  { %v3572_v9 = vmul.f32 0.03125, %v3570_v21 }
0x1339   :  { %v3567_v19 = vpop.xlane.xlu1 %3566 }
0x133a   :  { %v3574_v22 = vadd.f32 1e-05, %v3572_v9  ;;  %v3571_v23 = vmul.f32 0.03125, %v3567_v19 }
0x133c   :  { %8200 = vrsqrt.f32 %v3574_v22  ;;  %v3573_v31 = vadd.f32 1e-05, %v3571_v23 }
0x133e   :  { %8202 = vrsqrt.f32 %v3573_v31 }
0x1349   :  { %v8201_v35 = vpop.eup %8200 }
0x134a   :  { %v3578_v40 = vmul.f32 %v8201_v35, %v3562_v12 }
0x134b   :  { %v8203_v41 = vpop.eup %8202 }
0x134c   :  { %v3577_v42 = vmul.f32 %v8203_v41, %v3561_v32  ;;  %v3584_v46 = vmul.f32 %v9013_v29, %v3578_v40 }
0x134e   :  { %v3583_v47 = vmul.f32 %v9013_v29, %v3577_v42  ;;  %v3590_v30 = vadd.f32 %v9022_v45, %v3584_v46 }
0x1350   :  { %v3589_v48 = vadd.f32 %v9022_v45, %v3583_v47 }
0x1352   :  { %7840 = vmatprep.mubr.msk.f32.mxu1 %vm47_vm0, %v3589_v48 }
0x1353   :  { %7841 = vmatmul.mubr.msk.f32.vlgmr.msra.gmra.mxu1 %vm47_vm0, %v3590_v30 }
0x1354   :  { %7845 = vmatprep.mubr.msk.f32.mxu1 %vm8290_vm1, %v8289_v39 }
0x1413   :  { %v7842_v43 = vpop.f32.mrf.mxu1 }
0x1414   :  { %v9035_v50 = vadd.f32 %v7842_v43, %v7257_v26 }
0x1415   :  { %v3678_v44 = vpop.f32.mrf.mxu1 }
0x1416   :  { %v9037_v51 = vadd.f32 %v7257_v26, %v3678_v44 }
0x1418   :  { %3688 = vrot.lane.b32.xlu1 %v9037_v51, %s8291_s28 }
0x141c   :  { %3855 = vrot.lane.b32.xlu1 %v9037_v51, %s8292_s29 }
0x1420   :  { %3853 = vrot.lane.b32.xlu1 %v9037_v51, %s8295_s12 }
0x148a   :  { %v3689_v52 = vpop.permute.xlu1 %3688 }
0x148b   :  { %7844 = vmatpush3.xpose.msk.msra.mxu1 %vm184_vm2, %v3689_v52 }
0x148c   :  { %7848 = vmatprep.subr.mxu1 %v8289_v39 }
0x148e   :  { %7846 = vmatmul.mubr.msk.f32.vlgmr.msra.gmra.mxu1 %vm184_vm2, %v9037_v51  ;;  %v3856_v6 = vpop.permute.xlu1 %3855 }
0x148f   :  { %7850 = vmatprep.mubr.msk.f32.mxu1 %vm8290_vm1, %v8289_v39 }
0x1492   :  { %v3854_v8 = vpop.permute.xlu1 %3853 }
0x154e   :  { %v3760_v53 = vpop.f32.mrf.mxu1 }
0x154f   :  { %v3764_v54 = vmul.f32 0.35355338, %v3760_v53 }
0x1550   :  { %v7847_v55 = vpop.f32.mrf.mxu1 }
0x1551   :  { %v3765_v27 = vsel %vm8455_vm3, %v3764_v54, -1e+30 }
0x1552   :  { %v3766_v1 = vsel %vm184_vm2, %v3765_v27, -inf }
0x1553   :  { %3767 = vmax.xlane.f32.xlu0 %v3766_v1 }
0x15dc   :  { %v3768_v0 = vpop.xlane.xlu0 %3767 }
0x15dd   :  { %v3769_v56 = vsub.f32 %v3765_v27, %v3768_v0 }
0x15df   :  { %v3770_v57 = vmul.f32 1.442695, %v3769_v56 }
0x15e1   :  { %8204 = vpow2.f32 %v3770_v57 }
0x15ee   :  { %v8205_v59 = vpop.eup %8204 }
0x15ef   :  { %v3772_v62 = vsel %vm184_vm2, %v8205_v59, 0.0 }
0x15f0   :  { %3773 = vadd.xlane.f32.xlu0 %v3772_v62 }
0x1606   :  { %3777 = vrot.lane.b32.xlu0 %v9037_v51, %s8298_s15 }
0x1679   :  { %v3774_v63 = vpop.xlane.xlu0 %3773 }
0x167a   :  { %8206 = vrcp.f32 %v3774_v63 }
0x167d   :  { %v3778_v2 = vpop.permute.xlu0 %3777 }
0x167e   :  { %7849 = vmatpush3.msra.mxu1 %v3778_v2 }
0x167f   :  { %7853 = vmatprep.subr.mxu1 %v8289_v39 }
0x1687   :  { %v8207_v4 = vpop.eup %8206 }
0x1688   :  { %v3776_v7 = vmul.f32 %v8207_v4, %v8205_v59 }
0x168a   :  { %7851 = vmatmul.mubr.msk.f32.vlgmr.msra.gmra.mxu1 %vm184_vm2, %v3776_v7 }
0x168b   :  { %7854 = vmatpush3.xpose.msk.msra.mxu1 %vm184_vm2, %v3856_v6  ;;  %7855 = vmatprep.mubr.msk.f32.mxu1 %vm8290_vm1, %v8289_v39 }
0x168c   :  { %7858 = vmatprep.subr.mxu1 %v8289_v39 }
0x168e   :  { %7856 = vmatmul.mubr.msk.f32.vlgmr.msra.gmra.mxu1 %vm184_vm2, %v3854_v8 }
0x168f   :  { %7860 = vmatprep.mubr.msk.f32.mxu1 %vm8290_vm1, %v8289_v39 }
0x174a   :  { %v9066_v10 = vpop.f32.mrf.mxu1 }
0x174c   :  { %v7852_v11 = vpop.f32.mrf.mxu1 }
0x174e   :  { %v3927_v12 = vpop.f32.mrf.mxu1 }
0x174f   :  { %v3931_v13 = vmul.f32 0.35355338, %v3927_v12 }
0x1750   :  { %v7857_v32 = vpop.f32.mrf.mxu1 }
0x1751   :  { %v3932_v14 = vsel %vm8455_vm3, %v3931_v13, -1e+30 }
0x1752   :  { %v3933_v38 = vsel %vm184_vm2, %v3932_v14, -inf }
0x1753   :  { %3934 = vmax.xlane.f32.xlu1 %v3933_v38 }
0x1764   :  { %3944 = vrot.lane.b32.xlu1 %v9037_v51, %s8299_s16 }
0x1768   :  { %4020 = vrot.lane.b32.xlu1 %v9037_v51, %s8296_s13 }
0x176c   :  { %4189 = vrot.lane.b32.xlu1 %v9037_v51, %s8294_s11 }
0x1770   :  { %4187 = vrot.lane.b32.xlu1 %v9037_v51, %s8297_s14 }
0x1774   :  { %4537 = vrot.lane.b32.xlu1 %v9035_v50, %s8292_s29 }
0x1778   :  { %4704 = vrot.lane.b32.xlu1 %v9035_v50, %s8293_s30 }
0x177c   :  { %4871 = vrot.lane.b32.xlu1 %v9035_v50, %s8294_s11 }
0x17dc   :  { %v3935_v15 = vpop.xlane.xlu1 %3934 }
0x17dd   :  { %v3936_v16 = vsub.f32 %v3932_v14, %v3935_v15 }
0x17df   :  { %v3937_v17 = vmul.f32 1.442695, %v3936_v16 }
0x17e0   :  { %v3945_v36 = vpop.permute.xlu1 %3944 }
0x17e1   :  { %8208 = vpow2.f32 %v3937_v17  ;;  %7859 = vmatpush3.msra.mxu1 %v3945_v36 }
0x17e2   :  { %7863 = vmatprep.subr.mxu1 %v8289_v39 }
0x17e4   :  { %v4021_v18 = vpop.permute.xlu1 %4020 }
0x17e8   :  { %v4190_v20 = vpop.permute.xlu1 %4189 }
0x17e9   :  { %7874 = vmatpush3.xpose.msk.msra.mxu0 %vm184_vm2, %v4190_v20 }
0x17ea   :  { %7883 = vmatprep.subr.mxu0 %v8289_v39 }
0x17ec   :  { %v4188_v21 = vpop.permute.xlu1 %4187 }
0x17ed   :  { %7876 = vmatmul.mubr.msk.f32.vlgmr.msra.gmra.mxu0 %vm184_vm2, %v4188_v21 }
0x17ee   :  { %v8209_v9 = vpop.eup %8208  ;;  %7885 = vmatprep.mubr.msk.f32.mxu0 %vm8290_vm1, %v8289_v39 }
0x17ef   :  { %v3939_v19 = vsel %vm184_vm2, %v8209_v9, 0.0 }
0x17f0   :  { %3940 = vadd.xlane.f32.xlu0 %v3939_v19  ;;  %v4538_v31 = vpop.permute.xlu1 %4537 }
0x17f4   :  { %v4705_v42 = vpop.permute.xlu1 %4704 }
0x17f8   :  { %v4872_v48 = vpop.permute.xlu1 %4871 }
0x1806   :  { %4022 = vrot.lane.b32.xlu0 %v9037_v51, %s8293_s30 }
0x180a   :  { %4370 = vrot.lane.b32.xlu0 %v9035_v50, %s8291_s28 }
0x180e   :  { %4535 = vrot.lane.b32.xlu0 %v9035_v50, %s8295_s12 }
0x1812   :  { %4702 = vrot.lane.b32.xlu0 %v9035_v50, %s8296_s13 }
0x1816   :  { %4869 = vrot.lane.b32.xlu0 %v9035_v50, %s8297_s14 }
0x1879   :  { %v3941_v22 = vpop.xlane.xlu0 %3940 }
0x187a   :  { %8210 = vrcp.f32 %v3941_v22 }
0x187d   :  { %v4023_v23 = vpop.permute.xlu0 %4022 }
0x1881   :  { %v4371_v35 = vpop.permute.xlu0 %4370 }
0x1882   :  { %7884 = vmatpush3.xpose.msk.msra.mxu0 %vm184_vm2, %v4371_v35 }
0x1883   :  { %7893 = vmatprep.subr.mxu0 %v8289_v39 }
0x1885   :  { %v4536_v40 = vpop.permute.xlu0 %4535  ;;  %7886 = vmatmul.mubr.msk.f32.vlgmr.msra.gmra.mxu0 %vm184_vm2, %v9035_v50 }
0x1886   :  { %7894 = vmatpush3.xpose.msk.msra.mxu0 %vm184_vm2, %v4538_v31  ;;  %7895 = vmatprep.mubr.msk.f32.mxu0 %vm8290_vm1, %v8289_v39 }
0x1887   :  { %v8211_v41 = vpop.eup %8210  ;;  %7903 = vmatprep.subr.mxu0 %v8289_v39 }
0x1888   :  { %v3943_v46 = vmul.f32 %v8211_v41, %v8209_v9 }
0x1889   :  { %7896 = vmatmul.mubr.msk.f32.vlgmr.msra.gmra.mxu0 %vm184_vm2, %v4536_v40  ;;  %v4703_v47 = vpop.permute.xlu0 %4702 }
0x188a   :  { %7861 = vmatmul.mubr.msk.f32.vlgmr.msra.gmra.mxu1 %vm184_vm2, %v3943_v46  ;;  %7904 = vmatpush3.xpose.msk.msra.mxu0 %vm184_vm2, %v4705_v42 }
0x188b   :  { %7864 = vmatpush3.xpose.msk.msra.mxu1 %vm184_vm2, %v4023_v23  ;;  %7905 = vmatprep.mubr.msk.f32.mxu0 %vm8290_vm1, %v8289_v39 }
0x188c   :  { %7865 = vmatprep.mubr.msk.f32.mxu1 %vm8290_vm1, %v8289_v39  ;;  %7913 = vmatprep.subr.mxu0 %v8289_v39 }
0x188d   :  { %7906 = vmatmul.mubr.msk.f32.vlgmr.msra.gmra.mxu0 %vm184_vm2, %v4703_v47  ;;  %7868 = vmatprep.subr.mxu1 %v8289_v39  ;;  %v4870_v30 = vpop.permute.xlu0 %4869 }
0x188e   :  { %7866 = vmatmul.mubr.msk.f32.vlgmr.msra.gmra.mxu1 %vm184_vm2, %v4021_v18  ;;  %7914 = vmatpush3.xpose.msk.msra.mxu0 %vm184_vm2, %v4872_v48 }
0x188f   :  { %7915 = vmatprep.mubr.msk.f32.mxu0 %vm8290_vm1, %v8289_v39  ;;  %7870 = vmatprep.mubr.msk.f32.mxu1 %vm8290_vm1, %v8289_v39 }
0x1891   :  { %7916 = vmatmul.mubr.msk.f32.vlgmr.msra.gmra.mxu0 %vm184_vm2, %v4870_v30 }
0x18ad   :  { %v4261_v26 = vpop.f32.mrf.mxu0 }
0x18ae   :  { %v4265_v43 = vmul.f32 0.35355338, %v4261_v26 }
0x18af   :  { %v7877_v44 = vpop.f32.mrf.mxu0 }
0x18b0   :  { %v4266_v52 = vsel %vm8455_vm3, %v4265_v43, -1e+30 }
0x18b1   :  { %v4267_v53 = vsel %vm184_vm2, %v4266_v52, -inf }
0x18b2   :  { %4268 = vmax.xlane.f32.xlu0 %v4267_v53 }
0x193b   :  { %v4269_v54 = vpop.xlane.xlu0 %4268 }
0x193c   :  { %v4270_v55 = vsub.f32 %v4266_v52, %v4269_v54 }
0x193e   :  { %v4271_v27 = vmul.f32 1.442695, %v4270_v55 }
0x1940   :  { %8212 = vpow2.f32 %v4271_v27 }
0x1945   :  { %v4442_v1 = vpop.f32.mrf.mxu0 }
0x1946   :  { %v4446_v0 = vmul.f32 0.35355338, %v4442_v1 }
0x1947   :  { %v7887_v56 = vpop.f32.mrf.mxu0 }
0x1948   :  { %v4447_v57 = vsel %vm8455_vm3, %v4446_v0, -1e+30 }
0x1949   :  { %v4609_v59 = vpop.f32.mrf.mxu0  ;;  %v4448_v62 = vsel %vm184_vm2, %v4447_v57, -inf }
0x194a   :  { %v4613_v63 = vmul.f32 0.35355338, %v4609_v59  ;;  %4449 = vmax.xlane.f32.xlu0 %v4448_v62  ;;  %v9134_v2 = vpop.f32.mrf.mxu1 }
0x194b   :  { %v7897_v4 = vpop.f32.mrf.mxu0 }
0x194c   :  { %v4614_v6 = vsel %vm8455_vm3, %v4613_v63, -1e+30  ;;  %v7862_v7 = vpop.f32.mrf.mxu1 }
0x194d   :  { %v4776_v8 = vpop.f32.mrf.mxu0  ;;  %v4615_v11 = vsel %vm184_vm2, %v4614_v6, -inf  ;;  %v9147_v19 = vpop.eup %8212 }
0x194e   :  { %4616 = vmax.xlane.f32.xlu0 %v4615_v11  ;;  %v4094_v12 = vpop.f32.mrf.mxu1  ;;  %v4780_v13 = vmul.f32 0.35355338, %v4776_v8  ;;  %v4273_v23 = vsel %vm184_vm2, %v9147_v19, 0.0 }
0x194f   :  { %v4098_v32 = vmul.f32 0.35355338, %v4094_v12  ;;  %v7907_v14 = vpop.f32.mrf.mxu0 }
0x1950   :  { %v7867_v38 = vpop.f32.mrf.mxu1  ;;  %v4781_v18 = vsel %vm8455_vm3, %v4780_v13, -1e+30 }
0x1951   :  { %v4099_v15 = vsel %vm8455_vm3, %v4098_v32, -1e+30  ;;  %v4943_v16 = vpop.f32.mrf.mxu0  ;;  %v4782_v22 = vsel %vm184_vm2, %v4781_v18, -inf }
0x1952   :  { %v4947_v17 = vmul.f32 0.35355338, %v4943_v16  ;;  %v4100_v36 = vsel %vm184_vm2, %v4099_v15, -inf }
0x1953   :  { %v7917_v20 = vpop.f32.mrf.mxu0  ;;  %4101 = vmax.xlane.f32.xlu1 %v4100_v36 }
0x1954   :  { %v4948_v21 = vsel %vm8455_vm3, %v4947_v17, -1e+30 }
0x1955   :  { %v4949_v9 = vsel %vm184_vm2, %v4948_v21, -inf }
0x1956   :  { %4950 = vmax.xlane.f32.xlu0 %v4949_v9 }
0x1957   :  { %4783 = vmax.xlane.f32.xlu1 %v4782_v22 }
0x195a   :  { %4274 = vadd.xlane.f32.xlu0 %v4273_v23 }
0x19d3   :  { %v4450_v31 = vpop.xlane.xlu0 %4449 }
0x19d4   :  { %v4451_v35 = vsub.f32 %v4447_v57, %v4450_v31 }
0x19d6   :  { %v4452_v40 = vmul.f32 1.442695, %v4451_v35 }
0x19d7   :  { %v4617_v41 = vpop.xlane.xlu0 %4616 }
0x19d8   :  { %8214 = vpow2.f32 %v4452_v40  ;;  %v4618_v42 = vsub.f32 %v4614_v6, %v4617_v41  ;;  %v7256_v40 = vld [vmem:[%s9584_s4 + $0x58] sm:$0xff]  ;;  %v7255_v41 = vld [vmem:[%s9584_s4 + $0x50] sm:$0xff] }
0x19d9   :  { %7923 = vmatprep.subr.mxu0 %v7256_v40 }
0x19da   :  { %v4619_v46 = vmul.f32 1.442695, %v4618_v42  ;;  %7924 = vmatpush3.msra.mxu0 %v7256_v40 }
0x19db   :  { %7925 = vmatprep.subr.mxu0 %v7255_v41 }
0x19dc   :  { %8216 = vpow2.f32 %v4619_v46  ;;  %v4102_v47 = vpop.xlane.xlu1 %4101  ;;  %7926 = vmatpush3.msra.mxu0 %v7255_v41 }
0x19dd   :  { %v4103_v59 = vsub.f32 %v4099_v15, %v4102_v47  ;;  %v7254_v47 = vld [vmem:[%s9584_s4 + $0x48] sm:$0xff] }
0x19de   :  { %7927 = vmatprep.subr.mxu0 %v7254_v47 }
0x19df   :  { %v4951_v48 = vpop.xlane.xlu0 %4950  ;;  %v4104_v62 = vmul.f32 1.442695, %v4103_v59  ;;  %7928 = vmatpush3.msra.mxu0 %v7254_v47 }
0x19e0   :  { %v4952_v30 = vsub.f32 %v4948_v21, %v4951_v48  ;;  %v4784_v26 = vpop.xlane.xlu1 %4783  ;;  %v7253_v48 = vld [vmem:[%s9584_s4 + $0x40] sm:$0xff] }
0x19e1   :  { %v4785_v43 = vsub.f32 %v4781_v18, %v4784_v26  ;;  %7929 = vmatprep.subr.mxu0 %v7253_v48 }
0x19e2   :  { %v4953_v44 = vmul.f32 1.442695, %v4952_v30  ;;  %7930 = vmatpush3.msra.mxu0 %v7253_v48 }
0x19e3   :  { %v4786_v52 = vmul.f32 1.442695, %v4785_v43  ;;  %v4275_v8 = vpop.xlane.xlu0 %4274 }
0x19e4   :  { %8218 = vpow2.f32 %v4953_v44 }
0x19e5   :  { %v8215_v53 = vpop.eup %8214  ;;  %8220 = vpow2.f32 %v4786_v52 }
0x19e6   :  { %v4454_v54 = vsel %vm184_vm2, %v8215_v53, 0.0  ;;  %8222 = vpow2.f32 %v4104_v62 }
0x19e7   :  { %4455 = vadd.xlane.f32.xlu1 %v4454_v54 }
0x19e9   :  { %v8217_v55 = vpop.eup %8216 }
0x19ea   :  { %v4621_v27 = vsel %vm184_vm2, %v8217_v55, 0.0 }
0x19eb   :  { %4622 = vadd.xlane.f32.xlu0 %v4621_v27 }
0x19f1   :  { %v9154_v1 = vpop.eup %8218 }
0x19f2   :  { %v8221_v0 = vpop.eup %8220  ;;  %v4955_v56 = vsel %vm184_vm2, %v9154_v1, 0.0 }
0x19f3   :  { %4956 = vadd.xlane.f32.xlu0 %v4955_v56  ;;  %v4788_v57 = vsel %vm184_vm2, %v8221_v0, 0.0  ;;  %v8223_v63 = vpop.eup %8222 }
0x19f4   :  { %4789 = vadd.xlane.f32.xlu1 %v4788_v57  ;;  %v4106_v4 = vsel %vm184_vm2, %v8223_v63, 0.0 }
0x1a05   :  { %4111 = vrot.lane.b32.xlu1 %v9037_v51, %s8301_s17 }
0x1a09   :  { %4278 = vrot.lane.b32.xlu0 %v9037_v51, %s9595_s0 }
0x1a0d   :  { %4960 = vrot.lane.b32.xlu0 %v9035_v50, %s9595_s0 }
0x1a29   :  { %4107 = vadd.xlane.f32.xlu1 %v4106_v4 }
0x1a3a   :  { %4459 = vrot.lane.b32.xlu1 %v9035_v50, %s8298_s15 }
0x1a3e   :  { %4626 = vrot.lane.b32.xlu1 %v9035_v50, %s8299_s16 }
0x1a42   :  { %4793 = vrot.lane.b32.xlu1 %v9035_v50, %s8301_s17 }
0x1a46   :  { %4355 = vrot.lane.b32.xlu1 %v9134_v2, %s8302_s18 }
0x1a70   :  { %v4456_v51 = vpop.xlane.xlu1 %4455 }
0x1a74   :  { %v4623_v12 = vpop.xlane.xlu0 %4622 }
0x1a7c   :  { %v4957_v13 = vpop.xlane.xlu0 %4956 }
0x1a7d   :  { %v4790_v6 = vpop.xlane.xlu1 %4789 }
0x1a80   :  { %v4279_v38 = vpop.permute.xlu0 %4278 }
0x1a81   :  { %v4112_v7 = vpop.permute.xlu1 %4111 }
0x1a82   :  { %7869 = vmatpush3.msra.mxu1 %v4112_v7 }
0x1a83   :  { %7878 = vmatprep.subr.mxu1 %v8289_v39 }
0x1a84   :  { %v4961_v23 = vpop.permute.xlu0 %4960 }
0x1ab2   :  { %v4108_v11 = vpop.xlane.xlu1 %4107 }
0x1ab3   :  { %8224 = vrcp.f32 %v4108_v11  ;;  %v5054_v11 = vrot.slane %v9018_v37, %v3345_v61  ;;  %v7289_v61 = vld [vmem:[%s9581_s2 + $0x78] sm:$0xff]  ;;  %v7286_v37 = vld [vmem:[%s9581_s2 + $0x60] sm:$0xff] }
0x1ab4   :  { %8226 = vrcp.f32 %v4275_v8 }
0x1ab5   :  { %8228 = vrcp.f32 %v4456_v51 }
0x1ab6   :  { %8230 = vrcp.f32 %v4623_v12  ;;  %v4460_v2 = vpop.permute.xlu1 %4459 }
0x1ab7   :  { %8232 = vrcp.f32 %v4790_v6 }
0x1ab8   :  { %8234 = vrcp.f32 %v4957_v13 }
0x1aba   :  { %v4627_v17 = vpop.permute.xlu1 %4626 }
0x1abe   :  { %v4794_v9 = vpop.permute.xlu1 %4793 }
0x1ac0   :  { %v8225_v32 = vpop.eup %8224 }
0x1ac1   :  { %v4110_v50 = vmul.f32 %v8225_v32, %v8223_v63  ;;  %v8227_v14 = vpop.eup %8226 }
0x1ac2   :  { %v4277_v15 = vmul.f32 %v8227_v14, %v9147_v19  ;;  %v8229_v16 = vpop.eup %8228 }
0x1ac3   :  { %7871 = vmatmul.mubr.msk.f32.vlgmr.msra.gmra.mxu1 %vm184_vm2, %v4110_v50  ;;  %v4458_v36 = vmul.f32 %v8229_v16, %v8215_v53  ;;  %v8231_v18 = vpop.eup %8230 }
0x1ac4   :  { %7879 = vmatpush3.msra.mxu1 %v4279_v38  ;;  %7880 = vmatprep.mubr.msk.f32.mxu1 %vm8290_vm1, %v8289_v39  ;;  %v4625_v20 = vmul.f32 %v8231_v18, %v8217_v55  ;;  %v8233_v21 = vpop.eup %8232 }
0x1ac5   :  { %7888 = vmatprep.subr.mxu1 %v8289_v39  ;;  %v4792_v19 = vmul.f32 %v8233_v21, %v8221_v0  ;;  %v8235_v22 = vpop.eup %8234 }
0x1ac6   :  { %v4959_v31 = vmul.f32 %v8235_v22, %v9154_v1  ;;  %v4356_v1 = vpop.permute.xlu1 %4355 }
0x1ac7   :  { %7881 = vmatmul.mubr.msk.f32.vlgmr.msra.gmra.mxu1 %vm184_vm2, %v4277_v15  ;;  %v4366_v56 = vsel %vm184_vm2, %v9066_v10, %v4356_v1  ;;  %v8285_v10 = vld [vmem:[%s9585_s1] sm:$0xff] }
0x1ac8   :  { %7889 = vmatpush3.msra.mxu1 %v4460_v2  ;;  %7890 = vmatprep.mubr.msk.f32.mxu1 %vm8290_vm1, %v8289_v39 }
0x1ac9   :  { %7898 = vmatprep.subr.mxu1 %v8289_v39 }
0x1acb   :  { %7891 = vmatmul.mubr.msk.f32.vlgmr.msra.gmra.mxu1 %vm184_vm2, %v4458_v36 }
0x1acc   :  { %7899 = vmatpush3.msra.mxu1 %v4627_v17  ;;  %7900 = vmatprep.mubr.msk.f32.mxu1 %vm8290_vm1, %v8289_v39 }
0x1acd   :  { %7908 = vmatprep.subr.mxu1 %v8289_v39 }
0x1acf   :  { %7901 = vmatmul.mubr.msk.f32.vlgmr.msra.gmra.mxu1 %vm184_vm2, %v4625_v20 }
0x1ad0   :  { %7909 = vmatpush3.msra.mxu1 %v4794_v9  ;;  %7910 = vmatprep.mubr.msk.f32.mxu1 %vm8290_vm1, %v8289_v39 }
0x1ad1   :  { %7918 = vmatprep.subr.mxu1 %v8289_v39 }
0x1ad3   :  { %7911 = vmatmul.mubr.msk.f32.vlgmr.msra.gmra.mxu1 %vm184_vm2, %v4792_v19 }
0x1ad4   :  { %7919 = vmatpush3.msra.mxu1 %v4961_v23  ;;  %7920 = vmatprep.mubr.msk.f32.mxu1 %vm8290_vm1, %v8289_v39 }
0x1ad5   :  { %7934 = vmatprep.subr.mxu1 %v7289_v61 }
0x1ad7   :  { %7921 = vmatmul.mubr.msk.f32.vlgmr.msra.gmra.mxu1 %vm184_vm2, %v4959_v31 }
0x1ad8   :  { %7935 = vmatpush3.msra.mxu1 %v7289_v61 }
0x1b83   :  { %v4183_v35 = vpop.f32.mrf.mxu1 }
0x1b84   :  { %4359 = vrot.lane.b32.xlu0 %v4183_v35, %s8303_s19  ;;  %v7294_v35 = vld [vmem:[%s9583_s3 + $0x3] ss:$0 sm:$0xff] }
0x1b85   :  { %v7872_v42 = vpop.f32.mrf.mxu1 }
0x1b87   :  { %v4350_v46 = vpop.f32.mrf.mxu1 }
0x1b88   :  { %4363 = vrot.lane.b32.xlu0 %v4350_v46, %s8304_s26 }
0x1b89   :  { %v7882_v30 = vpop.f32.mrf.mxu1 }
0x1b8b   :  { %v4531_v26 = vpop.f32.mrf.mxu1 }
0x1b8d   :  { %v7892_v43 = vpop.f32.mrf.mxu1 }
0x1b8f   :  { %v4698_v44 = vpop.f32.mrf.mxu1 }
0x1b90   :  { %5037 = vrot.lane.b32.xlu1 %v4698_v44, %s8302_s18  ;;  %v8286_v44 = vld [vmem:[%s9585_s1 + $0x8] sm:$0xff] }
0x1b91   :  { %v7902_v52 = vpop.f32.mrf.mxu1 }
0x1b93   :  { %v4865_v53 = vpop.f32.mrf.mxu1 }
0x1b94   :  { %5041 = vrot.lane.b32.xlu1 %v4865_v53, %s8303_s19 }
0x1b95   :  { %v7912_v54 = vpop.f32.mrf.mxu1 }
0x1b97   :  { %v5032_v55 = vpop.f32.mrf.mxu1 }
0x1b98   :  { %5045 = vrot.lane.b32.xlu0 %v5032_v55, %s8304_s26 }
0x1b99   :  { %v7922_v27 = vpop.f32.mrf.mxu1 }
0x1bf6   :  { %v4360_v0 = vpop.permute.xlu0 %4359 }
0x1bf7   :  { %v4367_v57 = vsel %vm862_vm4, %v4366_v56, %v4360_v0 }
0x1bfa   :  { %v4364_v59 = vpop.permute.xlu0 %4363 }
0x1bfb   :  { %v4368_v62 = vsel %vm864_vm5, %v4367_v57, %v4364_v59 }
0x1bfc   :  { %7931 = vmatprep.mubr.msk.f32.mxu0 %vm47_vm0, %v4368_v62 }
0x1c02   :  { %v5038_v63 = vpop.permute.xlu1 %5037 }
0x1c03   :  { %v5048_v51 = vsel %vm184_vm2, %v4531_v26, %v5038_v63 }
0x1c06   :  { %v5042_v4 = vpop.permute.xlu1 %5041 }
0x1c07   :  { %v5049_v6 = vsel %vm862_vm4, %v5048_v51, %v5042_v4 }
0x1c0a   :  { %v5046_v7 = vpop.permute.xlu0 %5045 }
0x1c0b   :  { %v5050_v8 = vsel %vm864_vm5, %v5049_v6, %v5046_v7 }
0x1c0c   :  { %7932 = vmatmul.mubr.msk.f32.vlgmr.msra.gmra.mxu0 %vm47_vm0, %v5050_v8 }
0x1c0d   :  { %7953 = vmatprep.mubr.msk.f32.mxu0 %vm47_vm0, %v8285_v10 }
0x1ccc   :  { %v7933_v12 = vpop.f32.mrf.mxu0 }
0x1ccd   :  { %v5133_v13 = vadd.f32 %v7933_v12, %v5054_v11 }
0x1cce   :  { %v5127_v32 = vpop.f32.mrf.mxu0 }
0x1ccf   :  { %v9231_v50 = vadd.f32 %v5133_v13, %v8983_v3  ;;  %v5128_v14 = vadd.f32 %v5127_v32, %v5054_v11  ;;  %v7287_v3 = vld [vmem:[%s9581_s2 + $0x68] sm:$0xff] }
0x1cd1   :  { %v9234_v38 = vadd.f32 %v5128_v14, %v8986_v5  ;;  %v5141_v2 = vsel %vm47_vm0, %v9231_v50, 0.0  ;;  %v7288_v5 = vld [vmem:[%s9581_s2 + $0x70] sm:$0xff] }
0x1cd2   :  { %5142 = vadd.xlane.f32.xlu0 %v5141_v2  ;;  %7936 = vmatprep.subr.mxu1 %v7288_v5 }
0x1cd3   :  { %v5138_v15 = vsel %vm47_vm0, %v9234_v38, 0.0  ;;  %7937 = vmatpush3.msra.mxu1 %v7288_v5 }
0x1cd4   :  { %5139 = vadd.xlane.f32.xlu1 %v5138_v15  ;;  %7938 = vmatprep.subr.mxu1 %v7287_v3 }
0x1cd5   :  { %7939 = vmatpush3.msra.mxu1 %v7287_v3 }
0x1cd6   :  { %7940 = vmatprep.subr.mxu1 %v7286_v37 }
0x1cd7   :  { %7941 = vmatpush3.msra.mxu1 %v7286_v37 }
0x1cd8   :  { %7956 = vmatprep.subr.mxu1 %v8289_v39 }
0x1ce5   :  { %5274 = vrot.lane.b32.xlu1 %v7289_v61, %s8291_s28 }
0x1ce9   :  { %5270 = vrot.lane.b32.xlu1 %v7287_v3, %s8291_s28 }
0x1ced   :  { %5268 = vrot.lane.b32.xlu1 %v7286_v37, %s8291_s28 }
0x1cf1   :  { %5281 = vrot.lane.b32.xlu1 %v7294_v35, %s8291_s28 }
0x1d5b   :  { %v5143_v16 = vpop.xlane.xlu0 %5142 }
0x1d5c   :  { %v5145_v17 = vmul.f32 0.03125, %v5143_v16 }
0x1d5d   :  { %v5140_v36 = vpop.xlane.xlu1 %5139 }
0x1d5e   :  { %v5147_v18 = vsub.f32 %v9231_v50, %v5145_v17  ;;  %v5144_v20 = vmul.f32 0.03125, %v5140_v36 }
0x1d60   :  { %v5146_v21 = vsub.f32 %v9234_v38, %v5144_v20  ;;  %v5149_v9 = vmul.f32 %v5147_v18, %v5147_v18 }
0x1d61   :  { %v5275_v31 = vpop.permute.xlu1 %5274 }
0x1d62   :  { %v5153_v19 = vsel %vm47_vm0, %v5149_v9, 0.0  ;;  %v5148_v22 = vmul.f32 %v5146_v21, %v5146_v21  ;;  %7945 = vmatprep.subr.mxu0 %v5275_v31 }
0x1d63   :  { %5154 = vadd.xlane.f32.xlu0 %v5153_v19  ;;  %7946 = vmatpush3.msra.mxu0 %v5275_v31 }
0x1d64   :  { %v5150_v23 = vsel %vm47_vm0, %v5148_v22, 0.0 }
0x1d65   :  { %v5271_v47 = vpop.permute.xlu1 %5270 }
0x1d67   :  { %5151 = vadd.xlane.f32.xlu0 %v5150_v23 }
0x1d69   :  { %v5269_v43 = vpop.permute.xlu1 %5268 }
0x1d6d   :  { %v5282_v59 = vpop.permute.xlu1 %5281 }
0x1d7d   :  { %5272 = vrot.lane.b32.xlu0 %v7288_v5, %s8291_s28 }
0x1dec   :  { %v5155_v40 = vpop.xlane.xlu0 %5154 }
0x1ded   :  { %v5157_v41 = vmul.f32 0.03125, %v5155_v40 }
0x1def   :  { %v5159_v42 = vadd.f32 1e-05, %v5157_v41 }
0x1df0   :  { %v5152_v46 = vpop.xlane.xlu0 %5151 }
0x1df1   :  { %8236 = vrsqrt.f32 %v5159_v42  ;;  %v5156_v48 = vmul.f32 0.03125, %v5152_v46 }
0x1df3   :  { %v5158_v30 = vadd.f32 1e-05, %v5156_v48 }
0x1df4   :  { %v5273_v26 = vpop.permute.xlu0 %5272 }
0x1df5   :  { %8238 = vrsqrt.f32 %v5158_v30  ;;  %7947 = vmatprep.subr.mxu0 %v5273_v26 }
0x1df6   :  { %7948 = vmatpush3.msra.mxu0 %v5273_v26 }
0x1df7   :  { %7949 = vmatprep.subr.mxu0 %v5271_v47 }
0x1df8   :  { %7950 = vmatpush3.msra.mxu0 %v5271_v47 }
0x1df9   :  { %7951 = vmatprep.subr.mxu0 %v5269_v43 }
0x1dfa   :  { %7952 = vmatpush3.msra.mxu0 %v5269_v43 }
0x1dfb   :  { %7954 = vmatmul.mubr.msk.f32.vlgmr.msra.gmra.mxu0 %vm47_vm0, %v8286_v44  ;;  %7966 = vmatprep.subr.mxu0 %v8289_v39 }
0x1dfc   :  { %7968 = vmatprep.mubr.msk.f32.mxu0 %vm8290_vm1, %v8289_v39 }
0x1dfe   :  { %v8237_v52 = vpop.eup %8236 }
0x1dff   :  { %v5163_v53 = vmul.f32 %v8237_v52, %v5147_v18 }
0x1e01   :  { %v5165_v27 = vmul.f32 %v5163_v53, %v9013_v29 }
0x1e02   :  { %v8239_v54 = vpop.eup %8238 }
0x1e03   :  { %v5162_v55 = vmul.f32 %v8239_v54, %v5146_v21  ;;  %v5167_v56 = vadd.f32 %v5165_v27, %v9022_v45 }
0x1e05   :  { %v5164_v1 = vmul.f32 %v5162_v55, %v9013_v29 }
0x1e07   :  { %v5166_v0 = vadd.f32 %v5164_v1, %v9022_v45 }
0x1e09   :  { %7942 = vmatprep.mubr.msk.f32.mxu1 %vm47_vm0, %v5166_v0 }
0x1e0a   :  { %7943 = vmatmul.mubr.msk.f32.vlgmr.msra.gmra.mxu1 %vm47_vm0, %v5167_v56 }
0x1e0b   :  { %7958 = vmatprep.mubr.msk.f32.mxu1 %vm8290_vm1, %v8289_v39 }
0x1ebb   :  { %v7955_v57 = vpop.f32.mrf.mxu0 }
0x1ebc   :  { %v9291_v29 = vadd.f32 %v7955_v57, %v5282_v59 }
0x1ebd   :  { %v5350_v62 = vpop.f32.mrf.mxu0 }
0x1ebe   :  { %v9280_v63 = vadd.f32 %v5350_v62, %v5282_v59 }
0x1ec0   :  { %5526 = vrot.lane.b32.xlu0 %v9280_v63, %s8295_s12  ;;  %7957 = vmatpush3.xpose.msk.msra.mxu1 %vm184_vm2, %v9280_v63 }
0x1ec1   :  { %7961 = vmatprep.subr.mxu1 %v8289_v39 }
0x1ec4   :  { %5693 = vrot.lane.b32.xlu0 %v9280_v63, %s8296_s13 }
0x1ec8   :  { %5860 = vrot.lane.b32.xlu0 %v9280_v63, %s8297_s14 }
0x1eca   :  { %v7944_v45 = vpop.f32.mrf.mxu1 }
0x1ecb   :  { %v5261_v6 = vadd.f32 %v7944_v45, %v7294_v35 }
0x1ecc   :  { %6207 = vrot.lane.b32.xlu0 %v9291_v29, %s8295_s12  ;;  %v5255_v4 = vpop.f32.mrf.mxu1 }
0x1ecd   :  { %v5256_v51 = vadd.f32 %v7294_v35, %v5255_v4 }
0x1ecf   :  { %5524 = vrot.lane.b32.xlu1 %v5256_v51, %s8295_s12  ;;  %7959 = vmatmul.mubr.msk.f32.vlgmr.msra.gmra.mxu1 %vm184_vm2, %v5256_v51 }
0x1ed0   :  { %6374 = vrot.lane.b32.xlu0 %v9291_v29, %s8296_s13  ;;  %7963 = vmatprep.mubr.msk.f32.mxu1 %vm8290_vm1, %v8289_v39 }
0x1ed3   :  { %5691 = vrot.lane.b32.xlu1 %v5256_v51, %s8296_s13 }
0x1ed4   :  { %6541 = vrot.lane.b32.xlu0 %v9291_v29, %s8297_s14 }
0x1ed7   :  { %5858 = vrot.lane.b32.xlu1 %v5256_v51, %s8297_s14 }
0x1edb   :  { %6205 = vrot.lane.b32.xlu1 %v5261_v6, %s8295_s12 }
0x1edf   :  { %6372 = vrot.lane.b32.xlu1 %v5261_v6, %s8296_s13 }
0x1ee3   :  { %6539 = vrot.lane.b32.xlu1 %v5261_v6, %s8297_s14 }
0x1f32   :  { %v5527_v7 = vpop.permute.xlu0 %5526 }
0x1f33   :  { %7967 = vmatpush3.xpose.msk.msra.mxu0 %vm184_vm2, %v5527_v7 }
0x1f34   :  { %7976 = vmatprep.subr.mxu0 %v8289_v39 }
0x1f36   :  { %v5694_v8 = vpop.permute.xlu0 %5693 }
0x1f3a   :  { %v5861_v11 = vpop.permute.xlu0 %5860 }
0x1f3e   :  { %v6208_v32 = vpop.permute.xlu0 %6207 }
0x1f41   :  { %v5525_v10 = vpop.permute.xlu1 %5524 }
0x1f42   :  { %7969 = vmatmul.mubr.msk.f32.vlgmr.msra.gmra.mxu0 %vm184_vm2, %v5525_v10  ;;  %v6375_v2 = vpop.permute.xlu0 %6374 }
0x1f43   :  { %7977 = vmatpush3.xpose.msk.msra.mxu0 %vm184_vm2, %v5694_v8  ;;  %7978 = vmatprep.mubr.msk.f32.mxu0 %vm8290_vm1, %v8289_v39 }
0x1f44   :  { %7986 = vmatprep.subr.mxu0 %v8289_v39 }
0x1f45   :  { %v5692_v12 = vpop.permute.xlu1 %5691 }
0x1f46   :  { %7979 = vmatmul.mubr.msk.f32.vlgmr.msra.gmra.mxu0 %vm184_vm2, %v5692_v12  ;;  %v6542_v61 = vpop.permute.xlu0 %6541 }
0x1f47   :  { %7987 = vmatpush3.xpose.msk.msra.mxu0 %vm184_vm2, %v5861_v11  ;;  %7988 = vmatprep.mubr.msk.f32.mxu0 %vm8290_vm1, %v8289_v39 }
0x1f48   :  { %7996 = vmatprep.subr.mxu0 %v8289_v39 }
0x1f49   :  { %v5859_v13 = vpop.permute.xlu1 %5858 }
0x1f4a   :  { %7989 = vmatmul.mubr.msk.f32.vlgmr.msra.gmra.mxu0 %vm184_vm2, %v5859_v13 }
0x1f4b   :  { %7997 = vmatpush3.xpose.msk.msra.mxu0 %vm184_vm2, %v9291_v29  ;;  %7998 = vmatprep.mubr.msk.f32.mxu0 %vm8290_vm1, %v8289_v39 }
0x1f4c   :  { %8006 = vmatprep.subr.mxu0 %v8289_v39 }
0x1f4d   :  { %v6206_v14 = vpop.permute.xlu1 %6205 }
0x1f4e   :  { %7999 = vmatmul.mubr.msk.f32.vlgmr.msra.gmra.mxu0 %vm184_vm2, %v5261_v6 }
0x1f4f   :  { %8007 = vmatpush3.xpose.msk.msra.mxu0 %vm184_vm2, %v6208_v32  ;;  %8008 = vmatprep.mubr.msk.f32.mxu0 %vm8290_vm1, %v8289_v39 }
0x1f50   :  { %8016 = vmatprep.subr.mxu0 %v8289_v39 }
0x1f51   :  { %v6373_v15 = vpop.permute.xlu1 %6372 }
0x1f52   :  { %8009 = vmatmul.mubr.msk.f32.vlgmr.msra.gmra.mxu0 %vm184_vm2, %v6206_v14 }
0x1f53   :  { %8017 = vmatpush3.xpose.msk.msra.mxu0 %vm184_vm2, %v6375_v2  ;;  %8018 = vmatprep.mubr.msk.f32.mxu0 %vm8290_vm1, %v8289_v39 }
0x1f54   :  { %8026 = vmatprep.subr.mxu0 %v8289_v39 }
0x1f55   :  { %v6540_v3 = vpop.permute.xlu1 %6539 }
0x1f56   :  { %8019 = vmatmul.mubr.msk.f32.vlgmr.msra.gmra.mxu0 %vm184_vm2, %v6373_v15 }
0x1f57   :  { %8027 = vmatpush3.xpose.msk.msra.mxu0 %vm184_vm2, %v6542_v61  ;;  %8028 = vmatprep.mubr.msk.f32.mxu0 %vm8290_vm1, %v8289_v39 }
0x1f5a   :  { %8029 = vmatmul.mubr.msk.f32.vlgmr.msra.gmra.mxu0 %vm184_vm2, %v6540_v3 }
0x1f8f   :  { %v5431_v5 = vpop.f32.mrf.mxu1 }
0x1f90   :  { %v5435_v37 = vmul.f32 0.35355338, %v5431_v5 }
0x1f91   :  { %v7960_v16 = vpop.f32.mrf.mxu1 }
0x1f92   :  { %v5436_v17 = vsel %vm8455_vm3, %v5435_v37, -1e+30 }
0x1f93   :  { %v5437_v36 = vsel %vm184_vm2, %v5436_v17, -inf }
0x1f94   :  { %5438 = vmax.xlane.f32.xlu0 %v5437_v36 }
0x2002   :  { %v5598_v18 = vpop.f32.mrf.mxu0 }
0x2003   :  { %v5602_v20 = vmul.f32 0.35355338, %v5598_v18 }
0x2004   :  { %v7970_v21 = vpop.f32.mrf.mxu0 }
0x2005   :  { %v5603_v9 = vsel %vm8455_vm3, %v5602_v20, -1e+30 }
0x2006   :  { %v5765_v19 = vpop.f32.mrf.mxu0  ;;  %v5604_v22 = vsel %vm184_vm2, %v5603_v9, -inf }
0x2007   :  { %v5769_v23 = vmul.f32 0.35355338, %v5765_v19  ;;  %5605 = vmax.xlane.f32.xlu1 %v5604_v22 }
0x2008   :  { %v7980_v31 = vpop.f32.mrf.mxu0 }
0x2009   :  { %v5770_v35 = vsel %vm8455_vm3, %v5769_v23, -1e+30 }
0x200a   :  { %v5932_v40 = vpop.f32.mrf.mxu0  ;;  %v5771_v41 = vsel %vm184_vm2, %v5770_v35, -inf }
0x200b   :  { %v5936_v42 = vmul.f32 0.35355338, %v5932_v40  ;;  %5772 = vmax.xlane.f32.xlu0 %v5771_v41 }
0x200c   :  { %v7990_v46 = vpop.f32.mrf.mxu0 }
0x200d   :  { %v5937_v47 = vsel %vm8455_vm3, %v5936_v42, -1e+30 }
0x200e   :  { %v6112_v48 = vpop.f32.mrf.mxu0  ;;  %v5938_v30 = vsel %vm184_vm2, %v5937_v47, -inf }
0x200f   :  { %v6116_v26 = vmul.f32 0.35355338, %v6112_v48  ;;  %5939 = vmax.xlane.f32.xlu0 %v5938_v30 }
0x2010   :  { %v8000_v43 = vpop.f32.mrf.mxu0 }
0x2011   :  { %v6117_v44 = vsel %vm8455_vm3, %v6116_v26, -1e+30 }
0x2012   :  { %v6279_v52 = vpop.f32.mrf.mxu0  ;;  %v6118_v53 = vsel %vm184_vm2, %v6117_v44, -inf }
0x2013   :  { %v6283_v54 = vmul.f32 0.35355338, %v6279_v52  ;;  %6119 = vmax.xlane.f32.xlu0 %v6118_v53 }
0x2014   :  { %v8010_v55 = vpop.f32.mrf.mxu0 }
0x2015   :  { %v9358_v27 = vsel %vm8455_vm3, %v6283_v54, -1e+30 }
0x2016   :  { %v6446_v1 = vpop.f32.mrf.mxu0  ;;  %v6285_v0 = vsel %vm184_vm2, %v9358_v27, -inf }
0x2017   :  { %v6450_v56 = vmul.f32 0.35355338, %v6446_v1  ;;  %6286 = vmax.xlane.f32.xlu1 %v6285_v0 }
0x2018   :  { %v8020_v57 = vpop.f32.mrf.mxu0 }
0x2019   :  { %v6451_v59 = vsel %vm8455_vm3, %v6450_v56, -1e+30 }
0x201a   :  { %v6613_v62 = vpop.f32.mrf.mxu0  ;;  %v6452_v45 = vsel %vm184_vm2, %v6451_v59, -inf }
0x201b   :  { %6453 = vmax.xlane.f32.xlu0 %v6452_v45  ;;  %v6617_v11 = vmul.f32 0.35355338, %v6613_v62 }
0x201c   :  { %v8030_v4 = vpop.f32.mrf.mxu0 }
0x201d   :  { %v5439_v51 = vpop.xlane.xlu0 %5438  ;;  %v6618_v12 = vsel %vm8455_vm3, %v6617_v11, -1e+30 }
0x201e   :  { %v5440_v6 = vsub.f32 %v5436_v17, %v5439_v51  ;;  %v6619_v13 = vsel %vm184_vm2, %v6618_v12, -inf }
0x2020   :  { %v5441_v7 = vmul.f32 1.442695, %v5440_v6 }
0x2022   :  { %8240 = vpow2.f32 %v5441_v7 }
0x2028   :  { %5448 = vrot.lane.b32.xlu1 %v9280_v63, %s8291_s28 }
0x202f   :  { %v8241_v8 = vpop.eup %8240 }
0x2030   :  { %v5443_v10 = vsel %vm184_vm2, %v8241_v8, 0.0 }
0x2031   :  { %5444 = vadd.xlane.f32.xlu0 %v5443_v10 }
0x2047   :  { %5615 = vrot.lane.b32.xlu0 %v9280_v63, %s8292_s29 }
0x204c   :  { %6620 = vmax.xlane.f32.xlu1 %v6619_v13 }
0x205d   :  { %5782 = vrot.lane.b32.xlu1 %v9280_v63, %s8293_s30 }
0x2061   :  { %5949 = vrot.lane.b32.xlu1 %v9280_v63, %s8294_s11 }
0x2065   :  { %6129 = vrot.lane.b32.xlu1 %v9291_v29, %s8291_s28 }
0x2090   :  { %v5606_v32 = vpop.xlane.xlu1 %5605 }
0x2091   :  { %v5607_v14 = vsub.f32 %v5603_v9, %v5606_v32 }
0x2093   :  { %v5608_v2 = vmul.f32 1.442695, %v5607_v14 }
0x2094   :  { %v5773_v15 = vpop.xlane.xlu0 %5772 }
0x2095   :  { %8242 = vpow2.f32 %v5608_v2  ;;  %v5774_v61 = vsub.f32 %v5770_v35, %v5773_v15 }
0x2097   :  { %v5775_v49 = vmul.f32 1.442695, %v5774_v61 }
0x2098   :  { %v5940_v3 = vpop.xlane.xlu0 %5939 }
0x2099   :  { %8244 = vpow2.f32 %v5775_v49  ;;  %v5941_v5 = vsub.f32 %v5937_v47, %v5940_v3 }
0x209b   :  { %v5942_v37 = vmul.f32 1.442695, %v5941_v5 }
0x209c   :  { %v6120_v16 = vpop.xlane.xlu0 %6119 }
0x209d   :  { %8246 = vpow2.f32 %v5942_v37  ;;  %v6121_v17 = vsub.f32 %v6117_v44, %v6120_v16 }
0x209f   :  { %v6122_v36 = vmul.f32 1.442695, %v6121_v17 }
0x20a0   :  { %v6287_v18 = vpop.xlane.xlu1 %6286 }
0x20a1   :  { %8248 = vpow2.f32 %v6122_v36  ;;  %v6288_v26 = vsub.f32 %v9358_v27, %v6287_v18 }
0x20a2   :  { %v8243_v63 = vpop.eup %8242 }
0x20a3   :  { %v5610_v20 = vsel %vm184_vm2, %v8243_v63, 0.0  ;;  %v6289_v52 = vmul.f32 1.442695, %v6288_v26 }
0x20a4   :  { %5611 = vadd.xlane.f32.xlu1 %v5610_v20  ;;  %v5449_v21 = vpop.permute.xlu1 %5448  ;;  %v6454_v9 = vpop.xlane.xlu0 %6453 }
0x20a5   :  { %v6455_v19 = vsub.f32 %v6451_v59, %v6454_v9  ;;  %7962 = vmatpush3.msra.mxu1 %v5449_v21 }
0x20a6   :  { %v8245_v22 = vpop.eup %8244  ;;  %7971 = vmatprep.subr.mxu1 %v8289_v39 }
0x20a7   :  { %v6456_v23 = vmul.f32 1.442695, %v6455_v19  ;;  %v5777_v31 = vsel %vm184_vm2, %v8245_v22, 0.0 }
0x20a8   :  { %5778 = vadd.xlane.f32.xlu0 %v5777_v31 }
0x20a9   :  { %8250 = vpow2.f32 %v6456_v23 }
0x20aa   :  { %v8247_v35 = vpop.eup %8246 }
0x20ab   :  { %v5944_v40 = vsel %vm184_vm2, %v8247_v35, 0.0 }
0x20ac   :  { %5945 = vadd.xlane.f32.xlu1 %v5944_v40 }
0x20ae   :  { %v8249_v41 = vpop.eup %8248 }
0x20af   :  { %v6124_v42 = vsel %vm184_vm2, %v8249_v41, 0.0 }
0x20b0   :  { %6125 = vadd.xlane.f32.xlu0 %v6124_v42  ;;  %v7291_v42 = vld [vmem:[%s9584_s4 + $0x68] sm:$0xff] }
0x20b6   :  { %v9384_v46 = vpop.eup %8250 }
0x20b7   :  { %v6458_v47 = vsel %vm184_vm2, %v9384_v46, 0.0 }
0x20b8   :  { %6459 = vadd.xlane.f32.xlu0 %v6458_v47 }
0x20ba   :  { %v5445_v48 = vpop.xlane.xlu0 %5444 }
0x20bb   :  { %8252 = vrcp.f32 %v5445_v48 }
0x20bc   :  { %8254 = vpow2.f32 %v6289_v52 }
0x20bd   :  { %6296 = vrot.lane.b32.xlu1 %v9291_v29, %s8292_s29 }
0x20be   :  { %v5616_v44 = vpop.permute.xlu0 %5615 }
0x20c8   :  { %v8253_v30 = vpop.eup %8252 }
0x20c9   :  { %v5447_v43 = vmul.f32 %v8253_v30, %v8241_v8  ;;  %v8255_v1 = vpop.eup %8254 }
0x20ca   :  { %v6291_v0 = vsel %vm184_vm2, %v8255_v1, 0.0 }
0x20cb   :  { %7964 = vmatmul.mubr.msk.f32.vlgmr.msra.gmra.mxu1 %vm184_vm2, %v5447_v43 }
0x20cc   :  { %7972 = vmatpush3.msra.mxu1 %v5616_v44  ;;  %7973 = vmatprep.mubr.msk.f32.mxu1 %vm8290_vm1, %v8289_v39 }
0x20cd   :  { %7981 = vmatprep.subr.mxu1 %v8289_v39 }
0x20d5   :  { %v6621_v53 = vpop.xlane.xlu1 %6620 }
0x20d6   :  { %v6622_v54 = vsub.f32 %v6618_v12, %v6621_v53 }
0x20d8   :  { %v6623_v55 = vmul.f32 1.442695, %v6622_v54 }
0x20d9   :  { %v5783_v57 = vpop.permute.xlu1 %5782 }
0x20da   :  { %8256 = vpow2.f32 %v6623_v55 }
0x20dd   :  { %v5950_v59 = vpop.permute.xlu1 %5949 }
0x20e1   :  { %6292 = vadd.xlane.f32.xlu1 %v6291_v0  ;;  %v6130_v62 = vpop.permute.xlu1 %6129 }
0x20e7   :  { %v8257_v27 = vpop.eup %8256 }
0x20e8   :  { %v6625_v56 = vsel %vm184_vm2, %v8257_v27, 0.0 }
0x20e9   :  { %6626 = vadd.xlane.f32.xlu0 %v6625_v56 }
0x20f2   :  { %6630 = vrot.lane.b32.xlu1 %v9291_v29, %s8294_s11 }
0x20ff   :  { %6463 = vrot.lane.b32.xlu0 %v9291_v29, %s8293_s30 }
0x212d   :  { %v5612_v45 = vpop.xlane.xlu1 %5611 }
0x212e   :  { %8258 = vrcp.f32 %v5612_v45 }
0x2131   :  { %v5779_v4 = vpop.xlane.xlu0 %5778 }
0x2132   :  { %8260 = vrcp.f32 %v5779_v4  ;;  %v9455_v4 = vld [vmem:[%s9582_s8 + $0x8] sm:$0xff] }
0x2135   :  { %v5946_v51 = vpop.xlane.xlu1 %5945 }
0x2136   :  { %8262 = vrcp.f32 %v5946_v51  ;;  %v6724_v51 = vrot.slane %v9455_v4, %v1550_v33 }
0x2139   :  { %v6126_v6 = vpop.xlane.xlu0 %6125  ;;  %v6297_v14 = vpop.permute.xlu1 %6296 }
0x213a   :  { %8264 = vrcp.f32 %v6126_v6 }
0x213b   :  { %v8259_v7 = vpop.eup %8258 }
0x213c   :  { %v5614_v8 = vmul.f32 %v8259_v7, %v8243_v63 }
0x213e   :  { %7974 = vmatmul.mubr.msk.f32.vlgmr.msra.gmra.mxu1 %vm184_vm2, %v5614_v8 }
0x213f   :  { %v8261_v10 = vpop.eup %8260  ;;  %7982 = vmatpush3.msra.mxu1 %v5783_v57  ;;  %7983 = vmatprep.mubr.msk.f32.mxu1 %vm8290_vm1, %v8289_v39 }
0x2140   :  { %7991 = vmatprep.subr.mxu1 %v8289_v39  ;;  %v5781_v29 = vmul.f32 %v8261_v10, %v8245_v22 }
0x2141   :  { %v6460_v2 = vpop.xlane.xlu0 %6459 }
0x2142   :  { %7984 = vmatmul.mubr.msk.f32.vlgmr.msra.gmra.mxu1 %vm184_vm2, %v5781_v29 }
0x2143   :  { %v8263_v11 = vpop.eup %8262  ;;  %7992 = vmatpush3.msra.mxu1 %v5950_v59  ;;  %7993 = vmatprep.mubr.msk.f32.mxu1 %vm8290_vm1, %v8289_v39 }
0x2144   :  { %8001 = vmatprep.subr.mxu1 %v8289_v39  ;;  %v5948_v12 = vmul.f32 %v8263_v11, %v8247_v35 }
0x2146   :  { %7994 = vmatmul.mubr.msk.f32.vlgmr.msra.gmra.mxu1 %vm184_vm2, %v5948_v12 }
0x2147   :  { %v8265_v13 = vpop.eup %8264  ;;  %8002 = vmatpush3.msra.mxu1 %v6130_v62  ;;  %8003 = vmatprep.mubr.msk.f32.mxu1 %vm8290_vm1, %v8289_v39 }
0x2148   :  { %8011 = vmatprep.subr.mxu1 %v8289_v39  ;;  %v6128_v32 = vmul.f32 %v8265_v13, %v8249_v41  ;;  %v7292_v41 = vld [vmem:[%s9584_s4 + $0x70] sm:$0xff] }
0x214a   :  { %8004 = vmatmul.mubr.msk.f32.vlgmr.msra.gmra.mxu1 %vm184_vm2, %v6128_v32 }
0x214b   :  { %8012 = vmatpush3.msra.mxu1 %v6297_v14  ;;  %8013 = vmatprep.mubr.msk.f32.mxu1 %vm8290_vm1, %v8289_v39 }
0x214c   :  { %8021 = vmatprep.subr.mxu1 %v8289_v39 }
0x216a   :  { %v6293_v15 = vpop.xlane.xlu1 %6292 }
0x216b   :  { %8266 = vrcp.f32 %v6293_v15 }
0x216c   :  { %8268 = vrcp.f32 %v6460_v2 }
0x216e   :  { %v6631_v17 = vpop.permute.xlu1 %6630 }
0x2172   :  { %v6627_v61 = vpop.xlane.xlu0 %6626 }
0x2173   :  { %8270 = vrcp.f32 %v6627_v61 }
0x2176   :  { %v6464_v37 = vpop.permute.xlu0 %6463 }
0x2178   :  { %v8267_v49 = vpop.eup %8266 }
0x2179   :  { %v6295_v3 = vmul.f32 %v8267_v49, %v8255_v1  ;;  %v8269_v5 = vpop.eup %8268 }
0x217a   :  { %v6462_v16 = vmul.f32 %v8269_v5, %v9384_v46  ;;  %v7290_v46 = vld [vmem:[%s9584_s4 + $0x60] sm:$0xff]  ;;  %v6849_v5 = vld [vmem:[%s9586_s5 + $0x38] sm:$0xff] }
0x217b   :  { %8014 = vmatmul.mubr.msk.f32.vlgmr.msra.gmra.mxu1 %vm184_vm2, %v6295_v3 }
0x217c   :  { %8022 = vmatpush3.msra.mxu1 %v6464_v37  ;;  %8023 = vmatprep.mubr.msk.f32.mxu1 %vm8290_vm1, %v8289_v39  ;;  %v6848_v37 = vld [vmem:[%s9586_s5 + $0x28] sm:$0xff] }
0x217d   :  { %8031 = vmatprep.subr.mxu1 %v8289_v39 }
0x217f   :  { %8024 = vmatmul.mubr.msk.f32.vlgmr.msra.gmra.mxu1 %vm184_vm2, %v6462_v16  ;;  %v6847_v16 = vld [vmem:[%s9586_s5 + $0x18] sm:$0xff] }
0x2180   :  { %v8271_v36 = vpop.eup %8270  ;;  %8032 = vmatpush3.msra.mxu1 %v6631_v17  ;;  %8033 = vmatprep.mubr.msk.f32.mxu1 %vm8290_vm1, %v8289_v39  ;;  %v7293_v39 = vld [vmem:[%s9584_s4 + $0x78] sm:$0xff]  ;;  %v6846_v17 = vld [vmem:[%s9586_s5 + $0x8] sm:$0xff] }
0x2181   :  { %v6629_v18 = vmul.f32 %v8271_v36, %v8257_v27  ;;  %8036 = vmatprep.subr.mxu0 %v7293_v39  ;;  %8047 = vmatprep.subr.mxu1 %v6849_v5 }
0x2182   :  { %8037 = vmatpush3.msra.mxu0 %v7293_v39 }
0x2183   :  { %8034 = vmatmul.mubr.msk.f32.vlgmr.msra.gmra.mxu1 %vm184_vm2, %v6629_v18  ;;  %8038 = vmatprep.subr.mxu0 %v7292_v41 }
0x2184   :  { %8039 = vmatpush3.msra.mxu0 %v7292_v41  ;;  %8048 = vmatpush3.msra.mxu1 %v6849_v5 }
0x2185   :  { %8040 = vmatprep.subr.mxu0 %v7291_v42  ;;  %8049 = vmatprep.subr.mxu1 %v6848_v37 }
0x2186   :  { %8041 = vmatpush3.msra.mxu0 %v7291_v42  ;;  %8050 = vmatpush3.msra.mxu1 %v6848_v37 }
0x2187   :  { %8042 = vmatprep.subr.mxu0 %v7290_v46  ;;  %8051 = vmatprep.subr.mxu1 %v6847_v16 }
0x2188   :  { %8043 = vmatpush3.msra.mxu0 %v7290_v46  ;;  %8052 = vmatpush3.msra.mxu1 %v6847_v16 }
0x2189   :  { %8053 = vmatprep.subr.mxu1 %v6846_v17 }
0x218a   :  { %8054 = vmatpush3.msra.mxu1 %v6846_v17  ;;  %v6972_v17 = vrot.slane %v9455_v4, %v3226_v24 }
0x218b   :  { %v5520_v63 = vpop.f32.mrf.mxu1 }
0x218d   :  { %v7965_v20 = vpop.f32.mrf.mxu1 }
0x21fe   :  { %v5687_v21 = vpop.f32.mrf.mxu1 }
0x21ff   :  { %6026 = vrot.lane.b32.xlu0 %v5687_v21, %s8302_s18 }
0x2200   :  { %v7975_v9 = vpop.f32.mrf.mxu1 }
0x2202   :  { %v5854_v19 = vpop.f32.mrf.mxu1 }
0x2203   :  { %6030 = vrot.lane.b32.xlu1 %v5854_v19, %s8303_s19  ;;  %v6837_v19 = vrot.slane %v9455_v4, %v8401_v28 }
0x2204   :  { %v7985_v22 = vpop.f32.mrf.mxu1 }
0x2206   :  { %v6021_v23 = vpop.f32.mrf.mxu1 }
0x2207   :  { %6034 = vrot.lane.b32.xlu1 %v6021_v23, %s8304_s26 }
0x2208   :  { %v7995_v31 = vpop.f32.mrf.mxu1 }
0x2209   :  { %v6843_v31 = vrot.slane %v9455_v4, %v3339_v60  ;;  %v6864_v60 = vld [vmem:[%s9587_s6 + $0xf0] sm:$0xff] }
0x220a   :  { %v6201_v35 = vpop.f32.mrf.mxu1 }
0x220c   :  { %v8005_v40 = vpop.f32.mrf.mxu1 }
0x223b   :  { %v6368_v47 = vpop.f32.mrf.mxu1 }
0x223c   :  { %6707 = vrot.lane.b32.xlu0 %v6368_v47, %s8302_s18  ;;  %v6865_v47 = vld [vmem:[%s9587_s6 + $0xf8] sm:$0xff] }
0x223d   :  { %v8015_v48 = vpop.f32.mrf.mxu1  ;;  %8058 = vmatprep.subr.mxu0 %v6865_v47 }
0x223e   :  { %v6863_v48 = vld [vmem:[%s9587_s6 + $0xe8] sm:$0xff] }
0x223f   :  { %v6535_v30 = vpop.f32.mrf.mxu1 }
0x2240   :  { %6711 = vrot.lane.b32.xlu0 %v6535_v30, %s8303_s19  ;;  %v6862_v30 = vld [vmem:[%s9587_s6 + $0xe0] sm:$0xff] }
0x2241   :  { %v8025_v26 = vpop.f32.mrf.mxu1 }
0x2242   :  { %v6861_v26 = vld [vmem:[%s9587_s6 + $0xd8] sm:$0xff] }
0x2243   :  { %v6702_v43 = vpop.f32.mrf.mxu1 }
0x2244   :  { %6715 = vrot.lane.b32.xlu1 %v6702_v43, %s8304_s26  ;;  %v6860_v43 = vld [vmem:[%s9587_s6 + $0xd0] sm:$0xff] }
0x2245   :  { %v8035_v44 = vpop.f32.mrf.mxu1 }
0x2246   :  { %v6859_v44 = vld [vmem:[%s9587_s6 + $0xc8] sm:$0xff] }
0x2271   :  { %v6027_v52 = vpop.permute.xlu0 %6026 }
0x2272   :  { %v6037_v54 = vsel %vm184_vm2, %v5520_v63, %v6027_v52  ;;  %v6858_v52 = vld [vmem:[%s9587_s6 + $0xc0] sm:$0xff] }
0x2275   :  { %v6031_v53 = vpop.permute.xlu1 %6030 }
0x2276   :  { %v6038_v55 = vsel %vm862_vm4, %v6037_v54, %v6031_v53  ;;  %v6857_v53 = vld [vmem:[%s9587_s6 + $0xb8] sm:$0xff]  ;;  %v6856_v54 = vld [vmem:[%s9587_s6 + $0xb0] sm:$0xff] }
0x2279   :  { %v6035_v1 = vpop.permute.xlu1 %6034 }
0x227a   :  { %v6039_v0 = vsel %vm864_vm5, %v6038_v55, %v6035_v1  ;;  %v6855_v55 = vld [vmem:[%s9587_s6 + $0xa8] sm:$0xff]  ;;  %v6854_v1 = vld [vmem:[%s9587_s6 + $0xa0] sm:$0xff] }
0x227b   :  { %8044 = vmatprep.mubr.msk.f32.mxu0 %vm47_vm0, %v6039_v0  ;;  %v6853_v0 = vld [vmem:[%s9587_s6 + $0x98] sm:$0xff] }
0x22ae   :  { %v6708_v27 = vpop.permute.xlu0 %6707 }
0x22af   :  { %v6718_v57 = vsel %vm184_vm2, %v6201_v35, %v6708_v27  ;;  %v6852_v27 = vld [vmem:[%s9587_s6 + $0x90] sm:$0xff] }
0x22b2   :  { %v6712_v56 = vpop.permute.xlu0 %6711 }
0x22b3   :  { %v6719_v59 = vsel %vm862_vm4, %v6718_v57, %v6712_v56  ;;  %v6851_v56 = vld [vmem:[%s9587_s6 + $0x88] sm:$0xff]  ;;  %v6850_v57 = vld [vmem:[%s9587_s6 + $0x80] sm:$0xff] }
0x22b6   :  { %v6716_v62 = vpop.permute.xlu1 %6715 }
0x22b7   :  { %v6720_v45 = vsel %vm864_vm5, %v6719_v59, %v6716_v62  ;;  %v8288_v59 = vld [vmem:[%s9588_s7] sm:$0x3] }
0x22b8   :  { %8045 = vmatmul.mubr.msk.f32.vlgmr.msra.gmra.mxu0 %vm47_vm0, %v6720_v45  ;;  %v6869_v62 = vrot.slane %v8288_v59, %v8401_v28 }
0x22b9   :  { %8059 = vmatpush3.msra.mxu0 %v6865_v47  ;;  %v7090_v47 = vld [vmem:[%s9589_s9 + $0x10] sm:$0xff] }
0x22ba   :  { %8060 = vmatprep.subr.mxu0 %v6864_v60 }
0x22bb   :  { %8061 = vmatpush3.msra.mxu0 %v6864_v60  ;;  %v7089_v60 = vld [vmem:[%s9589_s9 + $0x8] sm:$0xff] }
0x22bc   :  { %8062 = vmatprep.subr.mxu0 %v6863_v48 }
0x22bd   :  { %8063 = vmatpush3.msra.mxu0 %v6863_v48  ;;  %v7088_v48 = vld [vmem:[%s9589_s9] sm:$0xff] }
0x22be   :  { %8064 = vmatprep.subr.mxu0 %v6862_v30 }
0x22bf   :  { %8065 = vmatpush3.msra.mxu0 %v6862_v30 }
0x22c0   :  { %8066 = vmatprep.subr.mxu0 %v6861_v26 }
0x22c1   :  { %8067 = vmatpush3.msra.mxu0 %v6861_v26 }
0x22c2   :  { %8068 = vmatprep.subr.mxu0 %v6860_v43 }
0x22c3   :  { %8069 = vmatpush3.msra.mxu0 %v6860_v43 }
0x22c4   :  { %8070 = vmatprep.subr.mxu0 %v6859_v44 }
0x22c5   :  { %8071 = vmatpush3.msra.mxu0 %v6859_v44 }
0x22c6   :  { %8072 = vmatprep.subr.mxu0 %v6858_v52 }
0x22c7   :  { %8073 = vmatpush3.msra.mxu0 %v6858_v52 }
0x22c8   :  { %8074 = vmatprep.subr.mxu0 %v6857_v53 }
0x22c9   :  { %8075 = vmatpush3.msra.mxu0 %v6857_v53 }
0x22ca   :  { %8076 = vmatprep.subr.mxu0 %v6856_v54 }
0x22cb   :  { %8077 = vmatpush3.msra.mxu0 %v6856_v54 }
0x22cc   :  { %8078 = vmatprep.subr.mxu0 %v6855_v55 }
0x22cd   :  { %8079 = vmatpush3.msra.mxu0 %v6855_v55  ;;  %v7079_v55 = vrot.slane %v9455_v4, %v3474_v58 }
0x22ce   :  { %8080 = vmatprep.subr.mxu0 %v6854_v1 }
0x22cf   :  { %8081 = vmatpush3.msra.mxu0 %v6854_v1 }
0x22d0   :  { %8082 = vmatprep.subr.mxu0 %v6853_v0 }
0x22d1   :  { %8083 = vmatpush3.msra.mxu0 %v6853_v0 }
0x22d2   :  { %8084 = vmatprep.subr.mxu0 %v6852_v27 }
0x22d3   :  { %8085 = vmatpush3.msra.mxu0 %v6852_v27 }
0x22d4   :  { %8086 = vmatprep.subr.mxu0 %v6851_v56 }
0x22d5   :  { %8087 = vmatpush3.msra.mxu0 %v6851_v56 }
0x22d6   :  { %8088 = vmatprep.subr.mxu0 %v6850_v57 }
0x22d7   :  { %8089 = vmatpush3.msra.mxu0 %v6850_v57  ;;  %v7085_v57 = vrot.slane %v9455_v4, %v3581_v34 }
0x2378   :  { %v8046_v6 = vpop.f32.mrf.mxu0 }
0x2379   :  { %v6803_v7 = vadd.f32 %v8046_v6, %v6724_v51 }
0x237a   :  { %v6797_v8 = vpop.f32.mrf.mxu0 }
0x237b   :  { %v9461_v10 = vadd.f32 %v6803_v7, %v9231_v50  ;;  %v6798_v29 = vadd.f32 %v6797_v8, %v6724_v51 }
0x237d   :  { %v9464_v11 = vadd.f32 %v6798_v29, %v9234_v38  ;;  %v6811_v12 = vsel %vm47_vm0, %v9461_v10, 0.0 }
0x237e   :  { %6812 = vadd.xlane.f32.xlu1 %v6811_v12 }
0x237f   :  { %v6808_v13 = vsel %vm47_vm0, %v9464_v11, 0.0 }
0x2380   :  { %6809 = vadd.xlane.f32.xlu0 %v6808_v13 }
0x2407   :  { %v6813_v32 = vpop.xlane.xlu1 %6812 }
0x2408   :  { %v6815_v33 = vmul.f32 0.03125, %v6813_v32 }
0x2409   :  { %v6810_v14 = vpop.xlane.xlu0 %6809 }
0x240a   :  { %v6814_v2 = vmul.f32 0.03125, %v6810_v14  ;;  %v6817_v15 = vsub.f32 %v9461_v10, %v6815_v33 }
0x240c   :  { %v6816_v50 = vsub.f32 %v9464_v11, %v6814_v2  ;;  %v6819_v49 = vmul.f32 %v6817_v15, %v6817_v15 }
0x240e   :  { %v6818_v61 = vmul.f32 %v6816_v50, %v6816_v50  ;;  %v6823_v3 = vsel %vm47_vm0, %v6819_v49, 0.0 }
0x2410   :  { %v6820_v38 = vsel %vm47_vm0, %v6818_v61, 0.0 }
0x2411   :  { %6821 = vadd.xlane.f32.xlu0 %v6820_v38 }
0x2415   :  { %6824 = vadd.xlane.f32.xlu0 %v6823_v3 }
0x249a   :  { %v6822_v36 = vpop.xlane.xlu0 %6821 }
0x249b   :  { %v6826_v18 = vmul.f32 0.03125, %v6822_v36 }
0x249d   :  { %v6828_v63 = vadd.f32 1e-05, %v6826_v18 }
0x249e   :  { %v6825_v20 = vpop.xlane.xlu0 %6824 }
0x249f   :  { %8272 = vrsqrt.f32 %v6828_v63  ;;  %v6827_v21 = vmul.f32 0.03125, %v6825_v20 }
0x24a1   :  { %v6829_v9 = vadd.f32 1e-05, %v6827_v21 }
0x24a3   :  { %8274 = vrsqrt.f32 %v6829_v9 }
0x24ac   :  { %v8273_v22 = vpop.eup %8272 }
0x24ad   :  { %v6832_v23 = vmul.f32 %v8273_v22, %v6816_v50 }
0x24af   :  { %v6838_v35 = vmul.f32 %v6837_v19, %v6832_v23 }
0x24b0   :  { %v8275_v40 = vpop.eup %8274 }
0x24b1   :  { %v6833_v39 = vmul.f32 %v8275_v40, %v6817_v15  ;;  %v6844_v41 = vadd.f32 %v6843_v31, %v6838_v35 }
0x24b3   :  { %v6839_v42 = vmul.f32 %v6837_v19, %v6833_v39  ;;  %8055 = vmatprep.mubr.msk.f32.mxu1 %vm47_vm0, %v6844_v41 }
0x24b5   :  { %v6845_v46 = vadd.f32 %v6843_v31, %v6839_v42 }
0x24b7   :  { %8056 = vmatmul.mubr.msk.f32.vlgmr.msra.gmra.mxu1 %vm47_vm0, %v6845_v46 }
0x2577   :  { %v8057_v45 = vpop.f32.mrf.mxu1 }
0x2578   :  { %v6948_v51 = vadd.f32 %v8057_v45, %v6869_v62 }
0x2579   :  { %v6942_v6 = vpop.f32.mrf.mxu1 }
0x257a   :  { %v6954_v7 = vmul.f32 0.044715, %v6948_v51  ;;  %v6943_v8 = vadd.f32 %v6942_v6, %v6869_v62  ;;  %v6952_v5 = vmul.f32 0.5, %v6948_v51 }
0x257c   :  { %v6956_v29 = vmul.f32 %v6954_v7, %v6948_v51  ;;  %v6953_v12 = vmul.f32 0.044715, %v6943_v8  ;;  %v6951_v28 = vmul.f32 0.5, %v6943_v8 }
0x257e   :  { %v6958_v13 = vmul.f32 %v6956_v29, %v6948_v51  ;;  %v6955_v32 = vmul.f32 %v6953_v12, %v6943_v8 }
0x2580   :  { %v6960_v33 = vadd.f32 %v6958_v13, %v6948_v51  ;;  %v6957_v14 = vmul.f32 %v6955_v32, %v6943_v8 }
0x2582   :  { %v6959_v2 = vadd.f32 %v6957_v14, %v6943_v8  ;;  %v6962_v15 = vmul.f32 0.7978846, %v6960_v33 }
0x2584   :  { %v6961_v50 = vmul.f32 0.7978846, %v6959_v2  ;;  %8276 = vtanh.f32 %v6962_v15 }
0x2586   :  { %8278 = vtanh.f32 %v6961_v50 }
0x2591   :  { %v8277_v61 = vpop.eup %8276 }
0x2592   :  { %v6966_v49 = vadd.f32 1.0, %v8277_v61 }
0x2593   :  { %v8279_v38 = vpop.eup %8278 }
0x2594   :  { %v6965_v3 = vadd.f32 1.0, %v8279_v38  ;;  %v6968_v16 = vmul.f32 %v6966_v49, %v6952_v5 }
0x2596   :  { %v6967_v37 = vmul.f32 %v6965_v3, %v6951_v28 }
0x2598   :  { %8090 = vmatprep.mubr.f32.mxu0 %v6967_v37 }
0x2599   :  { %8091 = vmatmul.mubr.f32.vlgmr.msra.gmra.mxu0 %v6968_v16 }
0x2659   :  { %v8092_v36 = vpop.f32.mrf.mxu0 }
0x265a   :  { %v7045_v18 = vadd.f32 %v8092_v36, %v6972_v17 }
0x265b   :  { %v7039_v63 = vpop.f32.mrf.mxu0 }
0x265c   :  { %v7049_v20 = vadd.f32 %v7045_v18, %v9461_v10  ;;  %v7040_v21 = vadd.f32 %v7039_v63, %v6972_v17 }
0x265e   :  { %v7048_v9 = vadd.f32 %v7040_v21, %v9464_v11  ;;  %v7053_v19 = vsel %vm47_vm0, %v7049_v20, 0.0  ;;  %v7091_v11 = vld [vmem:[%s9589_s9 + $0x18] sm:$0xff] }
0x265f   :  { %7054 = vadd.xlane.f32.xlu1 %v7053_v19  ;;  %8093 = vmatprep.subr.mxu1 %v7091_v11 }
0x2660   :  { %v7050_v22 = vsel %vm47_vm0, %v7048_v9, 0.0  ;;  %8094 = vmatpush3.msra.mxu1 %v7091_v11 }
0x2661   :  { %7051 = vadd.xlane.f32.xlu0 %v7050_v22  ;;  %8095 = vmatprep.subr.mxu1 %v7090_v47 }
0x2662   :  { %8096 = vmatpush3.msra.mxu1 %v7090_v47 }
0x2663   :  { %8097 = vmatprep.subr.mxu1 %v7089_v60 }
0x2664   :  { %8098 = vmatpush3.msra.mxu1 %v7089_v60 }
0x2665   :  { %8099 = vmatprep.subr.mxu1 %v7088_v48 }
0x2666   :  { %8100 = vmatpush3.msra.mxu1 %v7088_v48 }
0x26e8   :  { %v7055_v23 = vpop.xlane.xlu1 %7054 }
0x26e9   :  { %v7057_v31 = vmul.f32 0.03125, %v7055_v23 }
0x26ea   :  { %v7052_v35 = vpop.xlane.xlu0 %7051 }
0x26eb   :  { %v7059_v40 = vsub.f32 %v7049_v20, %v7057_v31  ;;  %v7056_v39 = vmul.f32 0.03125, %v7052_v35 }
0x26ed   :  { %v7058_v24 = vsub.f32 %v7048_v9, %v7056_v39  ;;  %v7061_v41 = vmul.f32 %v7059_v40, %v7059_v40 }
0x26ef   :  { %v7065_v42 = vsel %vm47_vm0, %v7061_v41, 0.0  ;;  %v7060_v46 = vmul.f32 %v7058_v24, %v7058_v24 }
0x26f0   :  { %7066 = vadd.xlane.f32.xlu1 %v7065_v42 }
0x26f1   :  { %v7062_v10 = vsel %vm47_vm0, %v7060_v46, 0.0 }
0x26f2   :  { %7063 = vadd.xlane.f32.xlu0 %v7062_v10 }
0x2779   :  { %v7067_v30 = vpop.xlane.xlu1 %7066 }
0x277a   :  { %v7069_v26 = vmul.f32 0.03125, %v7067_v30 }
0x277b   :  { %v7064_v43 = vpop.xlane.xlu0 %7063 }
0x277c   :  { %v7071_v44 = vadd.f32 1e-05, %v7069_v26  ;;  %v7068_v52 = vmul.f32 0.03125, %v7064_v43 }
0x277e   :  { %8280 = vrsqrt.f32 %v7071_v44  ;;  %v7070_v53 = vadd.f32 1e-05, %v7068_v52 }
0x2780   :  { %8282 = vrsqrt.f32 %v7070_v53 }
0x278b   :  { %v8281_v54 = vpop.eup %8280 }
0x278c   :  { %v7075_v1 = vmul.f32 %v8281_v54, %v7059_v40 }
0x278d   :  { %v8283_v0 = vpop.eup %8282 }
0x278e   :  { %v7074_v27 = vmul.f32 %v8283_v0, %v7058_v24  ;;  %v7081_v56 = vmul.f32 %v7079_v55, %v7075_v1 }
0x2790   :  { %v7080_v59 = vmul.f32 %v7079_v55, %v7074_v27  ;;  %v7087_v45 = vadd.f32 %v7085_v57, %v7081_v56 }
0x2792   :  { %v7086_v62 = vadd.f32 %v7085_v57, %v7080_v59 }
0x2794   :  { %8101 = vmatprep.mubr.msk.f32.mxu1 %vm47_vm0, %v7086_v62 }
0x2795   :  { %8102 = vmatmul.mubr.msk.f32.vlgmr.msra.gmra.mxu1 %vm47_vm0, %v7087_v45 }
0x2855   :  { %v8103_v51 = vpop.f32.mrf.mxu1 }
0x2856   :  { %7174 = vst [vmem:[%s9590_s10 + $0x8] sm:$0xff] %v8103_v51 }
0x2857   :  { %v7164_v58 = vpop.f32.mrf.mxu1 }
0x2858   :  { %7173 = vst [vmem:[%s9590_s10] sm:$0xff] %v7164_v58 }

</bundles_post_ra>
